<compile_context>
chip_gen: v5e
topology: v5e:2x2
jax: 0.10.0
libtpu: 0.0.40
codegen_flags: <defaults>
</compile_context>

<pallas_src>
import functools

import jax
import jax.numpy as jnp
import numpy as np
from jax import lax
from jax.experimental import pallas as pl
from jax.experimental.pallas import tpu as pltpu

LANE = 128
SUBLANE = 8
F32 = jnp.float32
BF16 = jnp.bfloat16


def _round_up(v, m):
    return (v + m - 1) // m * m


def _pad2(a, rows, cols):
    return jnp.pad(a, ((0, rows - a.shape[0]), (0, cols - a.shape[1])))


# ----------------------------------------------------------------------------
# Fused kernel: 6 x (GINConv + ReLU)  +  Set2Set(6)  +  fc1/ReLU + fc4.
# ----------------------------------------------------------------------------
def _netgine_kernel(eps_ref,                          # SMEM (L,) f32
                    x_ref, eattr_ref, S_ref, A_ref, B_ref,
                    be_w1, be_b1, be_w2, be_b2,       # (L,D,D) bf16 / (L,1,D) f32
                    mlp_w1, mlp_b1, mlp_w2, mlp_b2,
                    lstm_w, lstm_b,                   # (3D,4D) bf16 / (1,4D) f32
                    fc1_w, fc1_b, fc4_w, fc4_b,       # (2D,D) bf16 ... (1,D) f32
                    out_ref, *, dim_pad, steps, num_layers):
    D = dim_pad

    S = S_ref[...]                      # (E_pad, N_pad) bf16  gather matrix
    A = A_ref[...]                      # (N_pad, E_pad) bf16  scatter-add matrix
    eattr = eattr_ref[...]              # (E_pad, D)     bf16
    h0 = x_ref[...]                     # (N_pad, D)     f32

    # ---- 6 x (GINConv + outer ReLU); fori_loop bounds live ranges -----------
    def gin_body(l, h):
        e1 = jnp.maximum(
            jnp.dot(eattr, be_w1[l], preferred_element_type=F32) + be_b1[l], 0.0)
        e_emb = (jnp.dot(e1.astype(BF16), be_w2[l], preferred_element_type=F32)
                 + be_b2[l])
        x_j = jnp.dot(S, h.astype(BF16), preferred_element_type=F32)   # x[src[e]]
        msg = jnp.maximum(x_j + e_emb, 0.0)
        aggr = jnp.dot(A, msg.astype(BF16), preferred_element_type=F32)  # add @ dst
        z = (1.0 + eps_ref[l]) * h + aggr
        h1 = jnp.maximum(
            jnp.dot(z.astype(BF16), mlp_w1[l], preferred_element_type=F32)
            + mlp_b1[l], 0.0)
        return jnp.maximum(
            jnp.dot(h1.astype(BF16), mlp_w2[l], preferred_element_type=F32)
            + mlp_b2[l], 0.0)

    h = lax.fori_loop(0, num_layers, gin_body, h0)

    # ---- Set2Set: LSTM(2*dim -> dim), 6 processing steps ---------------------
    x_bf = h.astype(BF16)               # final node embeddings, MXU dtype
    x_t = x_bf.T                        # hoisted: one transpose, not one/step
    B = B_ref[...]                      # (G_pad, N_pad) graph membership (0/1)
    Bmask = B > 0.0
    Gp = B.shape[0]

    wl = lstm_w[...]
    bl = lstm_b[...]

    def s2s_body(_, carry):
        q, r, hs, c = carry
        # fused LSTM input matmul: [q|r|hs] (Gp,3D) @ (3D,4D); gate blocks
        # [i|f|g|o] each padded to D lanes -> aligned slices
        qrh = jnp.concatenate([q, r, hs], axis=1).astype(BF16)
        gates = jnp.dot(qrh, wl, preferred_element_type=F32) + bl       # (Gp, 4D)
        i_g = jax.nn.sigmoid(gates[:, 0:D])
        f_g = jax.nn.sigmoid(gates[:, D:2 * D])
        g_g = jnp.tanh(gates[:, 2 * D:3 * D])
        o_g = jax.nn.sigmoid(gates[:, 3 * D:4 * D])
        c = f_g * c + i_g * g_g
        hs = o_g * jnp.tanh(c)
        q = hs

        # attention: e_n = <x_n, q_{batch[n]}>, per-graph softmax, r_g = sum a_n x_n
        scores = jnp.dot(q.astype(BF16), x_t, preferred_element_type=F32)  # (Gp,N)
        seg_max = jnp.max(jnp.where(Bmask, scores, -1e30), axis=1, keepdims=True)
        # clamp to <= 0 so masked/padded rows can never overflow the exp
        expv = jnp.where(Bmask, jnp.exp(jnp.minimum(scores - seg_max, 0.0)), 0.0)
        den = jnp.sum(expv, axis=1, keepdims=True)
        den = jnp.where(den > 0.0, den, 1.0)       # empty/padded graphs -> 0, not NaN
        attn = expv * pl.reciprocal(den, approx=True)                   # EUP slot
        r = jnp.dot(attn.astype(BF16), x_bf, preferred_element_type=F32)
        return q, r, hs, c

    z0 = jnp.zeros((Gp, D), F32)
    q, r, _, _ = lax.fori_loop(0, steps, s2s_body, (z0, z0, z0, z0))

    # ---- fc1(relu) over q_star = [q, r] (single fused dot), then fc4 ---------
    qr = jnp.concatenate([q, r], axis=1).astype(BF16)                   # (Gp, 2D)
    h1 = jnp.maximum(
        jnp.dot(qr, fc1_w[...], preferred_element_type=F32) + fc1_b[...], 0.0)
    out_ref[...] = (jnp.dot(h1.astype(BF16), fc4_w[...],
                            preferred_element_type=F32) + fc4_b[...])


# ----------------------------------------------------------------------------
# Host-side parameter / graph-structure preparation (call once, reuse).
# ----------------------------------------------------------------------------
def prepare_params(convs, head, dim):
    """Pad + stack weights into MXU-friendly bf16 slabs (call once and cache)."""
    D = LANE
    cp = {}
    for name in ("be_w1", "be_w2", "mlp_w1", "mlp_w2"):
        cp[name] = jnp.stack([_pad2(p[name], D, D) for p in convs]).astype(BF16)
    for name in ("be_b1", "be_b2", "mlp_b1", "mlp_b2"):
        cp[name] = jnp.stack([_pad2(p[name], 1, D) for p in convs]).astype(F32)
    cp["eps"] = jnp.stack([p["eps"] for p in convs]).astype(F32)          # (L,)

    def pad_gate_cols(w):     # (rows, 4*dim) -> (rows, 4*D), each gate zero-padded
        return jnp.concatenate(
            [jnp.pad(w[:, k * dim:(k + 1) * dim], ((0, 0), (0, D - dim)))
             for k in range(4)], axis=1)

    wih = head["wih"]          # (2*dim, 4*dim), torch gate order i,f,g,o
    wq = jnp.pad(pad_gate_cols(wih[:dim]), ((0, D - dim), (0, 0)))
    wr = jnp.pad(pad_gate_cols(wih[dim:2 * dim]), ((0, D - dim), (0, 0)))
    wh = jnp.pad(pad_gate_cols(head["whh"]), ((0, D - dim), (0, 0)))
    hp = {}
    hp["lstm_w"] = jnp.concatenate([wq, wr, wh], axis=0).astype(BF16)     # (3D,4D)
    hp["lstm_b"] = pad_gate_cols(head["b"]).astype(F32)                   # (1,4D)
    fc1w = head["fc1_w"]       # (2*dim, dim)
    hp["fc1_w"] = jnp.concatenate(
        [_pad2(fc1w[:dim], D, D), _pad2(fc1w[dim:2 * dim], D, D)],
        axis=0).astype(BF16)                                              # (2D,D)
    hp["fc1_b"] = _pad2(head["fc1_b"], 1, D).astype(F32)
    hp["fc4_w"] = _pad2(head["fc4_w"], D, D).astype(BF16)
    hp["fc4_b"] = _pad2(head["fc4_b"], 1, D).astype(F32)
    return cp, hp


def build_graph_mats(src, dst, batch, num_nodes, num_edges, num_graphs):
    """Dense 0/1 gather / scatter-add / membership matrices, built directly in
    the MXU dtype.  They depend only on the (static) graph structure, so build
    them once and reuse across forward calls."""
    N_pad = _round_up(num_nodes, LANE)
    E_pad = _round_up(num_edges, LANE)
    G_pad = _round_up(num_graphs, SUBLANE)
    S = jnp.zeros((E_pad, N_pad), BF16).at[jnp.arange(num_edges), src].set(1.0)
    A = jnp.zeros((N_pad, E_pad), BF16).at[dst, jnp.arange(num_edges)].set(1.0)
    B = jnp.zeros((G_pad, N_pad), BF16).at[batch, jnp.arange(num_nodes)].set(1.0)
    return S, A, B


def net_gine_forward(x, edge_attr, graph_mats, params, num_graphs, out_dim,
                     *, steps=6):
    S, A, B = graph_mats
    cp, hp = params
    D = LANE
    E_pad, N_pad = S.shape
    G_pad = B.shape[0]
    num_layers = int(cp["be_w1"].shape[0])

    x_p = _pad2(x.astype(F32), N_pad, D)                  # f32 activation carry
    ea_p = _pad2(edge_attr.astype(F32), E_pad, D).astype(BF16)

    kernel = functools.partial(_netgine_kernel, dim_pad=D, steps=steps,
                               num_layers=num_layers)
    args = (cp["eps"], x_p, ea_p, S, A, B,
            cp["be_w1"], cp["be_b1"], cp["be_w2"], cp["be_b2"],
            cp["mlp_w1"], cp["mlp_b1"], cp["mlp_w2"], cp["mlp_b2"],
            hp["lstm_w"], hp["lstm_b"],
            hp["fc1_w"], hp["fc1_b"], hp["fc4_w"], hp["fc4_b"])

    # VMEM budget from the actual padded buffers (+ headroom for compiler
    # scratch / intermediates), capped for v7x's 64 MiB physical VMEM.
    total_bytes = sum(int(np.prod(a.shape)) * a.dtype.itemsize for a in args)
    total_bytes += G_pad * D * 4                           # output slab
    vmem_limit = int(min(max(2 * total_bytes + (8 << 20), 16 << 20), 48 << 20))

    in_specs = ([pl.BlockSpec(memory_space=pltpu.MemorySpace.SMEM)] +
                [pl.BlockSpec(memory_space=pltpu.MemorySpace.VMEM)] * (len(args) - 1))
    out_p = pl.pallas_call(
        kernel,
        out_shape=jax.ShapeDtypeStruct((G_pad, D), F32),
        in_specs=in_specs,
        out_specs=pl.BlockSpec(memory_space=pltpu.MemorySpace.VMEM),
        compiler_params=pltpu.CompilerParams(vmem_limit_bytes=vmem_limit),
    )(*args)
    return out_p[:num_graphs, :out_dim]


# ----------------------------------------------------------------------------
# Deterministic parameter initialization (synthetic, real/unpadded shapes).
# ----------------------------------------------------------------------------
def init_params(key, dim, num_features=6, edge_dim=4):
    keys = iter(jax.random.split(key, 64))

    def lin(k, fan_in, fan_out):
        kw, kb = jax.random.split(k)
        w = jax.random.normal(kw, (fan_in, fan_out), jnp.float32) / jnp.sqrt(
            jnp.float32(fan_in))
        b = 0.01 * jax.random.normal(kb, (1, fan_out), jnp.float32)
        return w, b

    convs = []
    dims = [(num_features, dim)] + [(dim, dim)] * 5
    for d1, d2 in dims:
        p = {}
        p["be_w1"], p["be_b1"] = lin(next(keys), edge_dim, d1)
        p["be_w2"], p["be_b2"] = lin(next(keys), d1, d1)
        p["mlp_w1"], p["mlp_b1"] = lin(next(keys), d1, d1)
        p["mlp_w2"], p["mlp_b2"] = lin(next(keys), d1, d2)
        p["eps"] = jnp.zeros((), jnp.float32)            # torch.nn.Parameter([0])
        convs.append(p)

    head = {}
    head["wih"], _ = lin(next(keys), 2 * dim, 4 * dim)   # LSTM W_ih^T (i,f,g,o)
    head["whh"], _ = lin(next(keys), dim, 4 * dim)       # LSTM W_hh^T
    head["b"] = 0.01 * jax.random.normal(next(keys), (1, 4 * dim), jnp.float32)
    head["fc1_w"], head["fc1_b"] = lin(next(keys), 2 * dim, dim)
    head["fc4_w"], head["fc4_b"] = lin(next(keys), dim, 12)
    return convs, head


# ----------------------------------------------------------------------------
# Pure-JAX f32 reference (index-based gather / segment-sum), validation only.
# ----------------------------------------------------------------------------
def ref_forward(x, edge_attr, src, dst, batch, num_graphs, convs, head, dim,
                steps=6):
    relu = jax.nn.relu
    h = x
    for p in convs:
        e1 = relu(edge_attr @ p["be_w1"] + p["be_b1"])
        e_emb = e1 @ p["be_w2"] + p["be_b2"]
        msg = relu(h[src] + e_emb)
        aggr = jax.ops.segment_sum(msg, dst, num_segments=h.shape[0])
        z = (1.0 + p["eps"]) * h + aggr
        h1 = relu(z @ p["mlp_w1"] + p["mlp_b1"])
        h = relu(h1 @ p["mlp_w2"] + p["mlp_b2"])

    G = num_graphs
    q = jnp.zeros((G, dim), jnp.float32)
    r = jnp.zeros((G, dim), jnp.float32)
    hs = jnp.zeros((G, dim), jnp.float32)
    c = jnp.zeros((G, dim), jnp.float32)
    wih, whh_, b = head["wih"], head["whh"], head["b"]
    for _ in range(steps):
        gates = q @ wih[:dim] + r @ wih[dim:] + hs @ whh_ + b
        i_g = jax.nn.sigmoid(gates[:, 0:dim])
        f_g = jax.nn.sigmoid(gates[:, dim:2 * dim])
        g_g = jnp.tanh(gates[:, 2 * dim:3 * dim])
        o_g = jax.nn.sigmoid(gates[:, 3 * dim:4 * dim])
        c = f_g * c + i_g * g_g
        hs = o_g * jnp.tanh(c)
        q = hs
        e = jnp.sum(h * q[batch], axis=1)
        e_max = jax.ops.segment_max(e, batch, num_segments=G)
        ev = jnp.exp(e - e_max[batch])
        den = jax.ops.segment_sum(ev, batch, num_segments=G)
        a = ev / den[batch]
        r = jax.ops.segment_sum(a[:, None] * h, batch, num_segments=G)

    h1 = relu(q @ head["fc1_w"][:dim] + r @ head["fc1_w"][dim:] + head["fc1_b"])
    return h1 @ head["fc4_w"] + head["fc4_b"]


if __name__ == "__main__":
    key = jax.random.PRNGKey(0)
    dim = 32
    num_features, edge_dim = 6, 4
    G, nodes_per_graph = 2, 8
    N = G * nodes_per_graph

    # small batched graph: a bidirectional ring per graph
    src_list, dst_list, batch_list = [], [], []
    for g in range(G):
        base = g * nodes_per_graph
        for i in range(nodes_per_graph):
            j = (i + 1) % nodes_per_graph
            src_list += [base + i, base + j]
            dst_list += [base + j, base + i]
        batch_list += [g] * nodes_per_graph
    src = jnp.array(src_list, jnp.int32)
    dst = jnp.array(dst_list, jnp.int32)
    batch = jnp.array(batch_list, jnp.int32)
    E = int(src.shape[0])

    kx, ke, kp = jax.random.split(key, 3)
    x = jax.random.normal(kx, (N, num_features), jnp.float32)        # data.x
    edge_attr = jax.random.normal(ke, (E, edge_dim), jnp.float32)    # data.edge_attr

    convs, head = init_params(kp, dim, num_features, edge_dim)

    # Build graph-structure matrices and padded parameters ONCE (cache across calls).
    graph_mats = build_graph_mats(src, dst, batch, N, E, G)
    params = prepare_params(convs, head, dim)

    out = net_gine_forward(x, edge_attr, graph_mats, params, G, out_dim=12)
    out = jax.block_until_ready(out)
    assert out.shape == (G, 12) and out.dtype == jnp.float32
    assert bool(jnp.all(jnp.isfinite(out)))

    with jax.default_matmul_precision("highest"):
        ref = jax.block_until_ready(
            ref_forward(x, edge_attr, src, dst, batch, G, convs, head, dim))
    # Tolerance reflects the bf16 MXU path (f32 accumulation) through 6 GIN
    # layers + 6 Set2Set steps vs. a full-f32 reference.
    np.testing.assert_allclose(np.asarray(out), np.asarray(ref), rtol=5e-2, atol=5e-2)

    print("KERNEL_OK")
</pallas_src>

<mosaic_0001>
module attributes {stable_mosaic.version = 11 : i64} {
  func.func @_netgine_kernel(%arg0: memref<6xf32, #tpu.memory_space<smem>>, %arg1: memref<128x128xf32, #tpu.memory_space<vmem>>, %arg2: memref<128x128xbf16, #tpu.memory_space<vmem>>, %arg3: memref<128x128xbf16, #tpu.memory_space<vmem>>, %arg4: memref<128x128xbf16, #tpu.memory_space<vmem>>, %arg5: memref<8x128xbf16, #tpu.memory_space<vmem>>, %arg6: memref<6x128x128xbf16, #tpu.memory_space<vmem>>, %arg7: memref<6x1x128xf32, #tpu.memory_space<vmem>>, %arg8: memref<6x128x128xbf16, #tpu.memory_space<vmem>>, %arg9: memref<6x1x128xf32, #tpu.memory_space<vmem>>, %arg10: memref<6x128x128xbf16, #tpu.memory_space<vmem>>, %arg11: memref<6x1x128xf32, #tpu.memory_space<vmem>>, %arg12: memref<6x128x128xbf16, #tpu.memory_space<vmem>>, %arg13: memref<6x1x128xf32, #tpu.memory_space<vmem>>, %arg14: memref<384x512xbf16, #tpu.memory_space<vmem>>, %arg15: memref<1x512xf32, #tpu.memory_space<vmem>>, %arg16: memref<256x128xbf16, #tpu.memory_space<vmem>>, %arg17: memref<1x128xf32, #tpu.memory_space<vmem>>, %arg18: memref<128x128xbf16, #tpu.memory_space<vmem>>, %arg19: memref<1x128xf32, #tpu.memory_space<vmem>>, %arg20: memref<8x128xf32, #tpu.memory_space<vmem>>) attributes {dimension_semantics = [], scalar_prefetch = 0 : i64, scratch_operands = 0 : i64, tpu.core_type = #tpu.core_type<tc>} {
    %c0 = arith.constant 0 : index
    %c0_0 = arith.constant 0 : index
    %0 = vector.load %arg3[%c0, %c0_0] : memref<128x128xbf16, #tpu.memory_space<vmem>>, vector<128x128xbf16>
    %c0_1 = arith.constant 0 : index
    %c0_2 = arith.constant 0 : index
    %1 = vector.load %arg4[%c0_1, %c0_2] : memref<128x128xbf16, #tpu.memory_space<vmem>>, vector<128x128xbf16>
    %c0_3 = arith.constant 0 : index
    %c0_4 = arith.constant 0 : index
    %2 = vector.load %arg2[%c0_3, %c0_4] : memref<128x128xbf16, #tpu.memory_space<vmem>>, vector<128x128xbf16>
    %c0_5 = arith.constant 0 : index
    %c0_6 = arith.constant 0 : index
    %3 = vector.load %arg1[%c0_5, %c0_6] : memref<128x128xf32, #tpu.memory_space<vmem>>, vector<128x128xf32>
    %c0_i32 = arith.constant 0 : i32
    %c6_i32 = arith.constant 6 : i32
    %4 = arith.addi %c0_i32, %c6_i32 : i32
    %c1_i32 = arith.constant 1 : i32
    %5 = scf.for %arg21 = %c0_i32 to %4 step %c1_i32 iter_args(%arg22 = %3) -> (vector<128x128xf32>)  : i32 {
      %32 = arith.index_cast %arg21 : i32 to index
      %c0_31 = arith.constant 0 : index
      %c0_32 = arith.constant 0 : index
      %33 = vector.load %arg6[%32, %c0_31, %c0_32] : memref<6x128x128xbf16, #tpu.memory_space<vmem>>, vector<1x128x128xbf16>
      %34 = vector.shape_cast %33 : vector<1x128x128xbf16> to vector<128x128xbf16>
      %cst_33 = arith.constant dense<0.000000e+00> : vector<128x128xf32>
      %35 = tpu.matmul %2, %34, %cst_33 {dimension_numbers = #tpu.dot_dimension_numbers<[1], [0], [0], [1], [0, 0, 1, 1], [], []>} : vector<128x128xbf16>, vector<128x128xbf16>, vector<128x128xf32> -> vector<128x128xf32>
      %36 = arith.index_cast %arg21 : i32 to index
      %c0_34 = arith.constant 0 : index
      %c0_35 = arith.constant 0 : index
      %37 = vector.load %arg7[%36, %c0_34, %c0_35] : memref<6x1x128xf32, #tpu.memory_space<vmem>>, vector<1x1x128xf32>
      %38 = vector.shape_cast %37 : vector<1x1x128xf32> to vector<1x128xf32>
      %39 = vector.broadcast %38 : vector<1x128xf32> to vector<128x128xf32>
      %40 = arith.addf %35, %39 : vector<128x128xf32>
      %cst_36 = arith.constant 0.000000e+00 : f32
      %41 = vector.broadcast %cst_36 : f32 to vector<128x128xf32>
      %42 = arith.maximumf %40, %41 : vector<128x128xf32>
      %43 = arith.truncf %42 : vector<128x128xf32> to vector<128x128xbf16>
      %44 = arith.index_cast %arg21 : i32 to index
      %c0_37 = arith.constant 0 : index
      %c0_38 = arith.constant 0 : index
      %45 = vector.load %arg8[%44, %c0_37, %c0_38] : memref<6x128x128xbf16, #tpu.memory_space<vmem>>, vector<1x128x128xbf16>
      %46 = vector.shape_cast %45 : vector<1x128x128xbf16> to vector<128x128xbf16>
      %cst_39 = arith.constant dense<0.000000e+00> : vector<128x128xf32>
      %47 = tpu.matmul %43, %46, %cst_39 {dimension_numbers = #tpu.dot_dimension_numbers<[1], [0], [0], [1], [0, 0, 1, 1], [], []>} : vector<128x128xbf16>, vector<128x128xbf16>, vector<128x128xf32> -> vector<128x128xf32>
      %48 = arith.index_cast %arg21 : i32 to index
      %c0_40 = arith.constant 0 : index
      %c0_41 = arith.constant 0 : index
      %49 = vector.load %arg9[%48, %c0_40, %c0_41] : memref<6x1x128xf32, #tpu.memory_space<vmem>>, vector<1x1x128xf32>
      %50 = vector.shape_cast %49 : vector<1x1x128xf32> to vector<1x128xf32>
      %51 = vector.broadcast %50 : vector<1x128xf32> to vector<128x128xf32>
      %52 = arith.addf %47, %51 : vector<128x128xf32>
      %53 = arith.truncf %arg22 : vector<128x128xf32> to vector<128x128xbf16>
      %cst_42 = arith.constant dense<0.000000e+00> : vector<128x128xf32>
      %54 = tpu.matmul %0, %53, %cst_42 {dimension_numbers = #tpu.dot_dimension_numbers<[1], [0], [0], [1], [0, 0, 1, 1], [], []>} : vector<128x128xbf16>, vector<128x128xbf16>, vector<128x128xf32> -> vector<128x128xf32>
      %55 = arith.addf %54, %52 : vector<128x128xf32>
      %cst_43 = arith.constant 0.000000e+00 : f32
      %56 = vector.broadcast %cst_43 : f32 to vector<128x128xf32>
      %57 = arith.maximumf %55, %56 : vector<128x128xf32>
      %58 = arith.truncf %57 : vector<128x128xf32> to vector<128x128xbf16>
      %cst_44 = arith.constant dense<0.000000e+00> : vector<128x128xf32>
      %59 = tpu.matmul %1, %58, %cst_44 {dimension_numbers = #tpu.dot_dimension_numbers<[1], [0], [0], [1], [0, 0, 1, 1], [], []>} : vector<128x128xbf16>, vector<128x128xbf16>, vector<128x128xf32> -> vector<128x128xf32>
      %60 = arith.index_cast %arg21 : i32 to index
      %61 = memref.load %arg0[%60] : memref<6xf32, #tpu.memory_space<smem>>
      %cst_45 = arith.constant 1.000000e+00 : f32
      %62 = arith.addf %cst_45, %61 : f32
      %63 = vector.broadcast %62 : f32 to vector<128x128xf32>
      %64 = arith.mulf %63, %arg22 : vector<128x128xf32>
      %65 = arith.addf %64, %59 : vector<128x128xf32>
      %66 = arith.truncf %65 : vector<128x128xf32> to vector<128x128xbf16>
      %67 = arith.index_cast %arg21 : i32 to index
      %c0_46 = arith.constant 0 : index
      %c0_47 = arith.constant 0 : index
      %68 = vector.load %arg10[%67, %c0_46, %c0_47] : memref<6x128x128xbf16, #tpu.memory_space<vmem>>, vector<1x128x128xbf16>
      %69 = vector.shape_cast %68 : vector<1x128x128xbf16> to vector<128x128xbf16>
      %cst_48 = arith.constant dense<0.000000e+00> : vector<128x128xf32>
      %70 = tpu.matmul %66, %69, %cst_48 {dimension_numbers = #tpu.dot_dimension_numbers<[1], [0], [0], [1], [0, 0, 1, 1], [], []>} : vector<128x128xbf16>, vector<128x128xbf16>, vector<128x128xf32> -> vector<128x128xf32>
      %71 = arith.index_cast %arg21 : i32 to index
      %c0_49 = arith.constant 0 : index
      %c0_50 = arith.constant 0 : index
      %72 = vector.load %arg11[%71, %c0_49, %c0_50] : memref<6x1x128xf32, #tpu.memory_space<vmem>>, vector<1x1x128xf32>
      %73 = vector.shape_cast %72 : vector<1x1x128xf32> to vector<1x128xf32>
      %74 = vector.broadcast %73 : vector<1x128xf32> to vector<128x128xf32>
      %75 = arith.addf %70, %74 : vector<128x128xf32>
      %cst_51 = arith.constant 0.000000e+00 : f32
      %76 = vector.broadcast %cst_51 : f32 to vector<128x128xf32>
      %77 = arith.maximumf %75, %76 : vector<128x128xf32>
      %78 = arith.truncf %77 : vector<128x128xf32> to vector<128x128xbf16>
      %79 = arith.index_cast %arg21 : i32 to index
      %c0_52 = arith.constant 0 : index
      %c0_53 = arith.constant 0 : index
      %80 = vector.load %arg12[%79, %c0_52, %c0_53] : memref<6x128x128xbf16, #tpu.memory_space<vmem>>, vector<1x128x128xbf16>
      %81 = vector.shape_cast %80 : vector<1x128x128xbf16> to vector<128x128xbf16>
      %cst_54 = arith.constant dense<0.000000e+00> : vector<128x128xf32>
      %82 = tpu.matmul %78, %81, %cst_54 {dimension_numbers = #tpu.dot_dimension_numbers<[1], [0], [0], [1], [0, 0, 1, 1], [], []>} : vector<128x128xbf16>, vector<128x128xbf16>, vector<128x128xf32> -> vector<128x128xf32>
      %83 = arith.index_cast %arg21 : i32 to index
      %c0_55 = arith.constant 0 : index
      %c0_56 = arith.constant 0 : index
      %84 = vector.load %arg13[%83, %c0_55, %c0_56] : memref<6x1x128xf32, #tpu.memory_space<vmem>>, vector<1x1x128xf32>
      %85 = vector.shape_cast %84 : vector<1x1x128xf32> to vector<1x128xf32>
      %86 = vector.broadcast %85 : vector<1x128xf32> to vector<128x128xf32>
      %87 = arith.addf %82, %86 : vector<128x128xf32>
      %cst_57 = arith.constant 0.000000e+00 : f32
      %88 = vector.broadcast %cst_57 : f32 to vector<128x128xf32>
      %89 = arith.maximumf %87, %88 : vector<128x128xf32>
      scf.yield %89 : vector<128x128xf32>
    }
    %c6_i32_7 = arith.constant 6 : i32
    %6 = arith.truncf %5 : vector<128x128xf32> to vector<128x128xbf16>
    %7 = tpu.transpose %6, [1, 0] : vector<128x128xbf16> -> vector<128x128xbf16>
    %c0_8 = arith.constant 0 : index
    %c0_9 = arith.constant 0 : index
    %8 = vector.load %arg5[%c0_8, %c0_9] : memref<8x128xbf16, #tpu.memory_space<vmem>>, vector<8x128xbf16>
    %cst = arith.constant 0.000000e+00 : bf16
    %9 = vector.broadcast %cst : bf16 to vector<8x128xbf16>
    %10 = arith.cmpf ogt, %8, %9 : vector<8x128xbf16>
    %c0_10 = arith.constant 0 : index
    %c0_11 = arith.constant 0 : index
    %11 = vector.load %arg14[%c0_10, %c0_11] : memref<384x512xbf16, #tpu.memory_space<vmem>>, vector<384x512xbf16>
    %c0_12 = arith.constant 0 : index
    %c0_13 = arith.constant 0 : index
    %12 = vector.load %arg15[%c0_12, %c0_13] : memref<1x512xf32, #tpu.memory_space<vmem>>, vector<1x512xf32>
    %cst_14 = arith.constant 0.000000e+00 : f32
    %13 = vector.broadcast %cst_14 : f32 to vector<8x128xf32>
    %c0_i32_15 = arith.constant 0 : i32
    %c6_i32_16 = arith.constant 6 : i32
    %14 = arith.addi %c0_i32_15, %c6_i32_16 : i32
    %c1_i32_17 = arith.constant 1 : i32
    %15:4 = scf.for %arg21 = %c0_i32_15 to %14 step %c1_i32_17 iter_args(%arg22 = %13, %arg23 = %13, %arg24 = %13, %arg25 = %13) -> (vector<8x128xf32>, vector<8x128xf32>, vector<8x128xf32>, vector<8x128xf32>)  : i32 {
      %32 = tpu.concatenate %arg22, %arg23, %arg24 in 1 : vector<8x128xf32>, vector<8x128xf32>, vector<8x128xf32> -> vector<8x384xf32>
      %33 = arith.truncf %32 : vector<8x384xf32> to vector<8x384xbf16>
      %cst_31 = arith.constant dense<0.000000e+00> : vector<8x512xf32>
      %34 = tpu.matmul %33, %11, %cst_31 {dimension_numbers = #tpu.dot_dimension_numbers<[1], [0], [0], [1], [0, 0, 1, 1], [], []>} : vector<8x384xbf16>, vector<384x512xbf16>, vector<8x512xf32> -> vector<8x512xf32>
      %35 = vector.broadcast %12 : vector<1x512xf32> to vector<8x512xf32>
      %36 = arith.addf %34, %35 : vector<8x512xf32>
      %37 = vector.extract_strided_slice %36 {offsets = [0, 0], sizes = [8, 128], strides = [1, 1]} : vector<8x512xf32> to vector<8x128xf32>
      %38 = arith.negf %37 : vector<8x128xf32>
      %39 = math.exp %38 : vector<8x128xf32>
      %cst_32 = arith.constant 1.000000e+00 : f32
      %40 = vector.broadcast %cst_32 : f32 to vector<8x128xf32>
      %41 = arith.addf %40, %39 : vector<8x128xf32>
      %42 = arith.divf %40, %41 : vector<8x128xf32>
      %43 = vector.extract_strided_slice %36 {offsets = [0, 128], sizes = [8, 128], strides = [1, 1]} : vector<8x512xf32> to vector<8x128xf32>
      %44 = arith.negf %43 : vector<8x128xf32>
      %45 = math.exp %44 : vector<8x128xf32>
      %cst_33 = arith.constant 1.000000e+00 : f32
      %46 = vector.broadcast %cst_33 : f32 to vector<8x128xf32>
      %47 = arith.addf %46, %45 : vector<8x128xf32>
      %48 = arith.divf %46, %47 : vector<8x128xf32>
      %49 = vector.extract_strided_slice %36 {offsets = [0, 256], sizes = [8, 128], strides = [1, 1]} : vector<8x512xf32> to vector<8x128xf32>
      %50 = math.tanh %49 : vector<8x128xf32>
      %51 = vector.extract_strided_slice %36 {offsets = [0, 384], sizes = [8, 128], strides = [1, 1]} : vector<8x512xf32> to vector<8x128xf32>
      %52 = arith.negf %51 : vector<8x128xf32>
      %53 = math.exp %52 : vector<8x128xf32>
      %cst_34 = arith.constant 1.000000e+00 : f32
      %54 = vector.broadcast %cst_34 : f32 to vector<8x128xf32>
      %55 = arith.addf %54, %53 : vector<8x128xf32>
      %56 = arith.divf %54, %55 : vector<8x128xf32>
      %57 = arith.mulf %48, %arg25 : vector<8x128xf32>
      %58 = arith.mulf %42, %50 : vector<8x128xf32>
      %59 = arith.addf %57, %58 : vector<8x128xf32>
      %60 = math.tanh %59 : vector<8x128xf32>
      %61 = arith.mulf %56, %60 : vector<8x128xf32>
      %62 = arith.truncf %61 : vector<8x128xf32> to vector<8x128xbf16>
      %cst_35 = arith.constant dense<0.000000e+00> : vector<8x128xf32>
      %63 = tpu.matmul %62, %7, %cst_35 {dimension_numbers = #tpu.dot_dimension_numbers<[1], [0], [0], [1], [0, 0, 1, 1], [], []>} : vector<8x128xbf16>, vector<128x128xbf16>, vector<8x128xf32> -> vector<8x128xf32>
      %cst_36 = arith.constant -1.000000e+30 : f32
      %64 = vector.broadcast %cst_36 : f32 to vector<8x128xf32>
      %65 = arith.select %10, %63, %64 : vector<8x128xi1>, vector<8x128xf32>
      %cst_37 = arith.constant dense<0xFF800000> : vector<8xf32>
      %66 = vector.multi_reduction <maximumf>, %65, %cst_37 [1] : vector<8x128xf32> to vector<8xf32>
      %67 = vector.shape_cast %66 : vector<8xf32> to vector<8x1xf32>
      %68 = vector.broadcast %67 : vector<8x1xf32> to vector<8x128xf32>
      %69 = arith.subf %63, %68 : vector<8x128xf32>
      %cst_38 = arith.constant 0.000000e+00 : f32
      %70 = vector.broadcast %cst_38 : f32 to vector<8x128xf32>
      %71 = arith.minimumf %69, %70 : vector<8x128xf32>
      %72 = math.exp %71 : vector<8x128xf32>
      %cst_39 = arith.constant 0.000000e+00 : f32
      %73 = vector.broadcast %cst_39 : f32 to vector<8x128xf32>
      %74 = arith.select %10, %72, %73 : vector<8x128xi1>, vector<8x128xf32>
      %cst_40 = arith.constant dense<0.000000e+00> : vector<8xf32>
      %75 = vector.multi_reduction <add>, %74, %cst_40 [1] : vector<8x128xf32> to vector<8xf32>
      %76 = vector.shape_cast %75 : vector<8xf32> to vector<8x1xf32>
      %cst_41 = arith.constant 0.000000e+00 : f32
      %77 = vector.broadcast %cst_41 : f32 to vector<8x1xf32>
      %78 = arith.cmpf ogt, %76, %77 : vector<8x1xf32>
      %cst_42 = arith.constant 1.000000e+00 : f32
      %79 = vector.broadcast %cst_42 : f32 to vector<8x1xf32>
      %80 = arith.select %78, %76, %79 : vector<8x1xi1>, vector<8x1xf32>
      %81 = tpu.reciprocal %80 {approx = true} : vector<8x1xf32> -> vector<8x1xf32>
      %82 = vector.broadcast %81 : vector<8x1xf32> to vector<8x128xf32>
      %83 = arith.mulf %74, %82 : vector<8x128xf32>
      %84 = arith.truncf %83 : vector<8x128xf32> to vector<8x128xbf16>
      %cst_43 = arith.constant dense<0.000000e+00> : vector<8x128xf32>
      %85 = tpu.matmul %84, %6, %cst_43 {dimension_numbers = #tpu.dot_dimension_numbers<[1], [0], [0], [1], [0, 0, 1, 1], [], []>} : vector<8x128xbf16>, vector<128x128xbf16>, vector<8x128xf32> -> vector<8x128xf32>
      scf.yield %61, %85, %61, %59 : vector<8x128xf32>, vector<8x128xf32>, vector<8x128xf32>, vector<8x128xf32>
    }
    %16 = tpu.concatenate %15#0, %15#1 in 1 : vector<8x128xf32>, vector<8x128xf32> -> vector<8x256xf32>
    %17 = arith.truncf %16 : vector<8x256xf32> to vector<8x256xbf16>
    %c0_18 = arith.constant 0 : index
    %c0_19 = arith.constant 0 : index
    %18 = vector.load %arg16[%c0_18, %c0_19] : memref<256x128xbf16, #tpu.memory_space<vmem>>, vector<256x128xbf16>
    %cst_20 = arith.constant dense<0.000000e+00> : vector<8x128xf32>
    %19 = tpu.matmul %17, %18, %cst_20 {dimension_numbers = #tpu.dot_dimension_numbers<[1], [0], [0], [1], [0, 0, 1, 1], [], []>} : vector<8x256xbf16>, vector<256x128xbf16>, vector<8x128xf32> -> vector<8x128xf32>
    %c0_21 = arith.constant 0 : index
    %c0_22 = arith.constant 0 : index
    %20 = vector.load %arg17[%c0_21, %c0_22] : memref<1x128xf32, #tpu.memory_space<vmem>>, vector<1x128xf32>
    %21 = vector.broadcast %20 : vector<1x128xf32> to vector<8x128xf32>
    %22 = arith.addf %19, %21 : vector<8x128xf32>
    %cst_23 = arith.constant 0.000000e+00 : f32
    %23 = vector.broadcast %cst_23 : f32 to vector<8x128xf32>
    %24 = arith.maximumf %22, %23 : vector<8x128xf32>
    %25 = arith.truncf %24 : vector<8x128xf32> to vector<8x128xbf16>
    %c0_24 = arith.constant 0 : index
    %c0_25 = arith.constant 0 : index
    %26 = vector.load %arg18[%c0_24, %c0_25] : memref<128x128xbf16, #tpu.memory_space<vmem>>, vector<128x128xbf16>
    %cst_26 = arith.constant dense<0.000000e+00> : vector<8x128xf32>
    %27 = tpu.matmul %25, %26, %cst_26 {dimension_numbers = #tpu.dot_dimension_numbers<[1], [0], [0], [1], [0, 0, 1, 1], [], []>} : vector<8x128xbf16>, vector<128x128xbf16>, vector<8x128xf32> -> vector<8x128xf32>
    %c0_27 = arith.constant 0 : index
    %c0_28 = arith.constant 0 : index
    %28 = vector.load %arg19[%c0_27, %c0_28] : memref<1x128xf32, #tpu.memory_space<vmem>>, vector<1x128xf32>
    %29 = vector.broadcast %28 : vector<1x128xf32> to vector<8x128xf32>
    %30 = arith.addf %27, %29 : vector<8x128xf32>
    %c0_29 = arith.constant 0 : index
    %c0_30 = arith.constant 0 : index
    %31 = vector.load %arg20[%c0_29, %c0_30] : memref<8x128xf32, #tpu.memory_space<vmem>>, vector<8x128xf32>
    tpu.vector_store %arg20[%c0_29, %c0_30], %30 {strides = array<i32>} : memref<8x128xf32, #tpu.memory_space<vmem>>, vector<8x128xf32>,
    return
  }
}

</mosaic_0001>

<bundles_post_ra>
// kernel: tpu_custom_call.1
= control target key start
LH: loop header
LB: loop body
LE: loop exit
PB: predicated region body
PF: predicated region fallthrough
CT: control target
= control target key end

     0   :  { %s5510_s0 = inlined_call_operand.hbm [shape: f32[6], index: 0, kind: input, shape index: {}]   ;;  %s5511_s1 = inlined_call_operand.hbm [shape: f32[128,128], index: 1, kind: input, shape index: {}]   ;;  %s5512_s2 = inlined_call_operand.hbm [shape: bf16[128,128], index: 2, kind: input, shape index: {}]   ;;  %s5513_s3 = inlined_call_operand.hbm [shape: bf16[128,128], index: 3, kind: input, shape index: {}]   ;;  %s5514_s4 = inlined_call_operand.hbm [shape: bf16[128,128], index: 4, kind: input, shape index: {}]   ;;  %s5515_s5 = inlined_call_operand.hbm [shape: bf16[8,128], index: 5, kind: input, shape index: {}]   ;;  %s5516_s6 = inlined_call_operand.hbm [shape: bf16[6,128,128], index: 6, kind: input, shape index: {}]   ;;  %s5517_s7 = inlined_call_operand.vmem [shape: f32[6,1,128], index: 7, kind: input, shape index: {}]   ;;  %s5518_s8 = inlined_call_operand.hbm [shape: bf16[6,128,128], index: 8, kind: input, shape index: {}]   ;;  %s5519_s9 = inlined_call_operand.hbm [shape: f32[6,1,128], index: 9, kind: input, shape index: {}]   ;;  %s5520_s10 = inlined_call_operand.hbm [shape: bf16[6,128,128], index: 10, kind: input, shape index: {}]   ;;  %s5521_s11 = inlined_call_operand.hbm [shape: f32[6,1,128], index: 11, kind: input, shape index: {}]   ;;  %s5522_s12 = inlined_call_operand.hbm [shape: bf16[6,128,128], index: 12, kind: input, shape index: {}]   ;;  %s5523_s13 = inlined_call_operand.vmem [shape: f32[6,1,128], index: 13, kind: input, shape index: {}]   ;;  %s5524_s14 = inlined_call_operand.hbm [shape: bf16[384,512], index: 14, kind: input, shape index: {}]   ;;  %s5525_s15 = inlined_call_operand.hbm [shape: f32[1,512], index: 15, kind: input, shape index: {}]   ;;  %s5526_s16 = inlined_call_operand.hbm [shape: bf16[256,128], index: 16, kind: input, shape index: {}]   ;;  %s5527_s17 = inlined_call_operand.vmem [shape: f32[1,128], index: 17, kind: input, shape index: {}]   ;;  %s5528_s18 = inlined_call_operand.hbm [shape: bf16[128,128], index: 18, kind: input, shape index: {}]   ;;  %s5529_s19 = inlined_call_operand.vmem [shape: f32[1,128], index: 19, kind: input, shape index: {}]   ;;  %s5530_s20 = inlined_call_operand.hbm [shape: f32[8,128], index: 20, kind: output, shape index: {}]  }
   0x1   :  { %5560 = sst [smem:[#allocation215_spill]] %s5510_s0 }
   0x2   :  { %5561 = sst [smem:[#allocation216_spill]] %s5511_s1 }
   0x3   :  { %5562 = sst [smem:[#allocation217_spill]] %s5512_s2 }
   0x4   :  { %5563 = sst [smem:[#allocation218_spill]] %s5513_s3 }
   0x5   :  { %5564 = sst [smem:[#allocation219_spill]] %s5514_s4 }
   0x6   :  { %5565 = sst [smem:[#allocation220_spill]] %s5530_s20 }
   0x7   :  { %25 = vsyncpa [#allocation5], 0 }
   0x8   :  { %26 = vsyncpa [#allocation3], 0 }
   0x9   :  { %27 = vsyncpa [#allocation8], 0 }
   0xa   :  { %28 = vsyncpa [#allocation11], 0 }
   0xb   :  { %29 = vsyncpa [#allocation14], 0 }
   0xc   :  { %30 = vsyncpa [#allocation17], 0 }
   0xd   :  { %31 = vsyncpa [#allocation20], 0 }
   0xe   :  { %32 = vsyncpa [#allocation23], 0 }
   0xf   :  { %33 = vsyncpa [#allocation26], 0  ;;  %s5566_s23 = sld [smem:[#allocation217_spill]] }
  0x15   :  { %s61_s24 = sshll.u32 %s5566_s23, 4  ;;  %s62_s24 = int_to_ptr.hbm [resolvable:$true] %s61_s24 }
  0x16   :  { %34 = vsyncpa [#allocation4], 0  ;;  %s4183_s2 = smov [#allocation7]   ;;  %s5567_s27 = sld [smem:[#allocation219_spill]] }
  0x17   :  { %s63_s25 = sshll.u32 %s4183_s2, 4  ;;  %s5531_s4 = smov 64   ;;  %s64_s25 = int_to_ptr.vmem [resolvable:$true] %s63_s25 }
  0x18   :  { %s5533_s29 = smov 4   ;;  %s4186_s30 = smov [#allocation10]  }
  0x19   :  { %69 = dma.hbm_to_vmem [thread:$0]  %s62_s24, 1024, %s64_s25, [#allocation8], %s5531_s4, %s5531_s4, %s5533_s29  }
  0x1a   :  { %s89_s0 = sshll.u32 %s4186_s30, 4  ;;  %s111_s22 = sshll.u32 %s5516_s6, 4  ;;  %s90_s0 = int_to_ptr.vmem [resolvable:$true] %s89_s0  ;;  %s112_s22 = int_to_ptr.hbm [resolvable:$true] %s111_s22 }
  0x1b   :  { %s139_s3 = sshll.u32 %s5519_s9, 4  ;;  %s4187_s26 = smov [#allocation13]   ;;  %s140_s3 = int_to_ptr.hbm [resolvable:$true] %s139_s3 }
  0x1c   :  { %s87_s28 = sshll.u32 %s5567_s27, 4  ;;  %s113_s27 = sshll.u32 %s4187_s26, 4  ;;  %s88_s28 = int_to_ptr.hbm [resolvable:$true] %s87_s28  ;;  %s114_s27 = int_to_ptr.vmem [resolvable:$true] %s113_s27 }
  0x1d   :  { %95 = dma.hbm_to_vmem [thread:$0]  %s88_s28, 1024, %s90_s0, [#allocation11], %s5531_s4, %s5531_s4, %s5533_s29  }
  0x1e   :  { %119 = dma.hbm_to_vmem [thread:$0]  %s112_s22, 6144, %s114_s27, [#allocation14], %s5531_s4, %s5531_s4, %s5533_s29  }
  0x1f   :  { %s4188_s24 = smov [#allocation16]   ;;  %s4189_s25 = smov 16  }
  0x20   :  { %s141_s6 = sshll.u32 %s4188_s24, 4  ;;  %s4190_s30 = smov 1   ;;  %s142_s6 = int_to_ptr.vmem [resolvable:$true] %s141_s6 }
  0x21   :  { %147 = dma.hbm_to_vmem [thread:$0]  %s140_s3, 96, %s142_s6, [#allocation17], %s4189_s25, %s4189_s25, %s4190_s30  }
  0x22   :  { %s165_s0 = sshll.u32 %s5521_s11, 4  ;;  %s4191_s9 = smov [#allocation19]   ;;  %s166_s0 = int_to_ptr.hbm [resolvable:$true] %s165_s0 }
  0x23   :  { %s167_s1 = sshll.u32 %s4191_s9, 4  ;;  %s193_s26 = sshll.u32 %s5524_s14, 4  ;;  %s168_s1 = int_to_ptr.vmem [resolvable:$true] %s167_s1  ;;  %s194_s26 = int_to_ptr.hbm [resolvable:$true] %s193_s26 }
  0x24   :  { %173 = dma.hbm_to_vmem [thread:$0]  %s166_s0, 96, %s168_s1, [#allocation20], %s4189_s25, %s4189_s25, %s4190_s30  }
  0x25   :  { %s4192_s22 = smov [#allocation22]   ;;  %s217_s3 = sshll.u32 %s5526_s16, 4  ;;  %s218_s3 = int_to_ptr.hbm [resolvable:$true] %s217_s3 }
  0x26   :  { %s195_s27 = sshll.u32 %s4192_s22, 4  ;;  %s4193_s6 = smov 256   ;;  %s196_s27 = int_to_ptr.vmem [resolvable:$true] %s195_s27 }
  0x27   :  { %201 = dma.hbm_to_vmem [thread:$0]  %s194_s26, 12288, %s196_s27, [#allocation23], %s4193_s6, %s4193_s6, %s4189_s25  }
  0x28   :  { %s4194_s11 = smov [#allocation25]   ;;  %s5568_s29 = sld [smem:[#allocation215_spill]] }
  0x29   :  { %s219_s21 = sshll.u32 %s4194_s11, 4  ;;  %s5569_s14 = smov 4   ;;  %s220_s21 = int_to_ptr.vmem [resolvable:$true] %s219_s21 }
  0x2a   :  { %s5570_s30 = smov 64   ;;  %s5571_s23 = sld [smem:[#allocation216_spill]] }
  0x2b   :  { %225 = dma.hbm_to_vmem [thread:$0]  %s218_s3, 2048, %s220_s21, [#allocation26], %s5570_s30, %s5570_s30, %s5569_s14  }
  0x2c   :  { %s4195_s16 = smov [#allocation2]   ;;  %s4196_s25 = smov [#allocation6]  }
  0x2d   :  { %s50_s2 = sshll.u32 %s4196_s25, 4  ;;  %s4197_s26 = smov 128   ;;  %s51_s2 = int_to_ptr.vmem [resolvable:$true] %s50_s2 }
  0x2e   :  { %s40_s20 = sshll.u32 %s5568_s29, 4  ;;  %s4198_s22 = smov 8   ;;  %s41_s20 = int_to_ptr.hbm [resolvable:$true] %s40_s20 }
  0x2f   :  { %43 = dma.hbm_to_smem %s41_s20, 16, %s4195_s16, [#allocation5]  }
  0x30   :  { %s48_s4 = sshll.u32 %s5571_s23, 4  ;;  %s5572_s24 = sld [smem:[#allocation218_spill]]  ;;  %s49_s4 = int_to_ptr.hbm [resolvable:$true] %s48_s4 }
  0x31   :  { %56 = dma.hbm_to_vmem [thread:$0]  %s49_s4, 2048, %s51_s2, [#allocation3], %s4197_s26, %s4197_s26, %s4198_s22  }
  0x32   :  { %s4199_s11 = smov [#allocation9]   ;;  %s101_s9 = sshll.u32 %s5515_s5, 4  ;;  %s102_s9 = int_to_ptr.hbm [resolvable:$true] %s101_s9 }
  0x33   :  { %s76_s3 = sshll.u32 %s4199_s11, 4  ;;  %s4200_s20 = smov [#allocation12]   ;;  %s77_s3 = int_to_ptr.vmem [resolvable:$true] %s76_s3 }
  0x34   :  { %s103_s0 = sshll.u32 %s4200_s20, 4  ;;  %s126_s4 = sshll.u32 %s5518_s8, 4  ;;  %s104_s0 = int_to_ptr.vmem [resolvable:$true] %s103_s0  ;;  %s127_s4 = int_to_ptr.hbm [resolvable:$true] %s126_s4 }
  0x35   :  { %106 = dma.hbm_to_vmem [thread:$0]  %s102_s9, 64, %s104_s0, [#allocation11]  }
  0x36   :  { %s74_s6 = sshll.u32 %s5572_s24, 4  ;;  %s152_s2 = sshll.u32 %s5520_s10, 4  ;;  %s75_s6 = int_to_ptr.hbm [resolvable:$true] %s74_s6  ;;  %s153_s2 = int_to_ptr.hbm [resolvable:$true] %s152_s2 }
  0x37   :  { %82 = dma.hbm_to_vmem [thread:$0]  %s75_s6, 1024, %s77_s3, [#allocation8], %s5570_s30, %s5570_s30, %s5569_s14  }
  0x38   :  { %s4201_s26 = smov [#allocation15]   ;;  %s4202_s22 = smov [#allocation18]  }
  0x39   :  { %s128_s5 = sshll.u32 %s4201_s26, 4  ;;  %s154_s29 = sshll.u32 %s4202_s22, 4  ;;  %s129_s5 = int_to_ptr.vmem [resolvable:$true] %s128_s5  ;;  %s155_s29 = int_to_ptr.vmem [resolvable:$true] %s154_s29 }
  0x3a   :  { %134 = dma.hbm_to_vmem [thread:$0]  %s127_s4, 6144, %s129_s5, [#allocation14], %s5570_s30, %s5570_s30, %s5569_s14  }
  0x3b   :  { %s178_s8 = sshll.u32 %s5522_s12, 4  ;;  %s207_s11 = sshll.u32 %s5525_s15, 4  ;;  %s179_s8 = int_to_ptr.hbm [resolvable:$true] %s178_s8  ;;  %s208_s11 = int_to_ptr.hbm [resolvable:$true] %s207_s11 }
  0x3c   :  { %160 = dma.hbm_to_vmem [thread:$0]  %s153_s2, 6144, %s155_s29, [#allocation17], %s5570_s30, %s5570_s30, %s5569_s14  }
  0x3d   :  { %s4203_s3 = smov [#allocation21]   ;;  %s4204_s28 = smov [#allocation24]  }
  0x3e   :  { %s180_s21 = sshll.u32 %s4203_s3, 4  ;;  %s209_s12 = sshll.u32 %s4204_s28, 4  ;;  %s181_s21 = int_to_ptr.vmem [resolvable:$true] %s180_s21  ;;  %s210_s12 = int_to_ptr.vmem [resolvable:$true] %s209_s12 }
  0x3f   :  { %186 = dma.hbm_to_vmem [thread:$0]  %s179_s8, 6144, %s181_s21, [#allocation20], %s5570_s30, %s5570_s30, %s5569_s14  }
  0x40   :  { %s232_s0 = sshll.u32 %s5528_s18, 4  ;;  %s4205_s1 = smov [#allocation27]   ;;  %s233_s0 = int_to_ptr.hbm [resolvable:$true] %s232_s0 }
  0x41   :  { %212 = dma.hbm_to_vmem [thread:$0]  %s208_s11, 64, %s210_s12, [#allocation23]  }
  0x42   :  { %s234_s23 = sshll.u32 %s4205_s1, 4  ;;  %s235_s23 = int_to_ptr.vmem [resolvable:$true] %s234_s23 }
  0x43   :  { %240 = dma.hbm_to_vmem [thread:$0]  %s233_s0, 1024, %s235_s23, [#allocation26], %s5570_s30, %s5570_s30, %s5569_s14  }
  0x44   :  { %4079 = dma.done.wait [#allocation5], 16  }
  0x45   :  { %4080 = vsyncadd [#allocation5], 4294967280 }
  0x46   :  { %4081 = dma.done.wait [#allocation3], 2048  }
  0x47   :  { %4082 = vsyncadd [#allocation3], 4294965248 }
  0x48   :  { %4083 = dma.done.wait [#allocation8], 2048  }
  0x49   :  { %4084 = vsyncadd [#allocation8], 4294965248 }
  0x4a   :  { %4085 = dma.done.wait [#allocation11], 1088  }
  0x4b   :  { %4086 = vsyncadd [#allocation11], 4294966208 }
  0x4c   :  { %4087 = dma.done.wait [#allocation14], 12288  }
  0x4d   :  { %4088 = vsyncadd [#allocation14], 4294955008 }
  0x4e   :  { %4089 = dma.done.wait [#allocation17], 6240  }
  0x4f   :  { %4090 = vsyncadd [#allocation17], 4294961056 }
  0x50   :  { %4091 = dma.done.wait [#allocation20], 6240  }
  0x51   :  { %4092 = vsyncadd [#allocation20], 4294961056 }
  0x52   :  { %4093 = dma.done.wait [#allocation23], 12352  }
  0x53   :  { %4094 = vsyncadd [#allocation23], 4294954944 }
  0x54   :  { %4095 = dma.done.wait [#allocation26], 3072  }
  0x55   :  { %4096 = vsyncadd [#allocation26], 4294964224 }
  0x56   :  { %307 = sfence }
  0x57   :  { %v4387_v0 = vld [vmem:[#allocation9] sm:$0xf]  ;;  %v4389_v1 = vld [vmem:[#allocation9] sm:$0xf0]  ;;  %v4391_v2 = vld [vmem:[#allocation9 + $0x8] sm:$0xf] }
  0x58   :  { %5573 = vst [vmem:[#allocation39_spill] sm:$0xff] %v4387_v0  ;;  %v4393_v3 = vld [vmem:[#allocation9 + $0x8] sm:$0xf0]  ;;  %v4395_v4 = vld [vmem:[#allocation9 + $0x10] sm:$0xf]  ;;  %v356_v48 = vld [vmem:[#allocation6] sm:$0xff]  }
  0x59   :  { %5574 = vst [vmem:[#allocation40_spill] sm:$0xff] %v4389_v1  ;;  %v4397_v5 = vld [vmem:[#allocation9 + $0x10] sm:$0xf0]  ;;  %v4399_v6 = vld [vmem:[#allocation9 + $0x18] sm:$0xf]  ;;  %v357_v49 = vld [vmem:[#allocation6 + $0x8] sm:$0xff]  }
  0x5a   :  { %5575 = vst [vmem:[#allocation41_spill] sm:$0xff] %v4391_v2  ;;  %v4401_v7 = vld [vmem:[#allocation9 + $0x18] sm:$0xf0]  ;;  %v4403_v8 = vld [vmem:[#allocation9 + $0x20] sm:$0xf]  ;;  %v358_v50 = vld [vmem:[#allocation6 + $0x10] sm:$0xff]  }
  0x5b   :  { %5576 = vst [vmem:[#allocation42_spill] sm:$0xff] %v4393_v3  ;;  %v4405_v9 = vld [vmem:[#allocation9 + $0x20] sm:$0xf0]  ;;  %v4407_v10 = vld [vmem:[#allocation9 + $0x28] sm:$0xf]  ;;  %v359_v51 = vld [vmem:[#allocation6 + $0x18] sm:$0xff]  }
  0x5c   :  { %5577 = vst [vmem:[#allocation43_spill] sm:$0xff] %v4395_v4  ;;  %v4409_v11 = vld [vmem:[#allocation9 + $0x28] sm:$0xf0]  ;;  %v4411_v12 = vld [vmem:[#allocation9 + $0x30] sm:$0xf]  ;;  %v360_v52 = vld [vmem:[#allocation6 + $0x20] sm:$0xff]  }
  0x5d   :  { %5578 = vst [vmem:[#allocation44_spill] sm:$0xff] %v4397_v5  ;;  %v4413_v13 = vld [vmem:[#allocation9 + $0x30] sm:$0xf0]  ;;  %v4415_v14 = vld [vmem:[#allocation9 + $0x38] sm:$0xf]  ;;  %v361_v53 = vld [vmem:[#allocation6 + $0x28] sm:$0xff]  }
  0x5e   :  { %5579 = vst [vmem:[#allocation45_spill] sm:$0xff] %v4399_v6  ;;  %v4417_v15 = vld [vmem:[#allocation9 + $0x38] sm:$0xf0]  ;;  %v4419_v16 = vld [vmem:[#allocation10] sm:$0xf]  ;;  %v362_v54 = vld [vmem:[#allocation6 + $0x30] sm:$0xff]  }
  0x5f   :  { %5580 = vst [vmem:[#allocation46_spill] sm:$0xff] %v4401_v7  ;;  %v4421_v17 = vld [vmem:[#allocation10] sm:$0xf0]  ;;  %v4423_v18 = vld [vmem:[#allocation10 + $0x8] sm:$0xf]  ;;  %v363_v55 = vld [vmem:[#allocation6 + $0x38] sm:$0xff]  }
  0x60   :  { %5581 = vst [vmem:[#allocation47_spill] sm:$0xff] %v4403_v8  ;;  %v4425_v19 = vld [vmem:[#allocation10 + $0x8] sm:$0xf0]  ;;  %v4427_v20 = vld [vmem:[#allocation10 + $0x10] sm:$0xf]  ;;  %v364_v56 = vld [vmem:[#allocation6 + $0x40] sm:$0xff]  }
  0x61   :  { %5582 = vst [vmem:[#allocation48_spill] sm:$0xff] %v4405_v9  ;;  %v4429_v21 = vld [vmem:[#allocation10 + $0x10] sm:$0xf0]  ;;  %v4431_v22 = vld [vmem:[#allocation10 + $0x18] sm:$0xf]  ;;  %v365_v57 = vld [vmem:[#allocation6 + $0x48] sm:$0xff]  }
  0x62   :  { %5583 = vst [vmem:[#allocation49_spill] sm:$0xff] %v4407_v10  ;;  %v4433_v23 = vld [vmem:[#allocation10 + $0x18] sm:$0xf0]  ;;  %v4435_v24 = vld [vmem:[#allocation10 + $0x20] sm:$0xf]  ;;  %v366_v58 = vld [vmem:[#allocation6 + $0x50] sm:$0xff]  }
  0x63   :  { %5584 = vst [vmem:[#allocation50_spill] sm:$0xff] %v4409_v11  ;;  %v4437_v25 = vld [vmem:[#allocation10 + $0x20] sm:$0xf0]  ;;  %v4439_v26 = vld [vmem:[#allocation10 + $0x28] sm:$0xf]  ;;  %v367_v59 = vld [vmem:[#allocation6 + $0x58] sm:$0xff]  }
  0x64   :  { %5585 = vst [vmem:[#allocation51_spill] sm:$0xff] %v4411_v12  ;;  %v4441_v27 = vld [vmem:[#allocation10 + $0x28] sm:$0xf0]  ;;  %v4443_v28 = vld [vmem:[#allocation10 + $0x30] sm:$0xf]  ;;  %v368_v60 = vld [vmem:[#allocation6 + $0x60] sm:$0xff]  }
  0x65   :  { %5586 = vst [vmem:[#allocation52_spill] sm:$0xff] %v4413_v13  ;;  %v4445_v29 = vld [vmem:[#allocation10 + $0x30] sm:$0xf0]  ;;  %v4447_v30 = vld [vmem:[#allocation10 + $0x38] sm:$0xf]  ;;  %v369_v61 = vld [vmem:[#allocation6 + $0x68] sm:$0xff]  }
  0x66   :  { %5587 = vst [vmem:[#allocation53_spill] sm:$0xff] %v4415_v14  ;;  %v4449_v31 = vld [vmem:[#allocation10 + $0x38] sm:$0xf0]  ;;  %v4451_v32 = vld [vmem:[#allocation7] sm:$0xf]  ;;  %v370_v62 = vld [vmem:[#allocation6 + $0x70] sm:$0xff]  }
  0x67   :  { %5588 = vst [vmem:[#allocation54_spill] sm:$0xff] %v4417_v15  ;;  %v4453_v33 = vld [vmem:[#allocation7] sm:$0xf0]  ;;  %v4455_v34 = vld [vmem:[#allocation7 + $0x8] sm:$0xf]  ;;  %v371_v63 = vld [vmem:[#allocation6 + $0x78] sm:$0xff]  }
  0x68   :  { %5589 = vst [vmem:[#allocation55_spill] sm:$0xff] %v4439_v26  ;;  %v4457_v35 = vld [vmem:[#allocation7 + $0x8] sm:$0xf0]  ;;  %v4459_v36 = vld [vmem:[#allocation7 + $0x10] sm:$0xf]  ;;  %s4515_s15 = smov 0  }
  0x69   :  { %5590 = vst [vmem:[#allocation56_spill] sm:$0xff] %v4441_v27  ;;  %v4461_v37 = vld [vmem:[#allocation7 + $0x10] sm:$0xf0]  ;;  %v4463_v38 = vld [vmem:[#allocation7 + $0x18] sm:$0xf] }
  0x6a   :  { %5591 = vst [vmem:[#allocation57_spill] sm:$0xff] %v4443_v28  ;;  %v4465_v39 = vld [vmem:[#allocation7 + $0x18] sm:$0xf0]  ;;  %v4467_v40 = vld [vmem:[#allocation7 + $0x20] sm:$0xf] }
  0x6b   :  { %5592 = vst [vmem:[#allocation58_spill] sm:$0xff] %v4445_v29  ;;  %v4469_v41 = vld [vmem:[#allocation7 + $0x20] sm:$0xf0]  ;;  %v4471_v42 = vld [vmem:[#allocation7 + $0x28] sm:$0xf] }
  0x6c   :  { %5593 = vst [vmem:[#allocation59_spill] sm:$0xff] %v4447_v30  ;;  %v4473_v43 = vld [vmem:[#allocation7 + $0x28] sm:$0xf0]  ;;  %v4475_v44 = vld [vmem:[#allocation7 + $0x30] sm:$0xf] }
  0x6d   :  { %5594 = vst [vmem:[#allocation60_spill] sm:$0xff] %v4449_v31  ;;  %v4477_v45 = vld [vmem:[#allocation7 + $0x30] sm:$0xf0]  ;;  %v4479_v46 = vld [vmem:[#allocation7 + $0x38] sm:$0xf] }
  0x6e   :  { %5595 = vst [vmem:[#allocation61_spill] sm:$0xff] %v4451_v32  ;;  %v4481_v47 = vld [vmem:[#allocation7 + $0x38] sm:$0xf0] }
  0x6f   :  { %5596 = vst [vmem:[#allocation62_spill] sm:$0xff] %v4453_v33 }
  0x70   :  { %5597 = vst [vmem:[#allocation63_spill] sm:$0xff] %v4455_v34 }
  0x71   :  { %5598 = vst [vmem:[#allocation64_spill] sm:$0xff] %v4457_v35 }
  0x72   :  { %5599 = vst [vmem:[#allocation65_spill] sm:$0xff] %v4459_v36 }
  0x73   :  { %5600 = vst [vmem:[#allocation66_spill] sm:$0xff] %v4461_v37 }
  0x74   :  { %5601 = vst [vmem:[#allocation67_spill] sm:$0xff] %v4463_v38 }
  0x75   :  { %5602 = vst [vmem:[#allocation68_spill] sm:$0xff] %v4465_v39 }
  0x76   :  { %5603 = vst [vmem:[#allocation69_spill] sm:$0xff] %v4467_v40 }
  0x77   :  { %5604 = vst [vmem:[#allocation70_spill] sm:$0xff] %v4469_v41 }
  0x78   :  { %5605 = vst [vmem:[#allocation71_spill] sm:$0xff] %v4471_v42 }
  0x79   :  { %5606 = vst [vmem:[#allocation72_spill] sm:$0xff] %v4473_v43 }
  0x7a   :  { %5607 = vst [vmem:[#allocation73_spill] sm:$0xff] %v4475_v44 }
  0x7b   :  { %5608 = vst [vmem:[#allocation74_spill] sm:$0xff] %v4477_v45 }
  0x7c   :  { %5609 = vst [vmem:[#allocation75_spill] sm:$0xff] %v4479_v46 }
  0x7d   :  { %5610 = vst [vmem:[#allocation76_spill] sm:$0xff] %v4481_v47 }
  0x7e LB: > { %5611 = vst [vmem:[#allocation77_spill] sm:$0xff] %v4101_v63  ;;  %s4569_s18 = sshll.u32 %s4165_s15, 6  ;;  %s413_s16 = scalar_lea.vmem %s5517_s7, %s4165_s15  ;;  %v5619_v32 = vld [vmem:[#allocation61_spill] sm:$0xff]  ;;  %v5620_v33 = vld [vmem:[#allocation62_spill] sm:$0xff]  ;;  %v5623_v34 = vld [vmem:[#allocation63_spill] sm:$0xff]  ;;  %s4165_s15 = sphi %s4515_s15, %s377_s15   ;;  %v4161_v48 = vphi %v356_v48, %v5683_v48   ;;  %v4157_v49 = vphi %v357_v49, %v5682_v49   ;;  %v4153_v50 = vphi %v358_v50, %v5681_v50   ;;  %v4149_v51 = vphi %v359_v51, %v5680_v51   ;;  %v4145_v52 = vphi %v360_v52, %v5679_v52   ;;  %v4141_v53 = vphi %v361_v53, %v5678_v53   ;;  %v4137_v54 = vphi %v362_v54, %v5677_v54   ;;  %v4133_v55 = vphi %v363_v55, %v5676_v55   ;;  %v4129_v56 = vphi %v364_v56, %v5675_v56   ;;  %v4125_v57 = vphi %v365_v57, %v5674_v57   ;;  %v4121_v58 = vphi %v366_v58, %v5673_v58   ;;  %v4117_v59 = vphi %v367_v59, %v5672_v59   ;;  %v4113_v60 = vphi %v368_v60, %v5671_v60   ;;  %v4109_v61 = vphi %v369_v61, %v5670_v61   ;;  %v4105_v62 = vphi %v370_v62, %v5669_v62   ;;  %v4101_v63 = vphi %v371_v63, %v5668_v63  }
  0x7f   : > { %5612 = vst [vmem:[#allocation78_spill] sm:$0xff] %v4105_v62  ;;  %s396_s14 = scalar_lea.vmem [#allocation13], %s4569_s18  ;;  %v5621_v40 = vld [vmem:[#allocation69_spill] sm:$0xff]  ;;  %v5622_v41 = vld [vmem:[#allocation70_spill] sm:$0xff]  ;;  %v5624_v35 = vld [vmem:[#allocation64_spill] sm:$0xff]  ;;  %s588_s25 = scalar_lea.vmem [#allocation15], %s4569_s18 }
  0x80   : > { %5613 = vst [vmem:[#allocation79_spill] sm:$0xff] %v4109_v61  ;;  %v3217_v31 = vld [vmem:[%s396_s14 + $0x38] sm:$0xff]  ;;  %v3216_v30 = vld [vmem:[%s396_s14 + $0x30] sm:$0xff]  ;;  %v3215_v29 = vld [vmem:[%s396_s14 + $0x28] sm:$0xff]  ;;  %s605_s2 = scalar_lea.vmem [#allocation16], %s4165_s15  ;;  %s977_s22 = scalar_lea.vmem [#allocation18], %s4569_s18 }
  0x81   : > { %5614 = vst [vmem:[#allocation80_spill] sm:$0xff] %v4113_v60  ;;  %514 = vmatpush.bf16.msra.mxu0 %v3217_v31  ;;  %3365 = vmatpush.bf16.msra.mxu2 %v3217_v31  ;;  %v3214_v28 = vld [vmem:[%s396_s14 + $0x20] sm:$0xff]  ;;  %v3213_v27 = vld [vmem:[%s396_s14 + $0x18] sm:$0xff]  ;;  %v3212_v26 = vld [vmem:[%s396_s14 + $0x10] sm:$0xff]  ;;  %s933_s29 = sld [smem:[#allocation2 + %s4165_s15]]  ;;  %s994_s24 = scalar_lea.vmem [#allocation19], %s4165_s15 }
  0x82   : > { %5615 = vst [vmem:[#allocation81_spill] sm:$0xff] %v4117_v59  ;;  %v3211_v31 = vld [vmem:[%s396_s14 + $0x8] sm:$0xff]  ;;  %v5627_v36 = vld [vmem:[#allocation65_spill] sm:$0xff]  ;;  %v5628_v37 = vld [vmem:[#allocation66_spill] sm:$0xff]  ;;  %s4732_s8 = scalar_lea.vmem [#allocation21], %s4569_s18  ;;  %s1138_s11 = scalar_lea.vmem %s5523_s13, %s4165_s15 }
  0x83   : > { %5616 = vst [vmem:[#allocation82_spill] sm:$0xff] %v4121_v58  ;;  %v5625_v42 = vld [vmem:[#allocation71_spill] sm:$0xff]  ;;  %v5626_v43 = vld [vmem:[#allocation72_spill] sm:$0xff]  ;;  %v5629_v44 = vld [vmem:[#allocation73_spill] sm:$0xff]  ;;  %s377_s15 = sadd.s32 1, %s4165_s15  }
  0x84   : > { %5617 = vst [vmem:[#allocation83_spill] sm:$0xff] %v4125_v57  ;;  %v5630_v45 = vld [vmem:[#allocation74_spill] sm:$0xff]  ;;  %v5631_v38 = vld [vmem:[#allocation67_spill] sm:$0xff]  ;;  %v5632_v39 = vld [vmem:[#allocation68_spill] sm:$0xff]  ;;  %p4775_p0 = scmp.ge.s32.totalorder %s377_s15, 6  }
  0x85   : > { %5618 = vst [vmem:[#allocation84_spill] sm:$0xff] %v4129_v56  ;;  %515 = vmatpush.bf16.msra.mxu0 %v3216_v30  ;;  %3366 = vmatpush.bf16.msra.mxu2 %v3216_v30  ;;  %v3210_v30 = vld [vmem:[%s396_s14] sm:$0xff]  ;;  %v5634_v47 = vld [vmem:[#allocation76_spill] sm:$0xff]  ;;  %v5637_v2 = vld [vmem:[#allocation41_spill] sm:$0xff]  ;;  %s5235_s7 = smov (%p4775_p0), 0  }
  0x86   : > { %v5633_v46 = vld [vmem:[#allocation75_spill] sm:$0xff]  ;;  %v5636_v1 = vld [vmem:[#allocation40_spill] sm:$0xff]  ;;  %v5638_v3 = vld [vmem:[#allocation42_spill] sm:$0xff] }
  0x87   : > { %v5635_v0 = vld [vmem:[#allocation39_spill] sm:$0xff]  ;;  %v5640_v5 = vld [vmem:[#allocation44_spill] sm:$0xff]  ;;  %v5641_v6 = vld [vmem:[#allocation45_spill] sm:$0xff]  ;;  %s934_s27 = sadd.f32 1.0, %s933_s29 }
  0x88   : > { %v5639_v4 = vld [vmem:[#allocation43_spill] sm:$0xff]  ;;  %v5642_v7 = vld [vmem:[#allocation46_spill] sm:$0xff]  ;;  %v5644_v9 = vld [vmem:[#allocation48_spill] sm:$0xff] }
  0x89   : > { %516 = vmatpush.bf16.msra.mxu0 %v3215_v29  ;;  %3367 = vmatpush.bf16.msra.mxu2 %v3215_v29  ;;  %v2478_v29 = vor.u32 %v5620_v33, %v5619_v32  ;;  %v713_v32 = vpack.c.bf16 %v4109_v61, %v4113_v60  ;;  %v2502_v33 = vor.u32 %v5630_v45, %v5629_v44  ;;  %v5643_v8 = vld [vmem:[#allocation47_spill] sm:$0xff]  ;;  %v5645_v10 = vld [vmem:[#allocation49_spill] sm:$0xff]  ;;  %v5646_v11 = vld [vmem:[#allocation50_spill] sm:$0xff] }
  0x8a   : > { %v5647_v12 = vld [vmem:[#allocation51_spill] sm:$0xff]  ;;  %v5648_v13 = vld [vmem:[#allocation52_spill] sm:$0xff]  ;;  %v5649_v14 = vld [vmem:[#allocation53_spill] sm:$0xff] }
  0x8b   : > { %v5650_v15 = vld [vmem:[#allocation54_spill] sm:$0xff] }
  0x8d   : > { %517 = vmatpush.bf16.msra.mxu0 %v3214_v28  ;;  %3368 = vmatpush.bf16.msra.mxu2 %v3214_v28  ;;  %v2494_v28 = vor.u32 %v5622_v41, %v5621_v40 }
  0x91   : > { %518 = vmatpush.bf16.msra.mxu0 %v3213_v27  ;;  %3369 = vmatpush.bf16.msra.mxu2 %v3213_v27  ;;  %v714_v27 = vpack.c.bf16 %v4101_v63, %v4105_v62 }
  0x95   : > { %519 = vmatpush.bf16.msra.mxu0 %v3212_v26  ;;  %3370 = vmatpush.bf16.msra.mxu2 %v3212_v26  ;;  %v2482_v26 = vor.u32 %v5624_v35, %v5623_v34 }
  0x99   : > { %520 = vmatpush.bf16.msra.mxu0 %v3211_v31  ;;  %3371 = vmatpush.bf16.msra.mxu2 %v3211_v31  ;;  %v2498_v31 = vor.u32 %v5626_v43, %v5625_v42 }
  0x9d   : > { %521 = vmatpush.bf16.msra.mxu0 %v3210_v30  ;;  %3372 = vmatpush.bf16.msra.mxu2 %v3210_v30  ;;  %v712_v30 = vpack.c.bf16 %v4117_v59, %v4121_v58 }
  0xa0   : > { %522 = vmatmul.bf16.vlgmr.msra.gmra.mxu0 %v2478_v29  ;;  %542 = vmatmul.bf16.vlgmr.msra.gmra.mxu2 %v2494_v28  ;;  %v711_v29 = vpack.c.bf16 %v4125_v57, %v4129_v56  ;;  %v710_v28 = vpack.c.bf16 %v4133_v55, %v4137_v54 }
  0xa1   : > { %763 = vmatpush.bf16.msrb.mxu2 %v714_v27  ;;  %v2486_v27 = vor.u32 %v5628_v37, %v5627_v36 }
  0xa5   : > { %764 = vmatpush.bf16.msrb.mxu2 %v713_v32  ;;  %v709_v32 = vpack.c.bf16 %v4141_v53, %v4145_v52 }
  0xa9   : > { %765 = vmatpush.bf16.msrb.mxu2 %v712_v30  ;;  %v2490_v30 = vor.u32 %v5632_v39, %v5631_v38 }
  0xad   : > { %766 = vmatpush.bf16.msrb.mxu2 %v711_v29  ;;  %v2506_v29 = vor.u32 %v5634_v47, %v5633_v46 }
  0xb0   : > { %527 = vmatmul.bf16.gmra.mxu0 %v2482_v26  ;;  %547 = vmatmul.bf16.gmra.mxu2 %v2498_v31  ;;  %v708_v26 = vpack.c.bf16 %v4149_v51, %v4153_v50  ;;  %v707_v31 = vpack.c.bf16 %v4157_v49, %v4161_v48 }
  0xb1   : > { %767 = vmatpush.bf16.msrb.mxu2 %v710_v28  ;;  %v3226_v28 = vld [vmem:[%s588_s25 + $0x38] sm:$0xff] }
  0xb2   : > { %658 = vmatpush.bf16.msra.mxu1 %v3226_v28  ;;  %3373 = vmatpush.bf16.msra.mxu3 %v3226_v28  ;;  %v3220_v28 = vld [vmem:[%s588_s25 + $0x8] sm:$0xff] }
  0xb5   : > { %768 = vmatpush.bf16.msrb.mxu2 %v709_v32  ;;  %v3224_v32 = vld [vmem:[%s588_s25 + $0x28] sm:$0xff] }
  0xb9   : > { %769 = vmatpush.bf16.msrb.mxu2 %v708_v26  ;;  %v3223_v26 = vld [vmem:[%s588_s25 + $0x20] sm:$0xff] }
  0xbd   : > { %770 = vmatpush.bf16.msrb.mxu2 %v707_v31  ;;  %v2579_v31 = vor.u32 %v5638_v3, %v5637_v2 }
  0xc0   : > { %532 = vmatmul.bf16.gmra.mxu0 %v2486_v27  ;;  %552 = vmatmul.bf16.gmra.mxu2 %v2502_v33  ;;  %v2575_v33 = vor.u32 %v5636_v1, %v5635_v0  ;;  %v3225_v27 = vld [vmem:[%s588_s25 + $0x30] sm:$0xff] }
  0xc1   : > { %659 = vmatpush.bf16.msra.mxu1 %v3225_v27  ;;  %3374 = vmatpush.bf16.msra.mxu3 %v3225_v27  ;;  %v3219_v27 = vld [vmem:[%s588_s25] sm:$0xff] }
  0xc5   : > { %660 = vmatpush.bf16.msra.mxu1 %v3224_v32  ;;  %3375 = vmatpush.bf16.msra.mxu3 %v3224_v32  ;;  %v2587_v32 = vor.u32 %v5642_v7, %v5641_v6 }
  0xc9   : > { %661 = vmatpush.bf16.msra.mxu1 %v3223_v26  ;;  %3376 = vmatpush.bf16.msra.mxu3 %v3223_v26  ;;  %v2591_v26 = vor.u32 %v5644_v9, %v5643_v8 }
  0xd0   : > { %537 = vmatmul.bf16.gmra.mxu0 %v2490_v30  ;;  %557 = vmatmul.bf16.gmra.mxu2 %v2506_v29  ;;  %v3222_v30 = vld [vmem:[%s588_s25 + $0x18] sm:$0xff]  ;;  %v2583_v29 = vor.u32 %v5640_v5, %v5639_v4  ;;  %v2595_v5 = vor.u32 %v5646_v11, %v5645_v10 }
  0xd1   : > { %662 = vmatpush.bf16.msra.mxu1 %v3222_v30  ;;  %3377 = vmatpush.bf16.msra.mxu3 %v3222_v30  ;;  %v4625_v30 = vld [vmem:[%s413_s16] ss:$0 sm:$0xff] }
  0xe0   : > { %771 = vmatmul.bf16.vlgmr.msrb.gmra.mxu2 %v2575_v33  ;;  %v3221_v33 = vld [vmem:[%s588_s25 + $0x10] sm:$0xff] }
  0xe1   : > { %663 = vmatpush.bf16.msra.mxu1 %v3221_v33  ;;  %3378 = vmatpush.bf16.msra.mxu3 %v3221_v33 }
  0xe5   : > { %664 = vmatpush.bf16.msra.mxu1 %v3220_v28  ;;  %3379 = vmatpush.bf16.msra.mxu3 %v3220_v28 }
  0xe9   : > { %665 = vmatpush.bf16.msra.mxu1 %v3219_v27  ;;  %3380 = vmatpush.bf16.msra.mxu3 %v3219_v27 }
  0xf0   : > { %776 = vmatmul.bf16.gmra.mxu2 %v2579_v31 }
 0x100   : > { %781 = vmatmul.bf16.gmra.mxu2 %v2583_v29 }
 0x110   : > { %786 = vmatmul.bf16.gmra.mxu2 %v2587_v32 }
 0x11d   : > { %v523_v31 = vpop.f32.mrf.mxu0 }
 0x11e   : > { %v524_v29 = vadd.f32 %v4625_v30, %v523_v31 }
 0x120   : > { %791 = vmatmul.bf16.gmra.mxu2 %v2591_v26  ;;  %v563_v27 = vmax.f32 %v524_v29, 0.0 }
 0x123   : > { %v543_v33 = vpop.f32.mrf.mxu2 }
 0x124   : > { %v544_v1 = vadd.f32 %v4625_v30, %v543_v33 }
 0x125   : > { %v525_v28 = vpop.f32.mrf.mxu0 }
 0x126   : > { %v526_v0 = vadd.f32 %v4625_v30, %v525_v28  ;;  %v571_v26 = vmax.f32 %v544_v1, 0.0  ;;  %v2599_v1 = vor.u32 %v5648_v13, %v5647_v12 }
 0x128   : > { %v564_v32 = vmax.f32 %v526_v0, 0.0 }
 0x12a   : > { %v579_v2 = vpack.c.bf16 %v564_v32, %v563_v27 }
 0x12b   : > { %v545_v3 = vpop.f32.mrf.mxu2 }
 0x12c   : > { %v546_v4 = vadd.f32 %v4625_v30, %v545_v3  ;;  %666 = vmatmul.bf16.vlgmr.msra.gmra.mxu1 %v579_v2 }
 0x12d   : > { %v528_v6 = vpop.f32.mrf.mxu0 }
 0x12e   : > { %v572_v7 = vmax.f32 %v546_v4, 0.0  ;;  %v529_v29 = vadd.f32 %v4625_v30, %v528_v6 }
 0x130   : > { %v583_v31 = vpack.c.bf16 %v572_v7, %v571_v26  ;;  %796 = vmatmul.bf16.gmra.mxu2 %v2595_v5  ;;  %v565_v8 = vmax.f32 %v529_v29, 0.0 }
 0x132   : > { %686 = vmatmul.bf16.vlgmr.msra.gmra.mxu3 %v583_v31 }
 0x133   : > { %v548_v28 = vpop.f32.mrf.mxu2 }
 0x134   : > { %v549_v3 = vadd.f32 %v4625_v30, %v548_v28 }
 0x135   : > { %v530_v0 = vpop.f32.mrf.mxu0 }
 0x136   : > { %v531_v33 = vadd.f32 %v4625_v30, %v530_v0  ;;  %v573_v5 = vmax.f32 %v549_v3, 0.0 }
 0x138   : > { %v566_v27 = vmax.f32 %v531_v33, 0.0 }
 0x13a   : > { %v580_v2 = vpack.c.bf16 %v566_v27, %v565_v8 }
 0x13b   : > { %v550_v32 = vpop.f32.mrf.mxu2 }
 0x13c   : > { %v551_v9 = vadd.f32 %v4625_v30, %v550_v32  ;;  %671 = vmatmul.bf16.gmra.mxu1 %v580_v2 }
 0x13d   : > { %v533_v4 = vpop.f32.mrf.mxu0 }
 0x13e   : > { %v574_v6 = vmax.f32 %v551_v9, 0.0  ;;  %v534_v26 = vadd.f32 %v4625_v30, %v533_v4  ;;  %v2603_v9 = vor.u32 %v5650_v15, %v5649_v14 }
 0x140   : > { %v584_v7 = vpack.c.bf16 %v574_v6, %v573_v5  ;;  %801 = vmatmul.bf16.gmra.mxu2 %v2599_v1  ;;  %v567_v0 = vmax.f32 %v534_v26, 0.0 }
 0x142   : > { %691 = vmatmul.bf16.gmra.mxu3 %v584_v7 }
 0x143   : > { %v553_v31 = vpop.f32.mrf.mxu2 }
 0x144   : > { %v554_v33 = vadd.f32 %v4625_v30, %v553_v31 }
 0x145   : > { %v535_v29 = vpop.f32.mrf.mxu0 }
 0x146   : > { %v536_v8 = vadd.f32 %v4625_v30, %v535_v29  ;;  %v575_v1 = vmax.f32 %v554_v33, 0.0 }
 0x148   : > { %v568_v28 = vmax.f32 %v536_v8, 0.0 }
 0x14a   : > { %v581_v27 = vpack.c.bf16 %v568_v28, %v567_v0 }
 0x14b   : > { %v555_v2 = vpop.f32.mrf.mxu2 }
 0x14c   : > { %v556_v32 = vadd.f32 %v4625_v30, %v555_v2  ;;  %676 = vmatmul.bf16.gmra.mxu1 %v581_v27 }
 0x14d   : > { %v538_v3 = vpop.f32.mrf.mxu0 }
 0x14e   : > { %v576_v4 = vmax.f32 %v556_v32, 0.0  ;;  %v539_v6 = vadd.f32 %v4625_v30, %v538_v3 }
 0x150   : > { %v585_v5 = vpack.c.bf16 %v576_v4, %v575_v1  ;;  %806 = vmatmul.bf16.gmra.mxu2 %v2603_v9  ;;  %v569_v29 = vmax.f32 %v539_v6, 0.0 }
 0x152   : > { %696 = vmatmul.bf16.gmra.mxu3 %v585_v5 }
 0x153   : > { %v558_v7 = vpop.f32.mrf.mxu2 }
 0x154   : > { %v559_v8 = vadd.f32 %v4625_v30, %v558_v7 }
 0x155   : > { %v540_v26 = vpop.f32.mrf.mxu0 }
 0x156   : > { %v541_v31 = vadd.f32 %v4625_v30, %v540_v26  ;;  %v577_v33 = vmax.f32 %v559_v8, 0.0  ;;  %v4665_v8 = vld [vmem:[%s605_s2] ss:$0 sm:$0xff] }
 0x158   : > { %v570_v0 = vmax.f32 %v541_v31, 0.0 }
 0x15a   : > { %v582_v28 = vpack.c.bf16 %v570_v0, %v569_v29 }
 0x15b   : > { %v560_v27 = vpop.f32.mrf.mxu2 }
 0x15c   : > { %v561_v2 = vadd.f32 %v4625_v30, %v560_v27  ;;  %681 = vmatmul.bf16.gmra.mxu1 %v582_v28 }
 0x15e   : > { %v578_v32 = vmax.f32 %v561_v2, 0.0 }
 0x160   : > { %v586_v9 = vpack.c.bf16 %v578_v32, %v577_v33 }
 0x162   : > { %701 = vmatmul.bf16.gmra.mxu3 %v586_v9 }
 0x163   : > { %v4649_v3 = vpop.f32.mrf.mxu2 }
 0x16b   : > { %v4651_v1 = vpop.f32.mrf.mxu2 }
 0x173   : > { %v4653_v4 = vpop.f32.mrf.mxu2 }
 0x17b   : > { %v4655_v5 = vpop.f32.mrf.mxu2 }
 0x183   : > { %v4657_v6 = vpop.f32.mrf.mxu2 }
 0x18b   : > { %v4659_v7 = vpop.f32.mrf.mxu2 }
 0x193   : > { %v787_v26 = vpop.f32.mrf.mxu2 }
 0x19b   : > { %v789_v30 = vpop.f32.mrf.mxu2 }
 0x1a3   : > { %v792_v29 = vpop.f32.mrf.mxu2 }
 0x1a9   : > { %v4661_v31 = vpop.f32.mrf.mxu1 }
 0x1ab   : > { %v794_v0 = vpop.f32.mrf.mxu2 }
 0x1b1   : > { %v669_v33 = vpop.f32.mrf.mxu1 }
 0x1b3   : > { %v797_v9 = vpop.f32.mrf.mxu2 }
 0x1b5   : > { %v687_v28 = vpop.f32.mrf.mxu3 }
 0x1b6   : > { %v688_v27 = vadd.f32 %v4665_v8, %v687_v28 }
 0x1b8   : > { %v793_v2 = vadd.f32 %v792_v29, %v688_v27 }
 0x1b9   : > { %v672_v10 = vpop.f32.mrf.mxu1 }
 0x1bb   : > { %v799_v12 = vpop.f32.mrf.mxu2 }
 0x1bd   : > { %v689_v32 = vpop.f32.mrf.mxu3 }
 0x1c1   : > { %v674_v13 = vpop.f32.mrf.mxu1 }
 0x1c3   : > { %v802_v15 = vpop.f32.mrf.mxu2 }
 0x1c5   : > { %v692_v11 = vpop.f32.mrf.mxu3 }
 0x1c6   : > { %v693_v62 = vadd.f32 %v4665_v8, %v692_v11 }
 0x1c9   : > { %v677_v35 = vpop.f32.mrf.mxu1 }
 0x1cb   : > { %v804_v36 = vpop.f32.mrf.mxu2 }
 0x1cd   : > { %v694_v14 = vpop.f32.mrf.mxu3 }
 0x1ce   : > { %v695_v46 = vadd.f32 %v4665_v8, %v694_v14 }
 0x1d0   : > { %v800_v58 = vadd.f32 %v799_v12, %v695_v46  ;;  %v678_v46 = vadd.f32 %v4665_v8, %v677_v35 }
 0x1d1   : > { %v679_v38 = vpop.f32.mrf.mxu1 }
 0x1d3   : > { %v807_v39 = vpop.f32.mrf.mxu2 }
 0x1d5   : > { %v697_v34 = vpop.f32.mrf.mxu3 }
 0x1d6   : > { %v698_v42 = vadd.f32 %v4665_v8, %v697_v34  ;;  %v798_v34 = vadd.f32 %v797_v9, %v693_v62 }
 0x1d8   : > { %v803_v61 = vadd.f32 %v802_v15, %v698_v42  ;;  %v680_v42 = vadd.f32 %v4665_v8, %v679_v38  ;;  %v670_v38 = vadd.f32 %v4665_v8, %v669_v33 }
 0x1d9   : > { %v682_v28 = vpop.f32.mrf.mxu1 }
 0x1da   : > { %v683_v11 = vadd.f32 %v4665_v8, %v682_v28 }
 0x1db   : > { %v809_v45 = vpop.f32.mrf.mxu2 }
 0x1dd   : > { %v699_v37 = vpop.f32.mrf.mxu3 }
 0x1de   : > { %v700_v29 = vadd.f32 %v4665_v8, %v699_v37 }
 0x1e0   : > { %v805_v47 = vadd.f32 %v804_v36, %v700_v29  ;;  %v3235_v29 = vld [vmem:[%s977_s22 + $0x38] sm:$0xff] }
 0x1e1   : > { %v684_v56 = vpop.f32.mrf.mxu1  ;;  %1047 = vmatpush.bf16.msrb.mxu0 %v3235_v29 }
 0x1e2   : > { %v825_v37 = vmax.f32 %v805_v47, 0.0  ;;  %v685_v14 = vadd.f32 %v4665_v8, %v684_v56  ;;  %v788_v47 = vadd.f32 %v787_v26, %v683_v11  ;;  %v668_v26 = vadd.f32 %v4665_v8, %v4661_v31 }
 0x1e3   : > { %v2607_v31 = vor.u32 %v4421_v17, %v4419_v16 }
 0x1e4   : > { %v818_v62 = vmax.f32 %v788_v47, 0.0 }
 0x1e5   : > { %v702_v40 = vpop.f32.mrf.mxu3 }
 0x1e6   : > { %v703_v41 = vadd.f32 %v4665_v8, %v702_v40  ;;  %v690_v40 = vadd.f32 %v4665_v8, %v689_v32 }
 0x1e8   : > { %v808_v43 = vadd.f32 %v807_v39, %v703_v41  ;;  %v824_v39 = vmax.f32 %v803_v61, 0.0  ;;  %v795_v41 = vadd.f32 %v794_v0, %v690_v40  ;;  %v783_v61 = vadd.f32 %v4657_v6, %v678_v46  ;;  %v5651_v40 = vld [vmem:[#allocation55_spill] sm:$0xff] }
 0x1e9   : > { %v775_v0 = vadd.f32 %v4651_v1, %v670_v38  ;;  %v773_v6 = vadd.f32 %v4649_v3, %v668_v26  ;;  %v2611_v1 = vor.u32 %v4425_v19, %v4423_v18  ;;  %v2615_v3 = vor.u32 %v4429_v21, %v4427_v20  ;;  %v4843_v18 = vld [vmem:[#allocation22 + $0xc] sm:$0xf] (%p4775_p0)  ;;  %v4845_v19 = vld [vmem:[#allocation22 + $0x8] sm:$0xf] (%p4775_p0)  ;;  %v4847_v20 = vld [vmem:[#allocation22 + $0x10] sm:$0xf0] (%p4775_p0) }
 0x1ea   : > { %v826_v60 = vmax.f32 %v808_v43, 0.0  ;;  %v834_v36 = vpack.c.bf16 %v825_v37, %v824_v39  ;;  %v821_v15 = vmax.f32 %v795_v41, 0.0  ;;  %v790_v43 = vadd.f32 %v789_v30, %v685_v14  ;;  %v5652_v37 = vld [vmem:[#allocation56_spill] sm:$0xff]  ;;  %v3231_v14 = vld [vmem:[%s977_s22 + $0x18] sm:$0xff]  ;;  %5694 = vst [vmem:[#allocation49_spill] sm:$0xff] (%p4775_p0), %v4843_v18 }
 0x1eb   : > { %v813_v33 = vmax.f32 %v775_v0, 0.0  ;;  %v812_v9 = vmax.f32 %v773_v6, 0.0  ;;  %v3234_v39 = vld [vmem:[%s977_s22 + $0x30] sm:$0xff]  ;;  %v3233_v41 = vld [vmem:[%s977_s22 + $0x28] sm:$0xff]  ;;  %5695 = vst [vmem:[#allocation50_spill] sm:$0xff] (%p4775_p0), %v4845_v19 }
 0x1ec   : > { %v819_v56 = vmax.f32 %v790_v43, 0.0  ;;  %1048 = vmatpush.bf16.msrb.mxu0 %v3234_v39  ;;  %v3228_v43 = vld [vmem:[%s977_s22] sm:$0xff]  ;;  %5696 = vst [vmem:[#allocation51_spill] sm:$0xff] (%p4775_p0), %v4847_v20  ;;  %v4965_v18 = vld [vmem:[#allocation22 + $0xec] sm:$0xf0] (%p4775_p0) }
 0x1ed   : > { %v704_v27 = vpop.f32.mrf.mxu3  ;;  %v828_v28 = vpack.c.bf16 %v813_v33, %v812_v9  ;;  %5739 = vst [vmem:[#allocation100_spill] sm:$0xff] (%p4775_p0), %v4965_v18  ;;  %v4973_v19 = vld [vmem:[#allocation22 + $0x100] sm:$0xf] (%p4775_p0)  ;;  %v5097_v20 = vld [vmem:[#allocation22 + $0x1f4] sm:$0xf0] (%p4775_p0) }
 0x1ee   : > { %v705_v44 = vadd.f32 %v4665_v8, %v704_v27  ;;  %v823_v27 = vmax.f32 %v800_v58, 0.0  ;;  %v785_v58 = vadd.f32 %v4659_v7, %v680_v42  ;;  %v831_v35 = vpack.c.bf16 %v819_v56, %v818_v62  ;;  %v3229_v42 = vld [vmem:[%s977_s22 + $0x8] sm:$0xff]  ;;  %5743 = vst [vmem:[#allocation104_spill] sm:$0xff] (%p4775_p0), %v4973_v19  ;;  %v5113_v19 = vld [vmem:[#allocation22 + $0x214] sm:$0xf0] (%p4775_p0) }
 0x1ef   : > { %v816_v7 = vmax.f32 %v783_v61, 0.0  ;;  %5788 = vst [vmem:[#allocation149_spill] sm:$0xff] (%p4775_p0), %v5097_v20  ;;  %v5119_v20 = vld [vmem:[#allocation22 + $0x22c] sm:$0xf] (%p4775_p0) }
 0x1f0   : > { %v810_v63 = vadd.f32 %v809_v45, %v705_v44  ;;  %v822_v44 = vmax.f32 %v798_v34, 0.0  ;;  %v820_v45 = vmax.f32 %v793_v2, 0.0  ;;  %v817_v30 = vmax.f32 %v785_v58, 0.0  ;;  %1049 = vmatpush.bf16.msrb.mxu0 %v3233_v41  ;;  %v5660_v41 = vld [vmem:[#allocation81_spill] sm:$0xff]  ;;  %5796 = vst [vmem:[#allocation157_spill] sm:$0xff] (%p4775_p0), %v5113_v19 }
 0x1f1   : > { %v2627_v34 = vor.u32 %v5652_v37, %v5651_v40  ;;  %5799 = vst [vmem:[#allocation160_spill] sm:$0xff] (%p4775_p0), %v5119_v20  ;;  %v5135_v19 = vld [vmem:[#allocation22 + $0x24c] sm:$0xf] (%p4775_p0)  ;;  %v5141_v20 = vld [vmem:[#allocation22 + $0x24c] sm:$0xf0] (%p4775_p0) }
 0x1f2   : > { %v827_v59 = vmax.f32 %v810_v63, 0.0  ;;  %v833_v12 = vpack.c.bf16 %v823_v27, %v822_v44  ;;  %v830_v2 = vpack.c.bf16 %v817_v30, %v816_v7  ;;  %v3232_v27 = vld [vmem:[%s977_s22 + $0x20] sm:$0xff]  ;;  %5807 = vst [vmem:[#allocation168_spill] sm:$0xff] (%p4775_p0), %v5135_v19  ;;  %v5157_v19 = vld [vmem:[#allocation22 + $0x26c] sm:$0xf0] (%p4775_p0) }
 0x1f3   : > { %v5654_v44 = vld [vmem:[#allocation58_spill] sm:$0xff]  ;;  %5810 = vst [vmem:[#allocation171_spill] sm:$0xff] (%p4775_p0), %v5141_v20 }
 0x1f4   : > { %v835_v57 = vpack.c.bf16 %v827_v59, %v826_v60  ;;  %v832_v59 = vpack.c.bf16 %v821_v15, %v820_v45  ;;  %v673_v60 = vadd.f32 %v4665_v8, %v672_v10  ;;  %1050 = vmatpush.bf16.msrb.mxu0 %v3232_v27  ;;  %v3230_v15 = vld [vmem:[%s977_s22 + $0x10] sm:$0xff]  ;;  %5818 = vst [vmem:[#allocation179_spill] sm:$0xff] (%p4775_p0), %v5157_v19  ;;  %v5163_v20 = vld [vmem:[#allocation22 + $0x284] sm:$0xf] (%p4775_p0) }
 0x1f5   : > { %v5656_v45 = vld [vmem:[#allocation60_spill] sm:$0xff]  ;;  %5821 = vst [vmem:[#allocation182_spill] sm:$0xff] (%p4775_p0), %v5163_v20  ;;  %v5179_v19 = vld [vmem:[#allocation22 + $0x2a4] sm:$0xf] (%p4775_p0)  ;;  %v5185_v20 = vld [vmem:[#allocation22 + $0x2a8] sm:$0xf] (%p4775_p0) }
 0x1f6   : > { %884 = vmatpush.bf16.msrb.mxu3 %v835_v57  ;;  %v675_v57 = vadd.f32 %v4665_v8, %v674_v13  ;;  %v778_v13 = vadd.f32 %v4653_v4, %v673_v60  ;;  %v2619_v4 = vor.u32 %v4433_v23, %v4431_v22  ;;  %v2623_v8 = vor.u32 %v4437_v25, %v4435_v24  ;;  %v4849_v22 = vld [vmem:[#allocation22 + $0xc] sm:$0xf0] (%p4775_p0)  ;;  %v4851_v23 = vld [vmem:[#allocation22 + $0x18] sm:$0xf0] (%p4775_p0)  ;;  %v4853_v24 = vld [vmem:[#allocation22 + $0x14] sm:$0xf0] (%p4775_p0) }
 0x1f7   :  { %5697 = vst [vmem:[#allocation52_spill] sm:$0xff] (%p4775_p0), %v4849_v22  ;;  %v4855_v25 = vld [vmem:[#allocation22 + $0x24] sm:$0xf] (%p4775_p0) }
 0x1f8   : > { %v780_v63 = vadd.f32 %v4655_v5, %v675_v57  ;;  %v814_v32 = vmax.f32 %v778_v13, 0.0  ;;  %1051 = vmatpush.bf16.msrb.mxu0 %v3231_v14  ;;  %v4709_v57 = vstv %s934_s27  ;;  %5698 = vst [vmem:[#allocation53_spill] sm:$0xff] (%p4775_p0), %v4851_v23  ;;  %v4967_v23 = vld [vmem:[#allocation22 + $0xf8] sm:$0xf0] (%p4775_p0)  ;;  %v5115_v22 = vld [vmem:[#allocation22 + $0x224] sm:$0xf] (%p4775_p0) }
 0x1f9   : > { %v936_v58 = vmul.f32 %v4161_v48, %v4709_v57  ;;  %v937_v56 = vmul.f32 %v4157_v49, %v4709_v57  ;;  %v939_v30 = vmul.f32 %v4149_v51, %v4709_v57  ;;  %v940_v49 = vmul.f32 %v4145_v52, %v4709_v57  ;;  %5699 = vst [vmem:[#allocation54_spill] sm:$0xff] (%p4775_p0), %v4853_v24  ;;  %v4971_v24 = vld [vmem:[#allocation22 + $0x104] sm:$0xf] (%p4775_p0) }
 0x1fa   : > { %885 = vmatpush.bf16.msrb.mxu3 %v834_v36  ;;  %v815_v10 = vmax.f32 %v780_v63, 0.0  ;;  %v5653_v36 = vld [vmem:[#allocation57_spill] sm:$0xff]  ;;  %v938_v63 = vmul.f32 %v4153_v50, %v4709_v57  ;;  %v941_v0 = vmul.f32 %v4141_v53, %v4709_v57  ;;  %v942_v51 = vmul.f32 %v4137_v54, %v4709_v57  ;;  %5700 = vst [vmem:[#allocation55_spill] sm:$0xff] (%p4775_p0), %v4855_v25 }
 0x1fb   : > { %v2631_v11 = vor.u32 %v5654_v44, %v5653_v36  ;;  %v943_v33 = vmul.f32 %v4133_v55, %v4709_v57  ;;  %v5657_v53 = vld [vmem:[#allocation84_spill] sm:$0xff]  ;;  %v947_v27 = vmul.f32 %v5660_v41, %v4709_v57  ;;  %5740 = vst [vmem:[#allocation101_spill] sm:$0xff] (%p4775_p0), %v4967_v23  ;;  %v5041_v23 = vld [vmem:[#allocation22 + $0x188] sm:$0xf] (%p4775_p0) }
 0x1fc   : > { %v829_v5 = vpack.c.bf16 %v815_v10, %v814_v32  ;;  %1052 = vmatpush.bf16.msrb.mxu0 %v3230_v15  ;;  %v3244_v55 = vld [vmem:[%s4732_s8 + $0x38] sm:$0xff]  ;;  %5742 = vst [vmem:[#allocation103_spill] sm:$0xff] (%p4775_p0), %v4971_v24  ;;  %v5075_v24 = vld [vmem:[#allocation22 + $0x1d0] sm:$0xf0] (%p4775_p0) }
 0x1fd   : > { %1191 = vmatpush.bf16.msrb.mxu1 %v3244_v55  ;;  %5768 = vst [vmem:[#allocation129_spill] sm:$0xff] (%p4775_p0), %v5041_v23  ;;  %v5073_v23 = vld [vmem:[#allocation22 + $0x1c8] sm:$0xf] (%p4775_p0) }
 0x1fe   : > { %886 = vmatpush.bf16.msrb.mxu3 %v833_v12  ;;  %v5655_v12 = vld [vmem:[#allocation59_spill] sm:$0xff]  ;;  %5779 = vst [vmem:[#allocation140_spill] sm:$0xff] (%p4775_p0), %v5073_v23  ;;  %v5095_v23 = vld [vmem:[#allocation22 + $0x1f8] sm:$0xf0] (%p4775_p0) }
 0x1ff   : > { %v2635_v46 = vor.u32 %v5656_v45, %v5655_v12  ;;  %v5661_v45 = vld [vmem:[#allocation80_spill] sm:$0xff]  ;;  %5780 = vst [vmem:[#allocation141_spill] sm:$0xff] (%p4775_p0), %v5075_v24 }
 0x200   : > { %1053 = vmatpush.bf16.msrb.mxu0 %v3229_v42  ;;  %v3242_v42 = vld [vmem:[%s4732_s8 + $0x28] sm:$0xff]  ;;  %5787 = vst [vmem:[#allocation148_spill] sm:$0xff] (%p4775_p0), %v5095_v23  ;;  %v5117_v23 = vld [vmem:[#allocation22 + $0x220] sm:$0xf] (%p4775_p0) }
 0x201   :  { %5797 = vst [vmem:[#allocation158_spill] sm:$0xff] (%p4775_p0), %v5115_v22  ;;  %v5137_v22 = vld [vmem:[#allocation22 + $0x248] sm:$0xf] (%p4775_p0) }
 0x202   : > { %887 = vmatpush.bf16.msrb.mxu3 %v832_v59  ;;  %5798 = vst [vmem:[#allocation159_spill] sm:$0xff] (%p4775_p0), %v5117_v23  ;;  %v5139_v23 = vld [vmem:[#allocation22 + $0x250] sm:$0xf0] (%p4775_p0) }
 0x203   :  { %5808 = vst [vmem:[#allocation169_spill] sm:$0xff] (%p4775_p0), %v5137_v22  ;;  %v5159_v22 = vld [vmem:[#allocation22 + $0x278] sm:$0xf0] (%p4775_p0) }
 0x204   : > { %1054 = vmatpush.bf16.msrb.mxu0 %v3228_v43  ;;  %v3241_v43 = vld [vmem:[%s4732_s8 + $0x20] sm:$0xff]  ;;  %5809 = vst [vmem:[#allocation170_spill] sm:$0xff] (%p4775_p0), %v5139_v23  ;;  %v5161_v23 = vld [vmem:[#allocation22 + $0x274] sm:$0xf0] (%p4775_p0) }
 0x205   :  { %5819 = vst [vmem:[#allocation180_spill] sm:$0xff] (%p4775_p0), %v5159_v22  ;;  %v5181_v22 = vld [vmem:[#allocation22 + $0x2a0] sm:$0xf] (%p4775_p0) }
 0x206   : > { %888 = vmatpush.bf16.msrb.mxu3 %v831_v35  ;;  %5820 = vst [vmem:[#allocation181_spill] sm:$0xff] (%p4775_p0), %v5161_v23  ;;  %v5183_v23 = vld [vmem:[#allocation22 + $0x2ac] sm:$0xf] (%p4775_p0) }
 0x207   :  { %5829 = vst [vmem:[#allocation190_spill] sm:$0xff] (%p4775_p0), %v5179_v19  ;;  %v5201_v19 = vld [vmem:[#allocation22 + $0x2c8] sm:$0xf] (%p4775_p0) }
 0x208   :  { %5830 = vst [vmem:[#allocation191_spill] sm:$0xff] (%p4775_p0), %v5181_v22  ;;  %v5203_v22 = vld [vmem:[#allocation22 + $0x2d0] sm:$0xf0] (%p4775_p0) }
 0x209   :  { %5831 = vst [vmem:[#allocation192_spill] sm:$0xff] (%p4775_p0), %v5183_v23  ;;  %v5205_v23 = vld [vmem:[#allocation22 + $0x2cc] sm:$0xf0] (%p4775_p0) }
 0x20a   : > { %889 = vmatpush.bf16.msrb.mxu3 %v830_v2  ;;  %5832 = vst [vmem:[#allocation193_spill] sm:$0xff] (%p4775_p0), %v5185_v20  ;;  %v5207_v20 = vld [vmem:[#allocation22 + $0x2d8] sm:$0xf0] (%p4775_p0) }
 0x20b   :  { %5840 = vst [vmem:[#allocation201_spill] sm:$0xff] (%p4775_p0), %v5201_v19  ;;  %v5223_v19 = vld [vmem:[#allocation22 + $0x2f8] sm:$0xf0] (%p4775_p0) }
 0x20c   :  { %5841 = vst [vmem:[#allocation202_spill] sm:$0xff] (%p4775_p0), %v5203_v22  ;;  %v5225_v22 = vld [vmem:[#allocation22 + $0x2f4] sm:$0xf0] (%p4775_p0) }
 0x20d   :  { %5842 = vst [vmem:[#allocation203_spill] sm:$0xff] (%p4775_p0), %v5205_v23  ;;  %v5227_v23 = vld [vmem:[#allocation24] sm:$0xf] (%p4775_p0) }
 0x20e   : > { %890 = vmatpush.bf16.msrb.mxu3 %v829_v5  ;;  %5843 = vst [vmem:[#allocation204_spill] sm:$0xff] (%p4775_p0), %v5207_v20  ;;  %v5229_v20 = vmov (%p4775_p0), 0.0  }
 0x20f   :  { %5850 = vst [vmem:[#allocation211_spill] sm:$0xff] (%p4775_p0), %v5223_v19 }
 0x210   :  { %5851 = vst [vmem:[#allocation212_spill] sm:$0xff] (%p4775_p0), %v5225_v22 }
 0x211   :  { %5852 = vst [vmem:[#allocation213_spill] sm:$0xff] (%p4775_p0), %v5227_v23 }
 0x212   : > { %891 = vmatpush.bf16.msrb.mxu3 %v828_v28 }
 0x215   : > { %892 = vmatmul.bf16.vlgmr.msrb.gmra.mxu3 %v2607_v31 }
 0x225   : > { %897 = vmatmul.bf16.gmra.mxu3 %v2611_v1  ;;  %v944_v1 = vmul.f32 %v5657_v53, %v4709_v57 }
 0x235   : > { %902 = vmatmul.bf16.gmra.mxu3 %v2615_v3  ;;  %v5658_v3 = vld [vmem:[#allocation83_spill] sm:$0xff] }
 0x245   : > { %907 = vmatmul.bf16.gmra.mxu3 %v2619_v4  ;;  %v945_v4 = vmul.f32 %v5658_v3, %v4709_v57 }
 0x255   : > { %912 = vmatmul.bf16.gmra.mxu3 %v2623_v8 }
 0x265   : > { %917 = vmatmul.bf16.gmra.mxu3 %v2627_v34  ;;  %v5659_v34 = vld [vmem:[#allocation82_spill] sm:$0xff] }
 0x266   : > { %v946_v39 = vmul.f32 %v5659_v34, %v4709_v57 }
 0x275   : > { %922 = vmatmul.bf16.gmra.mxu3 %v2631_v11  ;;  %v3243_v11 = vld [vmem:[%s4732_s8 + $0x30] sm:$0xff] }
 0x276   : > { %1192 = vmatpush.bf16.msrb.mxu1 %v3243_v11 }
 0x27a   : > { %1193 = vmatpush.bf16.msrb.mxu1 %v3242_v42 }
 0x27e   : > { %1194 = vmatpush.bf16.msrb.mxu1 %v3241_v43 }
 0x285   : > { %927 = vmatmul.bf16.gmra.mxu3 %v2635_v46  ;;  %v948_v46 = vmul.f32 %v5661_v45, %v4709_v57 }
 0x298   : > { %v893_v47 = vpop.f32.mrf.mxu3 }
 0x299   : > { %v952_v60 = vadd.f32 %v936_v58, %v893_v47  ;;  %v5662_v47 = vld [vmem:[#allocation79_spill] sm:$0xff] }
 0x29a   : > { %v949_v58 = vmul.f32 %v5662_v47, %v4709_v57 }
 0x2a0   : > { %v895_v59 = vpop.f32.mrf.mxu3 }
 0x2a1   : > { %v953_v61 = vadd.f32 %v937_v56, %v895_v59  ;;  %v3240_v59 = vld [vmem:[%s4732_s8 + $0x18] sm:$0xff] }
 0x2a2   : > { %1195 = vmatpush.bf16.msrb.mxu1 %v3240_v59 }
 0x2a3   : > { %v968_v62 = vpack.c.bf16 %v953_v61, %v952_v60 }
 0x2a5   : > { %1055 = vmatmul.bf16.vlgmr.msrb.gmra.mxu0 %v968_v62 }
 0x2a8   : > { %v898_v38 = vpop.f32.mrf.mxu3 }
 0x2a9   : > { %v954_v26 = vadd.f32 %v938_v63, %v898_v38  ;;  %v3239_v38 = vld [vmem:[%s4732_s8 + $0x10] sm:$0xff] }
 0x2aa   : > { %1196 = vmatpush.bf16.msrb.mxu1 %v3239_v38 }
 0x2b0   : > { %v900_v35 = vpop.f32.mrf.mxu3 }
 0x2b1   : > { %v955_v13 = vadd.f32 %v939_v30, %v900_v35  ;;  %v3238_v30 = vld [vmem:[%s4732_s8 + $0x8] sm:$0xff]  ;;  %v3237_v35 = vld [vmem:[%s4732_s8] sm:$0xff] }
 0x2b2   : > { %1197 = vmatpush.bf16.msrb.mxu1 %v3238_v30 }
 0x2b3   : > { %v969_v7 = vpack.c.bf16 %v955_v13, %v954_v26  ;;  %v5663_v26 = vld [vmem:[#allocation78_spill] sm:$0xff] }
 0x2b4   : > { %v950_v13 = vmul.f32 %v5663_v26, %v4709_v57 }
 0x2b5   : > { %1060 = vmatmul.bf16.gmra.mxu0 %v969_v7  ;;  %v5664_v7 = vld [vmem:[#allocation77_spill] sm:$0xff] }
 0x2b6   : > { %1198 = vmatpush.bf16.msrb.mxu1 %v3237_v35 }
 0x2b8   : > { %v903_v48 = vpop.f32.mrf.mxu3 }
 0x2b9   : > { %v956_v2 = vadd.f32 %v940_v49, %v903_v48  ;;  %v951_v48 = vmul.f32 %v5664_v7, %v4709_v57 }
 0x2c0   : > { %v905_v10 = vpop.f32.mrf.mxu3 }
 0x2c1   : > { %v957_v6 = vadd.f32 %v941_v0, %v905_v10 }
 0x2c3   : > { %v970_v32 = vpack.c.bf16 %v957_v6, %v956_v2 }
 0x2c5   : > { %1065 = vmatmul.bf16.gmra.mxu0 %v970_v32  ;;  %v3575_v32 = vld [vmem:[%s994_s24] ss:$0 sm:$0xff] }
 0x2c8   : > { %v908_v50 = vpop.f32.mrf.mxu3 }
 0x2c9   : > { %v958_v9 = vadd.f32 %v942_v51, %v908_v50 }
 0x2d0   : > { %v910_v5 = vpop.f32.mrf.mxu3 }
 0x2d1   : > { %v959_v28 = vadd.f32 %v943_v33, %v910_v5 }
 0x2d3   : > { %v971_v52 = vpack.c.bf16 %v959_v28, %v958_v9 }
 0x2d5   : > { %1070 = vmatmul.bf16.gmra.mxu0 %v971_v52 }
 0x2d8   : > { %v913_v31 = vpop.f32.mrf.mxu3 }
 0x2d9   : > { %v960_v29 = vadd.f32 %v944_v1, %v913_v31 }
 0x2e0   : > { %v915_v8 = vpop.f32.mrf.mxu3 }
 0x2e1   : > { %v961_v40 = vadd.f32 %v945_v4, %v915_v8 }
 0x2e3   : > { %v972_v54 = vpack.c.bf16 %v961_v40, %v960_v29 }
 0x2e5   : > { %1075 = vmatmul.bf16.gmra.mxu0 %v972_v54 }
 0x2e8   : > { %v918_v37 = vpop.f32.mrf.mxu3 }
 0x2e9   : > { %v962_v36 = vadd.f32 %v946_v39, %v918_v37 }
 0x2f0   : > { %v920_v14 = vpop.f32.mrf.mxu3 }
 0x2f1   : > { %v963_v44 = vadd.f32 %v947_v27, %v920_v14 }
 0x2f3   : > { %v973_v15 = vpack.c.bf16 %v963_v44, %v962_v36 }
 0x2f5   : > { %1080 = vmatmul.bf16.gmra.mxu0 %v973_v15 }
 0x2f8   : > { %v923_v12 = vpop.f32.mrf.mxu3 }
 0x2f9   : > { %v964_v60 = vadd.f32 %v948_v46, %v923_v12 }
 0x300   : > { %v925_v56 = vpop.f32.mrf.mxu3 }
 0x301   : > { %v965_v61 = vadd.f32 %v949_v58, %v925_v56 }
 0x303   : > { %v974_v62 = vpack.c.bf16 %v965_v61, %v964_v60 }
 0x305   : > { %1085 = vmatmul.bf16.gmra.mxu0 %v974_v62 }
 0x308   : > { %v928_v63 = vpop.f32.mrf.mxu3 }
 0x309   : > { %v966_v0 = vadd.f32 %v950_v13, %v928_v63 }
 0x310   : > { %v930_v49 = vpop.f32.mrf.mxu3 }
 0x311   : > { %v967_v10 = vadd.f32 %v951_v48, %v930_v49 }
 0x313   : > { %v975_v2 = vpack.c.bf16 %v967_v10, %v966_v0 }
 0x315   : > { %1090 = vmatmul.bf16.gmra.mxu0 %v975_v2 }
 0x322   : > { %v1056_v6 = vpop.f32.mrf.mxu0 }
 0x323   : > { %v1057_v50 = vadd.f32 %v3575_v32, %v1056_v6 }
 0x325   : > { %v1096_v5 = vmax.f32 %v1057_v50, 0.0 }
 0x32a   : > { %v1058_v51 = vpop.f32.mrf.mxu0 }
 0x32b   : > { %v1059_v33 = vadd.f32 %v3575_v32, %v1058_v51 }
 0x32d   : > { %v1097_v9 = vmax.f32 %v1059_v33, 0.0  ;;  %v3576_v33 = vld [vmem:[%s1138_s11] ss:$0 sm:$0xff] }
 0x32f   : > { %v1112_v28 = vpack.c.bf16 %v1097_v9, %v1096_v5 }
 0x331   : > { %1199 = vmatmul.bf16.vlgmr.msrb.gmra.mxu1 %v1112_v28 }
 0x332   : > { %v1061_v57 = vpop.f32.mrf.mxu0 }
 0x333   : > { %v1062_v52 = vadd.f32 %v3575_v32, %v1061_v57 }
 0x335   : > { %v1098_v1 = vmax.f32 %v1062_v52, 0.0 }
 0x33a   : > { %v1063_v31 = vpop.f32.mrf.mxu0 }
 0x33b   : > { %v1064_v53 = vadd.f32 %v3575_v32, %v1063_v31 }
 0x33d   : > { %v1099_v3 = vmax.f32 %v1064_v53, 0.0 }
 0x33f   : > { %v1113_v4 = vpack.c.bf16 %v1099_v3, %v1098_v1 }
 0x341   : > { %1204 = vmatmul.bf16.gmra.mxu1 %v1113_v4 }
 0x342   : > { %v1066_v8 = vpop.f32.mrf.mxu0 }
 0x343   : > { %v1067_v29 = vadd.f32 %v3575_v32, %v1066_v8 }
 0x345   : > { %v1100_v37 = vmax.f32 %v1067_v29, 0.0 }
 0x34a   : > { %v1068_v40 = vpop.f32.mrf.mxu0 }
 0x34b   : > { %v1069_v54 = vadd.f32 %v3575_v32, %v1068_v40 }
 0x34d   : > { %v1101_v55 = vmax.f32 %v1069_v54, 0.0 }
 0x34f   : > { %v1114_v34 = vpack.c.bf16 %v1101_v55, %v1100_v37 }
 0x351   : > { %1209 = vmatmul.bf16.gmra.mxu1 %v1114_v34 }
 0x352   : > { %v1071_v39 = vpop.f32.mrf.mxu0 }
 0x353   : > { %v1072_v41 = vadd.f32 %v3575_v32, %v1071_v39 }
 0x355   : > { %v1102_v36 = vmax.f32 %v1072_v41, 0.0 }
 0x35a   : > { %v1073_v27 = vpop.f32.mrf.mxu0 }
 0x35b   : > { %v1074_v14 = vadd.f32 %v3575_v32, %v1073_v27 }
 0x35d   : > { %v1103_v44 = vmax.f32 %v1074_v14, 0.0 }
 0x35f   : > { %v1115_v11 = vpack.c.bf16 %v1103_v44, %v1102_v36 }
 0x361   : > { %1214 = vmatmul.bf16.gmra.mxu1 %v1115_v11 }
 0x362   : > { %v1076_v15 = vpop.f32.mrf.mxu0 }
 0x363   : > { %v1077_v42 = vadd.f32 %v3575_v32, %v1076_v15 }
 0x365   : > { %v1104_v45 = vmax.f32 %v1077_v42, 0.0 }
 0x36a   : > { %v1078_v43 = vpop.f32.mrf.mxu0 }
 0x36b   : > { %v1079_v12 = vadd.f32 %v3575_v32, %v1078_v43 }
 0x36d   : > { %v1105_v46 = vmax.f32 %v1079_v12, 0.0 }
 0x36f   : > { %v1116_v47 = vpack.c.bf16 %v1105_v46, %v1104_v45 }
 0x371   : > { %1219 = vmatmul.bf16.gmra.mxu1 %v1116_v47 }
 0x372   : > { %v1081_v58 = vpop.f32.mrf.mxu0 }
 0x373   : > { %v1082_v56 = vadd.f32 %v3575_v32, %v1081_v58 }
 0x375   : > { %v1106_v61 = vmax.f32 %v1082_v56, 0.0 }
 0x37a   : > { %v1083_v59 = vpop.f32.mrf.mxu0 }
 0x37b   : > { %v1084_v60 = vadd.f32 %v3575_v32, %v1083_v59 }
 0x37d   : > { %v1107_v62 = vmax.f32 %v1084_v60, 0.0 }
 0x37f   : > { %v1117_v38 = vpack.c.bf16 %v1107_v62, %v1106_v61 }
 0x381   : > { %1224 = vmatmul.bf16.gmra.mxu1 %v1117_v38 }
 0x382   : > { %v1086_v63 = vpop.f32.mrf.mxu0 }
 0x383   : > { %v1087_v30 = vadd.f32 %v3575_v32, %v1086_v63 }
 0x385   : > { %v1108_v13 = vmax.f32 %v1087_v30, 0.0 }
 0x38a   : > { %v1088_v35 = vpop.f32.mrf.mxu0 }
 0x38b   : > { %v1089_v26 = vadd.f32 %v3575_v32, %v1088_v35 }
 0x38d   : > { %v1109_v7 = vmax.f32 %v1089_v26, 0.0 }
 0x38f   : > { %v1118_v48 = vpack.c.bf16 %v1109_v7, %v1108_v13 }
 0x391   : > { %1229 = vmatmul.bf16.gmra.mxu1 %v1118_v48 }
 0x392   : > { %v1091_v49 = vpop.f32.mrf.mxu0 }
 0x393   : > { %v1092_v0 = vadd.f32 %v3575_v32, %v1091_v49 }
 0x395   : > { %v1110_v6 = vmax.f32 %v1092_v0, 0.0 }
 0x39a   : > { %v1093_v10 = vpop.f32.mrf.mxu0 }
 0x39b   : > { %v1094_v2 = vadd.f32 %v3575_v32, %v1093_v10 }
 0x39d   : > { %v1111_v50 = vmax.f32 %v1094_v2, 0.0 }
 0x39f   : > { %v1119_v51 = vpack.c.bf16 %v1111_v50, %v1110_v6 }
 0x3a1   : > { %1234 = vmatmul.bf16.gmra.mxu1 %v1119_v51 }
 0x3ae   : > { %v1200_v5 = vpop.f32.mrf.mxu1 }
 0x3af   : > { %v4765_v48 = vadd.f32 %v3576_v33, %v1200_v5  ;;  %v1264_v5 = vld [vmem:[#allocation12] sm:$0xf] (%p4775_p0) }
 0x3b0   :  { %v1265_v21 = vunpack.c.l.bf16 (%p4775_p0), %v1264_v5  ;;  %v4949_v5 = vld [vmem:[#allocation22 + $0xcc] sm:$0xf0] (%p4775_p0) }
 0x3b1   : > { %v5665_v9 = vmov %v4765_v48  ;;  %5732 = vst [vmem:[#allocation93_spill] sm:$0xff] (%p4775_p0), %v4949_v5 }
 0x3b2   : > { %v1240_v28 = vmax.f32 %v5665_v9, 0.0   ;;  %vm4861_vm0 = vcmp.gt.f32.partialorder (%p4775_p0), %v1265_v21, 0.0  ;;  %v5702_v9 = vmov (%p4775_p0), 0  ;;  %v4951_v21 = vld [vmem:[#allocation22 + $0xd8] sm:$0xf0] (%p4775_p0) }
 0x3b3   :  { %v5703_v9 = vsel (%p4775_p0), %vm4861_vm0, 4294967295, %v5702_v9  ;;  %5733 = vst [vmem:[#allocation94_spill] sm:$0xff] (%p4775_p0), %v4951_v21  ;;  %v5031_v21 = vld [vmem:[#allocation22 + $0x178] sm:$0xf0] (%p4775_p0) }
 0x3b4   :  { %5704 = vst [vmem:[#allocation57_spill] sm:$0xff] (%p4775_p0), %v5703_v9  ;;  %v4953_v9 = vld [vmem:[#allocation22 + $0xd4] sm:$0xf0] (%p4775_p0) }
 0x3b5   :  { %5734 = vst [vmem:[#allocation95_spill] sm:$0xff] (%p4775_p0), %v4953_v9  ;;  %v5033_v9 = vld [vmem:[#allocation22 + $0x174] sm:$0xf0] (%p4775_p0) }
 0x3b6   : > { %v1202_v57 = vpop.f32.mrf.mxu1  ;;  %5765 = vst [vmem:[#allocation126_spill] sm:$0xff] (%p4775_p0), %v5031_v21  ;;  %v5053_v21 = vld [vmem:[#allocation22 + $0x1a0] sm:$0xf] (%p4775_p0) }
 0x3b7   : > { %v4768_v49 = vadd.f32 %v3576_v33, %v1202_v57  ;;  %5766 = vst [vmem:[#allocation127_spill] sm:$0xff] (%p4775_p0), %v5033_v9  ;;  %v5065_v9 = vld [vmem:[#allocation22 + $0x1b4] sm:$0xf0] (%p4775_p0) }
 0x3b8   :  { %5771 = vst [vmem:[#allocation132_spill] sm:$0xff] (%p4775_p0), %v5053_v21 }
 0x3b9   : > { %v5666_v31 = vmov %v4768_v49  ;;  %5776 = vst [vmem:[#allocation137_spill] sm:$0xff] (%p4775_p0), %v5065_v9  ;;  %v5087_v9 = vld [vmem:[#allocation22 + $0x1ec] sm:$0xf] (%p4775_p0) }
 0x3ba   : > { %v1241_v1 = vmax.f32 %v5666_v31, 0.0   ;;  %v4869_v31 = vld [vmem:[#allocation22 + $0x2c] sm:$0xf0] (%p4775_p0)  ;;  %5785 = vst [vmem:[#allocation146_spill] sm:$0xff] (%p4775_p0), %v5087_v9 }
 0x3bb   :  { %v5109_v9 = vld [vmem:[#allocation22 + $0x20c] sm:$0xf0] (%p4775_p0) }
 0x3bc   :  { %v4823_v10 = vpack.c.bf16 (%p4775_p0), %v1241_v1, %v1240_v28  ;;  %5794 = vst [vmem:[#allocation155_spill] sm:$0xff] (%p4775_p0), %v5109_v9  ;;  %v5131_v9 = vld [vmem:[#allocation22 + $0x244] sm:$0xf] (%p4775_p0) }
 0x3bd   :  { %5805 = vst [vmem:[#allocation166_spill] sm:$0xff] (%p4775_p0), %v5131_v9  ;;  %v5153_v9 = vld [vmem:[#allocation22 + $0x268] sm:$0xf] (%p4775_p0) }
 0x3be   : > { %v1205_v32 = vpop.f32.mrf.mxu1  ;;  %5684 = vst [vmem:[#allocation39_spill] sm:$0xff] (%p4775_p0), %v4823_v10  ;;  %v4955_v10 = vld [vmem:[#allocation22 + $0xe4] sm:$0xf] (%p4775_p0) }
 0x3bf   : > { %v4771_v52 = vadd.f32 %v3576_v33, %v1205_v32  ;;  %v4831_v32 = vld [vmem:[#allocation22 + $0x4] sm:$0xf] (%p4775_p0)  ;;  %5735 = vst [vmem:[#allocation96_spill] sm:$0xff] (%p4775_p0), %v4955_v10 }
 0x3c0   :  { %5688 = vst [vmem:[#allocation43_spill] sm:$0xff] (%p4775_p0), %v4831_v32  ;;  %v5091_v32 = vld [vmem:[#allocation22 + $0x1f0] sm:$0xf0] (%p4775_p0) }
 0x3c1   : > { %v1242_v3 = vmax.f32 %v4771_v52, 0.0   ;;  %5816 = vst [vmem:[#allocation177_spill] sm:$0xff] (%p4775_p0), %v5153_v9  ;;  %v5175_v9 = vld [vmem:[#allocation22 + $0x298] sm:$0xf0] (%p4775_p0) }
 0x3c2   :  { %5827 = vst [vmem:[#allocation188_spill] sm:$0xff] (%p4775_p0), %v5175_v9  ;;  %v5197_v9 = vld [vmem:[#allocation22 + $0x2c0] sm:$0xf] (%p4775_p0) }
 0x3c3   : > { %v5681_v50 = vmov %v1242_v3  ;;  %5838 = vst [vmem:[#allocation199_spill] sm:$0xff] (%p4775_p0), %v5197_v9  ;;  %v5219_v9 = vld [vmem:[#allocation22 + $0x2f0] sm:$0xf0] (%p4775_p0) }
 0x3c4   :  { %v4857_v50 = vld [vmem:[#allocation22 + $0x20] sm:$0xf] (%p4775_p0)  ;;  %5848 = vst [vmem:[#allocation209_spill] sm:$0xff] (%p4775_p0), %v5219_v9 }
 0x3c6   : > { %v1207_v53 = vpop.f32.mrf.mxu1 }
 0x3c7   : > { %v1208_v4 = vadd.f32 %v3576_v33, %v1207_v53 }
 0x3c9   : > { %v1243_v8 = vmax.f32 %v1208_v4, 0.0   ;;  %v4833_v4 = vld [vmem:[#allocation22] sm:$0xf] (%p4775_p0) }
 0x3ca   :  { %5689 = vst [vmem:[#allocation44_spill] sm:$0xff] (%p4775_p0), %v4833_v4 }
 0x3cb   : > { %v5680_v51 = vmov %v1243_v8  ;;  %v4825_v2 = vpack.c.bf16 (%p4775_p0), %v1243_v8, %v1242_v3  ;;  %v4875_v3 = vld [vmem:[#allocation22 + $0x44] sm:$0xf] (%p4775_p0)  ;;  %v4879_v8 = vld [vmem:[#allocation22 + $0x4c] sm:$0xf] (%p4775_p0) }
 0x3cc   :  { %v4859_v51 = vld [vmem:[#allocation22 + $0x2c] sm:$0xf] (%p4775_p0)  ;;  %5708 = vst [vmem:[#allocation61_spill] sm:$0xff] (%p4775_p0), %v4875_v3 }
 0x3cd   :  { %5685 = vst [vmem:[#allocation40_spill] sm:$0xff] (%p4775_p0), %v4825_v2  ;;  %v4957_v2 = vld [vmem:[#allocation22 + $0xe0] sm:$0xf] (%p4775_p0) }
 0x3ce   : > { %v1210_v29 = vpop.f32.mrf.mxu1  ;;  %5701 = vst [vmem:[#allocation56_spill] sm:$0xff] (%p4775_p0), %v4859_v51  ;;  %v4975_v51 = vld [vmem:[#allocation22 + $0x10c] sm:$0xf] (%p4775_p0) }
 0x3cf   : > { %v1211_v40 = vadd.f32 %v3576_v33, %v1210_v29  ;;  %5709 = vst [vmem:[#allocation62_spill] sm:$0xff] (%p4775_p0), %v4879_v8  ;;  %v4983_v8 = vld [vmem:[#allocation22 + $0x118] sm:$0xf0] (%p4775_p0) }
 0x3d0   :  { %5736 = vst [vmem:[#allocation97_spill] sm:$0xff] (%p4775_p0), %v4957_v2 }
 0x3d1   : > { %v1244_v37 = vmax.f32 %v1211_v40, 0.0   ;;  %5744 = vst [vmem:[#allocation105_spill] sm:$0xff] (%p4775_p0), %v4975_v51  ;;  %v4997_v51 = vld [vmem:[#allocation22 + $0x12c] sm:$0xf0] (%p4775_p0) }
 0x3d2   :  { %5748 = vst [vmem:[#allocation109_spill] sm:$0xff] (%p4775_p0), %v4983_v8  ;;  %v5005_v8 = vld [vmem:[#allocation22 + $0x140] sm:$0xf] (%p4775_p0) }
 0x3d3   : > { %v5679_v52 = vmov %v1244_v37  ;;  %5757 = vst [vmem:[#allocation118_spill] sm:$0xff] (%p4775_p0), %v5005_v8 }
 0x3d4   :  { %v4873_v52 = vld [vmem:[#allocation22 + $0x34] sm:$0xf0] (%p4775_p0) }
 0x3d5   :  { %5707 = vst [vmem:[#allocation60_spill] sm:$0xff] (%p4775_p0), %v4873_v52  ;;  %v4979_v52 = vld [vmem:[#allocation22 + $0x110] sm:$0xf0] (%p4775_p0) }
 0x3d6   : > { %v1212_v54 = vpop.f32.mrf.mxu1  ;;  %5746 = vst [vmem:[#allocation107_spill] sm:$0xff] (%p4775_p0), %v4979_v52  ;;  %v5081_v52 = vld [vmem:[#allocation22 + $0x1d4] sm:$0xf0] (%p4775_p0) }
 0x3d7   : > { %v1213_v55 = vadd.f32 %v3576_v33, %v1212_v54  ;;  %5782 = vst [vmem:[#allocation143_spill] sm:$0xff] (%p4775_p0), %v5081_v52  ;;  %v5103_v52 = vld [vmem:[#allocation22 + $0x20c] sm:$0xf] (%p4775_p0) }
 0x3d8   :  { %5791 = vst [vmem:[#allocation152_spill] sm:$0xff] (%p4775_p0), %v5103_v52  ;;  %v5125_v52 = vld [vmem:[#allocation22 + $0x22c] sm:$0xf0] (%p4775_p0) }
 0x3d9   : > { %v1245_v34 = vmax.f32 %v1213_v55, 0.0   ;;  %5802 = vst [vmem:[#allocation163_spill] sm:$0xff] (%p4775_p0), %v5125_v52  ;;  %v5147_v52 = vld [vmem:[#allocation22 + $0x264] sm:$0xf] (%p4775_p0) }
 0x3da   :  { %5813 = vst [vmem:[#allocation174_spill] sm:$0xff] (%p4775_p0), %v5147_v52  ;;  %v5169_v52 = vld [vmem:[#allocation22 + $0x288] sm:$0xf] (%p4775_p0) }
 0x3db   : > { %v5678_v53 = vmov %v1245_v34  ;;  %v4827_v6 = vpack.c.bf16 (%p4775_p0), %v1245_v34, %v1244_v37  ;;  %v4881_v37 = vld [vmem:[#allocation22 + $0x48] sm:$0xf] (%p4775_p0)  ;;  %v4887_v34 = vld [vmem:[#allocation22 + $0x58] sm:$0xf0] (%p4775_p0)  ;;  %5824 = vst [vmem:[#allocation185_spill] sm:$0xff] (%p4775_p0), %v5169_v52 }
 0x3dc   :  { %v4877_v53 = vld [vmem:[#allocation22 + $0x40] sm:$0xf] (%p4775_p0)  ;;  %5710 = vst [vmem:[#allocation63_spill] sm:$0xff] (%p4775_p0), %v4881_v37  ;;  %v4991_v37 = vld [vmem:[#allocation22 + $0x12c] sm:$0xf] (%p4775_p0) }
 0x3dd   :  { %5686 = vst [vmem:[#allocation41_spill] sm:$0xff] (%p4775_p0), %v4827_v6  ;;  %v4959_v6 = vld [vmem:[#allocation22 + $0xec] sm:$0xf] (%p4775_p0)  ;;  %v5191_v52 = vld [vmem:[#allocation22 + $0x2b8] sm:$0xf0] (%p4775_p0) }
 0x3de   : > { %v1215_v39 = vpop.f32.mrf.mxu1  ;;  %5711 = vst [vmem:[#allocation64_spill] sm:$0xff] (%p4775_p0), %v4887_v34  ;;  %v4985_v34 = vld [vmem:[#allocation22 + $0x114] sm:$0xf0] (%p4775_p0) }
 0x3df   : > { %v1216_v41 = vadd.f32 %v3576_v33, %v1215_v39  ;;  %v4889_v39 = vld [vmem:[#allocation22 + $0x54] sm:$0xf0] (%p4775_p0)  ;;  %5737 = vst [vmem:[#allocation98_spill] sm:$0xff] (%p4775_p0), %v4959_v6  ;;  %v5039_v6 = vld [vmem:[#allocation22 + $0x18c] sm:$0xf] (%p4775_p0) }
 0x3e0   :  { %5712 = vst [vmem:[#allocation65_spill] sm:$0xff] (%p4775_p0), %v4889_v39  ;;  %v4989_v39 = vld [vmem:[#allocation22 + $0x120] sm:$0xf] (%p4775_p0) }
 0x3e1   : > { %v1246_v27 = vmax.f32 %v1216_v41, 0.0   ;;  %v4891_v41 = vld [vmem:[#allocation22 + $0x64] sm:$0xf] (%p4775_p0)  ;;  %5749 = vst [vmem:[#allocation110_spill] sm:$0xff] (%p4775_p0), %v4985_v34  ;;  %v5043_v34 = vld [vmem:[#allocation22 + $0x190] sm:$0xf0] (%p4775_p0) }
 0x3e2   :  { %5751 = vst [vmem:[#allocation112_spill] sm:$0xff] (%p4775_p0), %v4991_v37  ;;  %v5013_v37 = vld [vmem:[#allocation22 + $0x14c] sm:$0xf0] (%p4775_p0) }
 0x3e3   : > { %v5677_v54 = vmov %v1246_v27  ;;  %5767 = vst [vmem:[#allocation128_spill] sm:$0xff] (%p4775_p0), %v5039_v6  ;;  %v5061_v6 = vld [vmem:[#allocation22 + $0x1ac] sm:$0xf0] (%p4775_p0) }
 0x3e4   :  { %v4883_v54 = vld [vmem:[#allocation22 + $0x50] sm:$0xf0] (%p4775_p0)  ;;  %5774 = vst [vmem:[#allocation135_spill] sm:$0xff] (%p4775_p0), %v5061_v6 }
 0x3e5   :  { %5835 = vst [vmem:[#allocation196_spill] sm:$0xff] (%p4775_p0), %v5191_v52  ;;  %v5213_v52 = vld [vmem:[#allocation22 + $0x2e0] sm:$0xf] (%p4775_p0) }
 0x3e6   : > { %v1217_v14 = vpop.f32.mrf.mxu1 }
 0x3e7   : > { %v1218_v36 = vadd.f32 %v3576_v33, %v1217_v14  ;;  %v4895_v14 = vld [vmem:[#allocation22 + $0x6c] sm:$0xf] (%p4775_p0) }
 0x3e8   :  { %5713 = vst [vmem:[#allocation66_spill] sm:$0xff] (%p4775_p0), %v4895_v14  ;;  %v4993_v14 = vld [vmem:[#allocation22 + $0x128] sm:$0xf] (%p4775_p0) }
 0x3e9   : > { %v1247_v44 = vmax.f32 %v1218_v36, 0.0   ;;  %v4897_v36 = vld [vmem:[#allocation22 + $0x68] sm:$0xf] (%p4775_p0)  ;;  %5752 = vst [vmem:[#allocation113_spill] sm:$0xff] (%p4775_p0), %v4993_v14 }
 0x3ea   :  { %5714 = vst [vmem:[#allocation67_spill] sm:$0xff] (%p4775_p0), %v4897_v36  ;;  %v5001_v36 = vld [vmem:[#allocation22 + $0x134] sm:$0xf0] (%p4775_p0)  ;;  %v5057_v14 = vld [vmem:[#allocation22 + $0x1a8] sm:$0xf] (%p4775_p0) }
 0x3eb   : > { %v5676_v55 = vmov %v1247_v44  ;;  %5755 = vst [vmem:[#allocation116_spill] sm:$0xff] (%p4775_p0), %v5001_v36  ;;  %v5055_v36 = vld [vmem:[#allocation22 + $0x1ac] sm:$0xf] (%p4775_p0) }
 0x3ec   :  { %v4885_v55 = vld [vmem:[#allocation22 + $0x4c] sm:$0xf0] (%p4775_p0)  ;;  %5772 = vst [vmem:[#allocation133_spill] sm:$0xff] (%p4775_p0), %v5055_v36 }
 0x3ed   :  { %5773 = vst [vmem:[#allocation134_spill] sm:$0xff] (%p4775_p0), %v5057_v14  ;;  %v5077_v36 = vld [vmem:[#allocation22 + $0x1cc] sm:$0xf0] (%p4775_p0)  ;;  %v5079_v14 = vld [vmem:[#allocation22 + $0x1d8] sm:$0xf0] (%p4775_p0) }
 0x3ee   : > { %v1220_v11 = vpop.f32.mrf.mxu1  ;;  %5781 = vst [vmem:[#allocation142_spill] sm:$0xff] (%p4775_p0), %v5079_v14  ;;  %v5101_v14 = vld [vmem:[#allocation22 + $0x200] sm:$0xf] (%p4775_p0) }
 0x3ef   : > { %v1221_v15 = vadd.f32 %v3576_v33, %v1220_v11  ;;  %v4901_v11 = vld [vmem:[#allocation22 + $0x6c] sm:$0xf0] (%p4775_p0)  ;;  %5790 = vst [vmem:[#allocation151_spill] sm:$0xff] (%p4775_p0), %v5101_v14  ;;  %v5123_v14 = vld [vmem:[#allocation22 + $0x230] sm:$0xf0] (%p4775_p0) }
 0x3f0   :  { %5715 = vst [vmem:[#allocation68_spill] sm:$0xff] (%p4775_p0), %v4901_v11 }
 0x3f1   : > { %v1248_v42 = vmax.f32 %v1221_v15, 0.0   ;;  %v4903_v15 = vld [vmem:[#allocation22 + $0x78] sm:$0xf0] (%p4775_p0)  ;;  %5801 = vst [vmem:[#allocation162_spill] sm:$0xff] (%p4775_p0), %v5123_v14  ;;  %v5145_v14 = vld [vmem:[#allocation22 + $0x254] sm:$0xf0] (%p4775_p0) }
 0x3f2   :  { %5716 = vst [vmem:[#allocation69_spill] sm:$0xff] (%p4775_p0), %v4903_v15  ;;  %v4995_v15 = vld [vmem:[#allocation22 + $0x130] sm:$0xf0] (%p4775_p0) }
 0x3f3   :  { %5753 = vst [vmem:[#allocation114_spill] sm:$0xff] (%p4775_p0), %v4995_v15  ;;  %v5089_v15 = vld [vmem:[#allocation22 + $0x1e8] sm:$0xf] (%p4775_p0) }
 0x3f4   :  { %5786 = vst [vmem:[#allocation147_spill] sm:$0xff] (%p4775_p0), %v5089_v15  ;;  %v5111_v15 = vld [vmem:[#allocation22 + $0x218] sm:$0xf0] (%p4775_p0) }
 0x3f5   :  { %5795 = vst [vmem:[#allocation156_spill] sm:$0xff] (%p4775_p0), %v5111_v15  ;;  %v5133_v15 = vld [vmem:[#allocation22 + $0x240] sm:$0xf] (%p4775_p0) }
 0x3f6   : > { %v1222_v43 = vpop.f32.mrf.mxu1  ;;  %5806 = vst [vmem:[#allocation167_spill] sm:$0xff] (%p4775_p0), %v5133_v15  ;;  %v5155_v15 = vld [vmem:[#allocation22 + $0x270] sm:$0xf0] (%p4775_p0) }
 0x3f7   : > { %v1223_v12 = vadd.f32 %v3576_v33, %v1222_v43  ;;  %v4907_v43 = vld [vmem:[#allocation22 + $0x84] sm:$0xf] (%p4775_p0)  ;;  %5812 = vst [vmem:[#allocation173_spill] sm:$0xff] (%p4775_p0), %v5145_v14  ;;  %v5167_v14 = vld [vmem:[#allocation22 + $0x28c] sm:$0xf] (%p4775_p0) }
 0x3f8   :  { %5817 = vst [vmem:[#allocation178_spill] sm:$0xff] (%p4775_p0), %v5155_v15  ;;  %v5177_v15 = vld [vmem:[#allocation22 + $0x294] sm:$0xf0] (%p4775_p0) }
 0x3f9   : > { %v1249_v45 = vmax.f32 %v1223_v12, 0.0   ;;  %v4909_v12 = vld [vmem:[#allocation22 + $0x80] sm:$0xf] (%p4775_p0)  ;;  %5823 = vst [vmem:[#allocation184_spill] sm:$0xff] (%p4775_p0), %v5167_v14  ;;  %v5189_v14 = vld [vmem:[#allocation22 + $0x2ac] sm:$0xf0] (%p4775_p0) }
 0x3fa   :  { %5718 = vst [vmem:[#allocation71_spill] sm:$0xff] (%p4775_p0), %v4909_v12 }
 0x3fb   : > { %v5674_v57 = vmov %v1249_v45  ;;  %v4835_v29 = vpack.c.bf16 (%p4775_p0), %v1249_v45, %v1248_v42  ;;  %v4911_v45 = vld [vmem:[#allocation22 + $0x8c] sm:$0xf] (%p4775_p0)  ;;  %5828 = vst [vmem:[#allocation189_spill] sm:$0xff] (%p4775_p0), %v5177_v15 }
 0x3fc   :  { %v4867_v57 = vld [vmem:[#allocation22 + $0x30] sm:$0xf0] (%p4775_p0)  ;;  %5719 = vst [vmem:[#allocation72_spill] sm:$0xff] (%p4775_p0), %v4911_v45  ;;  %v5003_v45 = vld [vmem:[#allocation22 + $0x144] sm:$0xf] (%p4775_p0) }
 0x3fd   :  { %5690 = vst [vmem:[#allocation45_spill] sm:$0xff] (%p4775_p0), %v4835_v29  ;;  %v4963_v29 = vld [vmem:[#allocation22 + $0xf0] sm:$0xf0] (%p4775_p0)  ;;  %v5199_v15 = vld [vmem:[#allocation22 + $0x2cc] sm:$0xf] (%p4775_p0) }
 0x3fe   : > { %v1225_v46 = vpop.f32.mrf.mxu1  ;;  %5756 = vst [vmem:[#allocation117_spill] sm:$0xff] (%p4775_p0), %v5003_v45  ;;  %v5099_v45 = vld [vmem:[#allocation22 + $0x204] sm:$0xf] (%p4775_p0) }
 0x3ff   : > { %v1226_v47 = vadd.f32 %v3576_v33, %v1225_v46  ;;  %v4913_v46 = vld [vmem:[#allocation22 + $0x88] sm:$0xf] (%p4775_p0)  ;;  %5789 = vst [vmem:[#allocation150_spill] sm:$0xff] (%p4775_p0), %v5099_v45 }
 0x400   :  { %5720 = vst [vmem:[#allocation73_spill] sm:$0xff] (%p4775_p0), %v4913_v46  ;;  %v5015_v46 = vld [vmem:[#allocation22 + $0x158] sm:$0xf0] (%p4775_p0)  ;;  %v5121_v45 = vld [vmem:[#allocation22 + $0x228] sm:$0xf] (%p4775_p0) }
 0x401   : > { %v1250_v38 = vmax.f32 %v1226_v47, 0.0   ;;  %v4915_v47 = vld [vmem:[#allocation22 + $0x90] sm:$0xf0] (%p4775_p0)  ;;  %5761 = vst [vmem:[#allocation122_spill] sm:$0xff] (%p4775_p0), %v5015_v46  ;;  %v5037_v46 = vld [vmem:[#allocation22 + $0x180] sm:$0xf] (%p4775_p0) }
 0x402   :  { %5800 = vst [vmem:[#allocation161_spill] sm:$0xff] (%p4775_p0), %v5121_v45  ;;  %v5143_v45 = vld [vmem:[#allocation22 + $0x258] sm:$0xf0] (%p4775_p0) }
 0x403   :  { %5811 = vst [vmem:[#allocation172_spill] sm:$0xff] (%p4775_p0), %v5143_v45  ;;  %v5165_v45 = vld [vmem:[#allocation22 + $0x280] sm:$0xf] (%p4775_p0) }
 0x404   :  { %5822 = vst [vmem:[#allocation183_spill] sm:$0xff] (%p4775_p0), %v5165_v45  ;;  %v5187_v45 = vld [vmem:[#allocation22 + $0x2b0] sm:$0xf0] (%p4775_p0) }
 0x405   :  { %5833 = vst [vmem:[#allocation194_spill] sm:$0xff] (%p4775_p0), %v5187_v45  ;;  %v5209_v45 = vld [vmem:[#allocation22 + $0x2d4] sm:$0xf0] (%p4775_p0) }
 0x406   : > { %v1227_v58 = vpop.f32.mrf.mxu1  ;;  %5834 = vst [vmem:[#allocation195_spill] sm:$0xff] (%p4775_p0), %v5189_v14  ;;  %v5211_v14 = vld [vmem:[#allocation22 + $0x2e4] sm:$0xf] (%p4775_p0) }
 0x407   : > { %v1228_v56 = vadd.f32 %v3576_v33, %v1227_v58  ;;  %v5673_v58 = vmov %v1250_v38  ;;  %5839 = vst [vmem:[#allocation200_spill] sm:$0xff] (%p4775_p0), %v5199_v15  ;;  %v5221_v15 = vld [vmem:[#allocation22 + $0x2ec] sm:$0xf0] (%p4775_p0) }
 0x408   :  { %v4919_v58 = vld [vmem:[#allocation22 + $0x98] sm:$0xf0] (%p4775_p0)  ;;  %5844 = vst [vmem:[#allocation205_spill] sm:$0xff] (%p4775_p0), %v5209_v45  ;;  %v5231_v45 = vmov (%p4775_p0), 0.0  }
 0x409   : > { %v1251_v30 = vmax.f32 %v1228_v56, 0.0   ;;  %v5675_v56 = vmov %v1248_v42  ;;  %v4905_v42 = vld [vmem:[#allocation22 + $0x74] sm:$0xf0] (%p4775_p0)  ;;  %5721 = vst [vmem:[#allocation74_spill] sm:$0xff] (%p4775_p0), %v4919_v58  ;;  %v5007_v58 = vld [vmem:[#allocation22 + $0x14c] sm:$0xf] (%p4775_p0) }
 0x40a   :  { %5717 = vst [vmem:[#allocation70_spill] sm:$0xff] (%p4775_p0), %v4905_v42  ;;  %v4921_v56 = vld [vmem:[#allocation22 + $0x94] sm:$0xf0] (%p4775_p0)  ;;  %v4999_v42 = vld [vmem:[#allocation22 + $0x138] sm:$0xf0] (%p4775_p0) }
 0x40b   :  { %v4837_v40 = vpack.c.bf16 (%p4775_p0), %v1251_v30, %v1250_v38  ;;  %v4917_v38 = vld [vmem:[#allocation22 + $0x8c] sm:$0xf0] (%p4775_p0)  ;;  %5722 = vst [vmem:[#allocation75_spill] sm:$0xff] (%p4775_p0), %v4921_v56  ;;  %v5011_v56 = vld [vmem:[#allocation22 + $0x150] sm:$0xf0] (%p4775_p0) }
 0x40c   :  { %5754 = vst [vmem:[#allocation115_spill] sm:$0xff] (%p4775_p0), %v4999_v42  ;;  %v5021_v42 = vld [vmem:[#allocation22 + $0x160] sm:$0xf] (%p4775_p0) }
 0x40d   :  { %5691 = vst [vmem:[#allocation46_spill] sm:$0xff] (%p4775_p0), %v4837_v40  ;;  %v4969_v40 = vld [vmem:[#allocation22 + $0xf4] sm:$0xf0] (%p4775_p0) }
 0x40e   : > { %v1230_v59 = vpop.f32.mrf.mxu1  ;;  %5741 = vst [vmem:[#allocation102_spill] sm:$0xff] (%p4775_p0), %v4969_v40  ;;  %v5049_v40 = vld [vmem:[#allocation22 + $0x194] sm:$0xf0] (%p4775_p0) }
 0x40f   : > { %v1231_v60 = vadd.f32 %v3576_v33, %v1230_v59  ;;  %v5672_v59 = vmov %v1251_v30  ;;  %v4923_v30 = vld [vmem:[#allocation22 + $0xa4] sm:$0xf] (%p4775_p0)  ;;  %5758 = vst [vmem:[#allocation119_spill] sm:$0xff] (%p4775_p0), %v5007_v58  ;;  %v5029_v58 = vld [vmem:[#allocation22 + $0x16c] sm:$0xf0] (%p4775_p0) }
 0x410   :  { %v4925_v59 = vld [vmem:[#allocation22 + $0xa0] sm:$0xf] (%p4775_p0)  ;;  %5760 = vst [vmem:[#allocation121_spill] sm:$0xff] (%p4775_p0), %v5011_v56  ;;  %v5105_v56 = vld [vmem:[#allocation22 + $0x208] sm:$0xf] (%p4775_p0) }
 0x411   : > { %v1252_v35 = vmax.f32 %v1231_v60, 0.0   ;;  %5770 = vst [vmem:[#allocation131_spill] sm:$0xff] (%p4775_p0), %v5049_v40  ;;  %v5071_v40 = vld [vmem:[#allocation22 + $0x1cc] sm:$0xf] (%p4775_p0) }
 0x412   :  { %5778 = vst [vmem:[#allocation139_spill] sm:$0xff] (%p4775_p0), %v5071_v40  ;;  %v5093_v40 = vld [vmem:[#allocation22 + $0x1ec] sm:$0xf0] (%p4775_p0) }
 0x413   : > { %v5671_v60 = vmov %v1252_v35  ;;  %5792 = vst [vmem:[#allocation153_spill] sm:$0xff] (%p4775_p0), %v5105_v56  ;;  %v5127_v56 = vld [vmem:[#allocation22 + $0x238] sm:$0xf0] (%p4775_p0) }
 0x414   :  { %v4927_v60 = vld [vmem:[#allocation22 + $0xac] sm:$0xf] (%p4775_p0)  ;;  %5803 = vst [vmem:[#allocation164_spill] sm:$0xff] (%p4775_p0), %v5127_v56  ;;  %v5149_v56 = vld [vmem:[#allocation22 + $0x260] sm:$0xf] (%p4775_p0) }
 0x415   :  { %5723 = vst [vmem:[#allocation76_spill] sm:$0xff] (%p4775_p0), %v4927_v60  ;;  %v5017_v60 = vld [vmem:[#allocation22 + $0x154] sm:$0xf0] (%p4775_p0) }
 0x416   : > { %v1232_v61 = vpop.f32.mrf.mxu1  ;;  %5762 = vst [vmem:[#allocation123_spill] sm:$0xff] (%p4775_p0), %v5017_v60  ;;  %v5059_v60 = vld [vmem:[#allocation22 + $0x1b0] sm:$0xf0] (%p4775_p0) }
 0x417   : > { %v1233_v62 = vadd.f32 %v3576_v33, %v1232_v61  ;;  %5814 = vst [vmem:[#allocation175_spill] sm:$0xff] (%p4775_p0), %v5149_v56  ;;  %v5171_v56 = vld [vmem:[#allocation22 + $0x290] sm:$0xf0] (%p4775_p0) }
 0x418   :  { %5825 = vst [vmem:[#allocation186_spill] sm:$0xff] (%p4775_p0), %v5171_v56  ;;  %v5193_v56 = vld [vmem:[#allocation22 + $0x2b4] sm:$0xf0] (%p4775_p0) }
 0x419   : > { %v1253_v26 = vmax.f32 %v1233_v62, 0.0   ;;  %5836 = vst [vmem:[#allocation197_spill] sm:$0xff] (%p4775_p0), %v5193_v56  ;;  %v5215_v56 = vld [vmem:[#allocation22 + $0x2ec] sm:$0xf] (%p4775_p0) }
 0x41a   :  { %5845 = vst [vmem:[#allocation206_spill] sm:$0xff] (%p4775_p0), %v5211_v14  ;;  %v5233_v14 = vmov (%p4775_p0), 0.0  }
 0x41b   : > { %v5670_v61 = vmov %v1253_v26  ;;  %v4839_v16 = vpack.c.bf16 (%p4775_p0), %v1253_v26, %v1252_v35  ;;  %v4929_v35 = vld [vmem:[#allocation22 + $0xa8] sm:$0xf] (%p4775_p0)  ;;  %v4935_v26 = vld [vmem:[#allocation22 + $0xb8] sm:$0xf0] (%p4775_p0)  ;;  %5846 = vst [vmem:[#allocation207_spill] sm:$0xff] (%p4775_p0), %v5215_v56 }
 0x41c   :  { %5724 = vst [vmem:[#allocation85_spill] sm:$0xff] (%p4775_p0), %v4929_v35  ;;  %v4931_v61 = vld [vmem:[#allocation22 + $0xb0] sm:$0xf0] (%p4775_p0)  ;;  %v5025_v35 = vld [vmem:[#allocation22 + $0x168] sm:$0xf] (%p4775_p0) }
 0x41d   :  { %5692 = vst [vmem:[#allocation47_spill] sm:$0xff] (%p4775_p0), %v4839_v16  ;;  %v4987_v16 = vld [vmem:[#allocation22 + $0x124] sm:$0xf] (%p4775_p0) }
 0x41e   : > { %v1235_v63 = vpop.f32.mrf.mxu1  ;;  %5725 = vst [vmem:[#allocation86_spill] sm:$0xff] (%p4775_p0), %v4935_v26  ;;  %v5019_v26 = vld [vmem:[#allocation22 + $0x164] sm:$0xf] (%p4775_p0) }
 0x41f   : > { %v1236_v13 = vadd.f32 %v3576_v33, %v1235_v63  ;;  %5750 = vst [vmem:[#allocation111_spill] sm:$0xff] (%p4775_p0), %v4987_v16  ;;  %v5083_v16 = vld [vmem:[#allocation22 + $0x1e4] sm:$0xf] (%p4775_p0) }
 0x420   :  { %5764 = vst [vmem:[#allocation125_spill] sm:$0xff] (%p4775_p0), %v5025_v35  ;;  %v5067_v35 = vld [vmem:[#allocation22 + $0x1c4] sm:$0xf] (%p4775_p0) }
 0x421   : > { %v1254_v7 = vmax.f32 %v1236_v13, 0.0   ;;  %v4939_v13 = vld [vmem:[#allocation22 + $0xc4] sm:$0xf] (%p4775_p0)  ;;  %5783 = vst [vmem:[#allocation144_spill] sm:$0xff] (%p4775_p0), %v5083_v16 }
 0x422   :  { %5727 = vst [vmem:[#allocation88_spill] sm:$0xff] (%p4775_p0), %v4939_v13 }
 0x423   : > { %v5669_v62 = vmov %v1254_v7  ;;  %5849 = vst [vmem:[#allocation210_spill] sm:$0xff] (%p4775_p0), %v5221_v15 }
 0x424   :  { %v4933_v62 = vld [vmem:[#allocation22 + $0xac] sm:$0xf0] (%p4775_p0) }
 0x426   : > { %v1237_v48 = vpop.f32.mrf.mxu1 }
 0x427   : > { %v1238_v49 = vadd.f32 %v3576_v33, %v1237_v48  ;;  %v5683_v48 = vmov %v1240_v28  ;;  %376 = sbr.rel (!%p4775_p0) target bundleno = 126 (0x7e), region = 186  ;;  %v4829_v33 = vpack.c.bf16 (%p4775_p0), %v1247_v44, %v1246_v27  ;;  %v4865_v28 = vld [vmem:[#allocation22 + $0x28] sm:$0xf] (%p4775_p0)  ;;  %v4893_v27 = vld [vmem:[#allocation22 + $0x60] sm:$0xf] (%p4775_p0) }
 0x428   :  { %5705 = vst [vmem:[#allocation58_spill] sm:$0xff] (%p4775_p0), %v4865_v28  ;;  %v4899_v44 = vld [vmem:[#allocation22 + $0x70] sm:$0xf0] (%p4775_p0)  ;;  %v4943_v48 = vld [vmem:[#allocation22 + $0xcc] sm:$0xf] (%p4775_p0) }
 0x429   : > { %v1255_v0 = vmax.f32 %v1238_v49, 0.0   ;;  %v5682_v49 = vmov %v1241_v1  ;;  %5687 = vst [vmem:[#allocation42_spill] sm:$0xff] (%p4775_p0), %v4829_v33  ;;  %v4871_v1 = vld [vmem:[#allocation22 + $0x38] sm:$0xf0] (%p4775_p0)  ;;  %v4961_v33 = vld [vmem:[#allocation22 + $0xe8] sm:$0xf] (%p4775_p0) }
 0x42a   :  { %5706 = vst [vmem:[#allocation59_spill] sm:$0xff] (%p4775_p0), %v4871_v1  ;;  %v4945_v49 = vld [vmem:[#allocation22 + $0xc8] sm:$0xf] (%p4775_p0)  ;;  %v4981_v28 = vld [vmem:[#allocation22 + $0x10c] sm:$0xf0] (%p4775_p0) }
 0x42b   : > { %v5668_v63 = vmov %v1255_v0  ;;  %v4841_v17 = vpack.c.bf16 (%p4775_p0), %v1255_v0, %v1254_v7  ;;  %v4941_v7 = vld [vmem:[#allocation22 + $0xc0] sm:$0xf] (%p4775_p0)  ;;  %5729 = vst [vmem:[#allocation90_spill] sm:$0xff] (%p4775_p0), %v4943_v48  ;;  %v4947_v0 = vld [vmem:[#allocation22 + $0xd0] sm:$0xf0] (%p4775_p0) }
 0x42c   :  { %v4937_v63 = vld [vmem:[#allocation22 + $0xb4] sm:$0xf0]  ;;  %5728 = vst [vmem:[#allocation89_spill] sm:$0xff] %v4941_v7  ;;  %v4977_v1 = vld [vmem:[#allocation22 + $0x108] sm:$0xf] }
 0x42d   :  { %5693 = vst [vmem:[#allocation48_spill] sm:$0xff] %v4841_v17  ;;  %v5009_v17 = vld [vmem:[#allocation22 + $0x148] sm:$0xf]  ;;  %v5027_v48 = vld [vmem:[#allocation22 + $0x170] sm:$0xf0] }
 0x42e   :  { %5726 = vst [vmem:[#allocation87_spill] sm:$0xff] %v4937_v63  ;;  %v5023_v63 = vld [vmem:[#allocation22 + $0x16c] sm:$0xf] }
 0x42f   :  { %5730 = vst [vmem:[#allocation91_spill] sm:$0xff] %v4945_v49  ;;  %v5035_v49 = vld [vmem:[#allocation22 + $0x184] sm:$0xf] }
 0x430   :  { %5731 = vst [vmem:[#allocation92_spill] sm:$0xff] %v4947_v0 }
 0x431   :  { %5738 = vst [vmem:[#allocation99_spill] sm:$0xff] %v4961_v33  ;;  %v5051_v33 = vld [vmem:[#allocation22 + $0x1a4] sm:$0xf] }
 0x432   :  { %5745 = vst [vmem:[#allocation106_spill] sm:$0xff] %v4977_v1  ;;  %v5047_v1 = vld [vmem:[#allocation22 + $0x198] sm:$0xf0] }
 0x433   :  { %5747 = vst [vmem:[#allocation108_spill] sm:$0xff] %v4981_v28  ;;  %v5107_v28 = vld [vmem:[#allocation22 + $0x210] sm:$0xf0] }
 0x434   :  { %5759 = vst [vmem:[#allocation120_spill] sm:$0xff] %v5009_v17  ;;  %v5063_v17 = vld [vmem:[#allocation22 + $0x1b8] sm:$0xf0] }
 0x435   :  { %5763 = vst [vmem:[#allocation124_spill] sm:$0xff] %v5023_v63  ;;  %v5045_v63 = vld [vmem:[#allocation22 + $0x18c] sm:$0xf0] }
 0x436   :  { %5769 = vst [vmem:[#allocation130_spill] sm:$0xff] %v5047_v1  ;;  %v5069_v1 = vld [vmem:[#allocation22 + $0x1c0] sm:$0xf] }
 0x437   :  { %5775 = vst [vmem:[#allocation136_spill] sm:$0xff] %v5063_v17  ;;  %v5085_v17 = vld [vmem:[#allocation22 + $0x1e0] sm:$0xf] }
 0x438   :  { %5777 = vst [vmem:[#allocation138_spill] sm:$0xff] %v5069_v1 }
 0x439   :  { %5784 = vst [vmem:[#allocation145_spill] sm:$0xff] %v5085_v17 }
 0x43a   :  { %5793 = vst [vmem:[#allocation154_spill] sm:$0xff] %v5107_v28  ;;  %v5129_v28 = vld [vmem:[#allocation22 + $0x234] sm:$0xf0] }
 0x43b   :  { %5804 = vst [vmem:[#allocation165_spill] sm:$0xff] %v5129_v28  ;;  %v5151_v28 = vld [vmem:[#allocation22 + $0x26c] sm:$0xf] }
 0x43c   :  { %5815 = vst [vmem:[#allocation176_spill] sm:$0xff] %v5151_v28  ;;  %v5173_v28 = vld [vmem:[#allocation22 + $0x28c] sm:$0xf0] }
 0x43d   :  { %5826 = vst [vmem:[#allocation187_spill] sm:$0xff] %v5173_v28  ;;  %v5195_v28 = vld [vmem:[#allocation22 + $0x2c4] sm:$0xf] }
 0x43e   :  { %5837 = vst [vmem:[#allocation198_spill] sm:$0xff] %v5195_v28  ;;  %v5217_v28 = vld [vmem:[#allocation22 + $0x2e8] sm:$0xf] }
 0x43f   :  { %5847 = vst [vmem:[#allocation208_spill] sm:$0xff] %v5217_v28 }
 0x440 LB: > { %5853 = vst [vmem:[#allocation214_spill] sm:$0xff] %v4169_v20  ;;  %v5854_v2 = vld [vmem:[#allocation97_spill] sm:$0xff]  ;;  %v5855_v18 = vld [vmem:[#allocation100_spill] sm:$0xff]  ;;  %v5860_v1 = vld [vmem:[#allocation138_spill] sm:$0xff]  ;;  %s1369_s7 = sadd.s32 1, %s4181_s7   ;;  %s4181_s7 = sphi %s5235_s7, %s1369_s7   ;;  %v4177_v14 = vphi %v5233_v14, %v2082_v14   ;;  %v4173_v45 = vphi %v5231_v45, %v6024_v45   ;;  %v4169_v20 = vphi %v5229_v20, %v2080_v20  }
 0x441   : > { %v2817_v23 = vor.u32 %v5855_v18, %v5854_v2  ;;  %v5856_v17 = vld [vmem:[#allocation145_spill] sm:$0xff]  ;;  %v5859_v10 = vld [vmem:[#allocation96_spill] sm:$0xff]  ;;  %v2929_v22 = vor.u32 %v5077_v36, %v5860_v1  ;;  %v2785_v2 = vor.u32 %v4933_v62, %v4925_v59  ;;  %v5864_v6 = vld [vmem:[#allocation135_spill] sm:$0xff]  ;;  %p1366_p1 = scmp.ge.s32.totalorder %s1369_s7, 6  }
 0x442   : > { %v2945_v56 = vor.u32 %v5093_v40, %v5856_v17  ;;  %v5857_v7 = vld [vmem:[#allocation89_spill] sm:$0xff]  ;;  %v2821_v20 = vor.u32 %v5859_v10, %v4963_v29  ;;  %v5861_v0 = vld [vmem:[#allocation92_spill] sm:$0xff]  ;;  %v5866_v12 = vld [vmem:[#allocation71_spill] sm:$0xff]  ;;  %s4206_s0 = smov (%p1366_p1), [#allocation28]   ;;  %s6025_s18 = sld [smem:[#allocation220_spill]] (%p1366_p1) }
 0x443   : > { %1864 = vmatpush.bf16.msra.mxu2 %v2817_v23  ;;  %v5858_v5 = vld [vmem:[#allocation93_spill] sm:$0xff]  ;;  %v5862_v13 = vld [vmem:[#allocation88_spill] sm:$0xff]  ;;  %v5869_v8 = vld [vmem:[#allocation118_spill] sm:$0xff]  ;;  %s2374_s1 = sshll.u32 (%p1366_p1), %s4206_s0, 4  ;;  %s2375_s1 = int_to_ptr.vmem [resolvable:$true] %s2374_s1 }
 0x444   : > { %v2801_v19 = vor.u32 %v5858_v5, %v5857_v7  ;;  %1877 = vmatpush.bf16.msra.mxu1 %v2945_v56  ;;  %1903 = vmatpush.bf16.msra.mxu3 %v2821_v20  ;;  %v2805_v28 = vor.u32 %v5862_v13, %v5861_v0  ;;  %v5863_v21 = vld [vmem:[#allocation132_spill] sm:$0xff]  ;;  %v2789_v56 = vor.u32 %v4923_v30, %v4931_v61  ;;  %v5867_v24 = vld [vmem:[#allocation141_spill] sm:$0xff]  ;;  %v5871_v25 = vld [vmem:[#allocation55_spill] sm:$0xff] }
 0x445   : > { %v2913_v23 = vor.u32 %v5864_v6, %v5863_v21  ;;  %v5865_v16 = vld [vmem:[#allocation144_spill] sm:$0xff]  ;;  %v2769_v20 = vor.u32 %v4917_v38, %v5866_v12  ;;  %v2773_v0 = vor.u32 %v4907_v43, %v4915_v47  ;;  %v5870_v3 = vld [vmem:[#allocation61_spill] sm:$0xff]  ;;  %v5874_v15 = vld [vmem:[#allocation210_spill] sm:$0xff]  ;;  %v5311_v12 = vpack.c.bf16 %v4177_v14, %v4177_v14 }
 0x446   : > { %v2949_v5 = vor.u32 %v5865_v16, %v5091_v32  ;;  %v5868_v11 = vld [vmem:[#allocation68_spill] sm:$0xff]  ;;  %v5877_v6 = vld [vmem:[#allocation121_spill] sm:$0xff]  ;;  %v5889_v14 = vld [vmem:[#allocation202_spill] sm:$0xff] }
 0x447   : > { %1865 = vmatpush.bf16.msra.mxu2 %v2801_v19  ;;  %v2897_v19 = vor.u32 %v5045_v63, %v5037_v46  ;;  %v5872_v4 = vld [vmem:[#allocation44_spill] sm:$0xff]  ;;  %v5878_v7 = vld [vmem:[#allocation117_spill] sm:$0xff]  ;;  %v5947_v16 = vld [vmem:[#allocation211_spill] sm:$0xff] }
 0x448   : > { %1878 = vmatpush.bf16.msra.mxu1 %v2929_v22  ;;  %1904 = vmatpush.bf16.msra.mxu3 %v2805_v28  ;;  %v2933_v22 = vor.u32 %v5067_v35, %v5867_v24  ;;  %v2753_v28 = vor.u32 %v5868_v11, %v4893_v27  ;;  %v5876_v1 = vld [vmem:[#allocation108_spill] sm:$0xff]  ;;  %v5879_v9 = vld [vmem:[#allocation209_spill] sm:$0xff]  ;;  %v5881_v11 = vld [vmem:[#allocation51_spill] sm:$0xff]  ;;  %s2376_s14 = sshll.u32 (%p1366_p1), %s6025_s18, 4  ;;  %s2377_s14 = int_to_ptr.hbm [resolvable:$true] %s2376_s14 }
 0x449   : > { %1916 = vmatpush.bf16.msra.mxu0 %v2949_v5  ;;  %v2917_v5 = vor.u32 %v5051_v33, %v5059_v60  ;;  %v3344_v33 = vld [vmem:[#allocation25 + $0x18] sm:$0xff] (%p1366_p1)  ;;  %v3361_v29 = vld [vmem:[#allocation27 + $0x20] sm:$0xff] (%p1366_p1)  ;;  %v3343_v40 = vld [vmem:[#allocation25 + $0x10] sm:$0xff] (%p1366_p1) }
 0x44a   :  { %v3352_v32 = vld [vmem:[#allocation25 + $0x58] sm:$0xff] (%p1366_p1)  ;;  %v3598_v38 = vld [vmem:[%s5529_s19] ss:$0 sm:$0xff] (%p1366_p1) }
 0x44b   : > { %1866 = vmatpush.bf16.msra.mxu2 %v2785_v2  ;;  %v2881_v2 = vor.u32 %v5029_v58, %v5021_v42 }
 0x44c   : > { %1879 = vmatpush.bf16.msra.mxu1 %v2913_v23  ;;  %1905 = vmatpush.bf16.msra.mxu3 %v2789_v56  ;;  %v2757_v23 = vor.u32 %v4891_v41, %v4899_v44  ;;  %v2737_v56 = vor.u32 %v4885_v55, %v4877_v53  ;;  %v3341_v53 = vld [vmem:[#allocation25] sm:$0xff] (%p1366_p1)  ;;  %v3358_v55 = vld [vmem:[#allocation27 + $0x8] sm:$0xff] (%p1366_p1) }
 0x44d   : > { %1917 = vmatpush.bf16.msra.mxu0 %v2933_v22  ;;  %v2741_v22 = vor.u32 %v5870_v3, %v4883_v54 }
 0x44f   : > { %1867 = vmatpush.bf16.msra.mxu2 %v2769_v20  ;;  %v2865_v20 = vor.u32 %v5013_v37, %v5869_v8  ;;  %v2869_v8 = vor.u32 %v5878_v7, %v5877_v6  ;;  %v5885_v6 = vld [vmem:[#allocation199_spill] sm:$0xff]  ;;  %v3349_v37 = vld [vmem:[#allocation25 + $0x40] sm:$0xff] (%p1366_p1) }
 0x450   : > { %1880 = vmatpush.bf16.msra.mxu1 %v2897_v19  ;;  %1906 = vmatpush.bf16.msra.mxu3 %v2773_v0  ;;  %v2901_v19 = vor.u32 %v5035_v49, %v5043_v34  ;;  %v2721_v0 = vor.u32 %v4869_v31, %v4857_v50  ;;  %v5886_v7 = vld [vmem:[#allocation203_spill] sm:$0xff]  ;;  %v3351_v50 = vld [vmem:[#allocation25 + $0x50] sm:$0xff] (%p1366_p1)  ;;  %v3357_v34 = vld [vmem:[#allocation27] sm:$0xff] (%p1366_p1) }
 0x451   : > { %1918 = vmatpush.bf16.msra.mxu0 %v2917_v5  ;;  %v2725_v5 = vor.u32 %v5871_v25, %v4867_v57  ;;  %v3342_v57 = vld [vmem:[#allocation25 + $0x8] sm:$0xff] (%p1366_p1) }
 0x452   :  { %v3350_v31 = vld [vmem:[#allocation25 + $0x48] sm:$0xff] (%p1366_p1) }
 0x453   : > { %1868 = vmatpush.bf16.msra.mxu2 %v2753_v28  ;;  %v2849_v28 = vor.u32 %v4997_v51, %v4989_v39  ;;  %v3360_v51 = vld [vmem:[#allocation27 + $0x18] sm:$0xff] (%p1366_p1)  ;;  %v3597_v39 = vld [vmem:[%s5527_s17] ss:$0 sm:$0xff] (%p1366_p1) }
 0x454   : > { %1881 = vmatpush.bf16.msra.mxu1 %v2881_v2  ;;  %1907 = vmatpush.bf16.msra.mxu3 %v2757_v23  ;;  %v2885_v2 = vor.u32 %v5019_v26, %v5027_v48  ;;  %v5873_v23 = vld [vmem:[#allocation52_spill] sm:$0xff] }
 0x455   : > { %1919 = vmatpush.bf16.msra.mxu0 %v2901_v19  ;;  %v2705_v19 = vor.u32 %v5873_v23, %v5872_v4  ;;  %v5883_v23 = vld [vmem:[#allocation147_spill] sm:$0xff]  ;;  %v5884_v4 = vld [vmem:[#allocation149_spill] sm:$0xff] }
 0x456   : > { %v2953_v13 = vor.u32 %v5884_v4, %v5883_v23  ;;  %v5891_v4 = vld [vmem:[#allocation140_spill] sm:$0xff]  ;;  %v5895_v23 = vld [vmem:[#allocation107_spill] sm:$0xff] }
 0x457   : > { %1869 = vmatpush.bf16.msra.mxu2 %v2737_v56  ;;  %v3073_v56 = vor.u32 %v5874_v15, %v5213_v52  ;;  %v3359_v52 = vld [vmem:[#allocation27 + $0x10] sm:$0xff] (%p1366_p1) }
 0x458   : > { %1882 = vmatpush.bf16.msra.mxu1 %v2865_v20  ;;  %1908 = vmatpush.bf16.msra.mxu3 %v2741_v22  ;;  %v5875_v20 = vld [vmem:[#allocation104_spill] sm:$0xff]  ;;  %v5880_v22 = vld [vmem:[#allocation206_spill] sm:$0xff] }
 0x459   : > { %1920 = vmatpush.bf16.msra.mxu0 %v2885_v2  ;;  %v2833_v3 = vor.u32 %v5876_v1, %v5875_v20  ;;  %v3077_v10 = vor.u32 %v5880_v22, %v5879_v9  ;;  %v5882_v2 = vld [vmem:[#allocation43_spill] sm:$0xff]  ;;  %v5317_v1 = vpack.c.bf16 %v4173_v45, %v4173_v45  ;;  %v5908_v9 = vld [vmem:[#allocation205_spill] sm:$0xff] }
 0x45a   : > { %v5888_v20 = vld [vmem:[#allocation111_spill] sm:$0xff] }
 0x45b   : > { %1870 = vmatpush.bf16.msra.mxu2 %v2721_v0  ;;  %v2709_v0 = vor.u32 %v5882_v2, %v5881_v11  ;;  %v5890_v11 = vld [vmem:[#allocation198_spill] sm:$0xff] }
 0x45c   : > { %1883 = vmatpush.bf16.msra.mxu1 %v2849_v28  ;;  %1909 = vmatpush.bf16.msra.mxu3 %v2725_v5  ;;  %v3057_v28 = vor.u32 %v5886_v7, %v5885_v6  ;;  %v5887_v5 = vld [vmem:[#allocation114_spill] sm:$0xff]  ;;  %v3061_v2 = vor.u32 %v5890_v11, %v5889_v14  ;;  %v5896_v6 = vld [vmem:[#allocation103_spill] sm:$0xff] }
 0x45d   : > { %1921 = vmatpush.bf16.msra.mxu0 %v2869_v8  ;;  %v2853_v22 = vor.u32 %v5888_v20, %v5887_v5  ;;  %v5892_v8 = vld [vmem:[#allocation143_spill] sm:$0xff]  ;;  %v5898_v7 = vld [vmem:[#allocation190_spill] sm:$0xff]  ;;  %v5900_v20 = vld [vmem:[#allocation212_spill] sm:$0xff] }
 0x45e   : > { %v2937_v45 = vor.u32 %v5892_v8, %v5891_v4  ;;  %v5901_v11 = vld [vmem:[#allocation134_spill] sm:$0xff]  ;;  %v5902_v4 = vld [vmem:[#allocation137_spill] sm:$0xff]  ;;  %v5904_v8 = vld [vmem:[#allocation187_spill] sm:$0xff] }
 0x45f   : > { %1871 = vmatpush.bf16.msra.mxu2 %v2705_v19  ;;  %v5893_v19 = vld [vmem:[#allocation191_spill] sm:$0xff] }
 0x460   : > { %1884 = vmatpush.bf16.msra.mxu1 %v2833_v3  ;;  %1910 = vmatpush.bf16.msra.mxu3 %v2709_v0  ;;  %v5894_v3 = vld [vmem:[#allocation195_spill] sm:$0xff]  ;;  %v5897_v0 = vld [vmem:[#allocation194_spill] sm:$0xff] }
 0x461   : > { %1922 = vmatpush.bf16.msra.mxu0 %v2853_v22  ;;  %v3045_v5 = vor.u32 %v5898_v7, %v5897_v0  ;;  %v2921_v22 = vor.u32 %v5902_v4, %v5901_v11  ;;  %v5909_v7 = vld [vmem:[#allocation129_spill] sm:$0xff] }
 0x462   : > { %1872 = vmatmul.bf16.vlgmr.msra.gmra.mxu2 %v5311_v12  ;;  %v5915_v4 = vld [vmem:[#allocation193_spill] sm:$0xff] }
 0x463   : > { %1890 = vmatpush.bf16.msrb.mxu2 %v3073_v56  ;;  %1885 = vmatmul.bf16.vlgmr.msra.gmra.mxu1 %v5317_v1  ;;  %v3041_v56 = vor.u32 %v5894_v3, %v5893_v19  ;;  %v5905_v3 = vld [vmem:[#allocation186_spill] sm:$0xff] }
 0x464   : > { %1929 = vmatpush.bf16.msrb.mxu1 %v3077_v10  ;;  %1955 = vmatpush.bf16.msrb.mxu3 %v2953_v13  ;;  %v2837_v10 = vor.u32 %v5896_v6, %v5895_v23  ;;  %v5899_v13 = vld [vmem:[#allocation208_spill] sm:$0xff]  ;;  %v5906_v23 = vld [vmem:[#allocation182_spill] sm:$0xff]  ;;  %v5907_v6 = vld [vmem:[#allocation201_spill] sm:$0xff] }
 0x465   : > { %1911 = vmatmul.bf16.vlgmr.msra.gmra.mxu3 %v5311_v12  ;;  %v3081_v14 = vor.u32 %v5900_v20, %v5899_v13  ;;  %v3065_v0 = vor.u32 %v5908_v9, %v5907_v6  ;;  %v5910_v13 = vld [vmem:[#allocation131_spill] sm:$0xff]  ;;  %v5917_v9 = vld [vmem:[#allocation125_spill] sm:$0xff] }
 0x466   : > { %1923 = vmatpush.bf16.msra.mxu0 %v2837_v10  ;;  %v5911_v10 = vld [vmem:[#allocation175_spill] sm:$0xff] }
 0x467   : > { %1891 = vmatpush.bf16.msrb.mxu2 %v3057_v28  ;;  %v5903_v28 = vld [vmem:[#allocation183_spill] sm:$0xff] }
 0x468   : > { %1930 = vmatpush.bf16.msrb.mxu1 %v3061_v2  ;;  %1956 = vmatpush.bf16.msrb.mxu3 %v2937_v45  ;;  %v3025_v19 = vor.u32 %v5904_v8, %v5903_v28  ;;  %v3029_v2 = vor.u32 %v5906_v23, %v5905_v3  ;;  %v2905_v45 = vor.u32 %v5910_v13, %v5909_v7  ;;  %v5916_v28 = vld [vmem:[#allocation197_spill] sm:$0xff]  ;;  %v5919_v23 = vld [vmem:[#allocation167_spill] sm:$0xff]  ;;  %v5922_v13 = vld [vmem:[#allocation166_spill] sm:$0xff] }
 0x469   : > { %1924 = vmatmul.bf16.vlgmr.msra.gmra.mxu0 %v5317_v1  ;;  %v3049_v8 = vor.u32 %v5916_v28, %v5915_v4  ;;  %v5920_v6 = vld [vmem:[#allocation171_spill] sm:$0xff] }
 0x46a   : > { %1968 = vmatpush.bf16.msrb.mxu0 %v3081_v14  ;;  %v5913_v14 = vld [vmem:[#allocation178_spill] sm:$0xff]  ;;  %v2993_v7 = vor.u32 %v5920_v6, %v5919_v23  ;;  %v5928_v28 = vld [vmem:[#allocation163_spill] sm:$0xff]  ;;  %v5932_v23 = vld [vmem:[#allocation181_spill] sm:$0xff] }
 0x46b   : > { %1892 = vmatpush.bf16.msrb.mxu2 %v3041_v56  ;;  %v5912_v56 = vld [vmem:[#allocation179_spill] sm:$0xff] }
 0x46c   : > { %1931 = vmatpush.bf16.msrb.mxu1 %v3045_v5  ;;  %1957 = vmatpush.bf16.msrb.mxu3 %v2921_v22  ;;  %v3009_v20 = vor.u32 %v5912_v56, %v5911_v10  ;;  %v5914_v5 = vld [vmem:[#allocation174_spill] sm:$0xff]  ;;  %v5918_v22 = vld [vmem:[#allocation127_spill] sm:$0xff]  ;;  %v5924_v10 = vld [vmem:[#allocation189_spill] sm:$0xff] }
 0x46d   : > { %v3013_v11 = vor.u32 %v5914_v5, %v5913_v14  ;;  %v2889_v3 = vor.u32 %v5918_v22, %v5917_v9  ;;  %v5925_v14 = vld [vmem:[#allocation120_spill] sm:$0xff]  ;;  %v5926_v5 = vld [vmem:[#allocation123_spill] sm:$0xff]  ;;  %v5930_v22 = vld [vmem:[#allocation158_spill] sm:$0xff] }
 0x46e   : > { %1969 = vmatpush.bf16.msrb.mxu0 %v3065_v0  ;;  %v2873_v4 = vor.u32 %v5926_v5, %v5925_v14  ;;  %v5938_v5 = vld [vmem:[#allocation102_spill] sm:$0xff] }
 0x46f   : > { %1893 = vmatpush.bf16.msrb.mxu2 %v3025_v19  ;;  %v5921_v19 = vld [vmem:[#allocation170_spill] sm:$0xff] }
 0x470   : > { %1932 = vmatpush.bf16.msrb.mxu1 %v3029_v2  ;;  %1958 = vmatpush.bf16.msrb.mxu3 %v2905_v45  ;;  %v2997_v0 = vor.u32 %v5922_v13, %v5921_v19  ;;  %v5923_v2 = vld [vmem:[#allocation185_spill] sm:$0xff]  ;;  %v5927_v45 = vld [vmem:[#allocation159_spill] sm:$0xff]  ;;  %v5934_v13 = vld [vmem:[#allocation116_spill] sm:$0xff] }
 0x471   : > { %v3033_v56 = vor.u32 %v5924_v10, %v5923_v2  ;;  %v2977_v9 = vor.u32 %v5928_v28, %v5927_v45  ;;  %v5933_v19 = vld [vmem:[#allocation113_spill] sm:$0xff]  ;;  %v5936_v10 = vld [vmem:[#allocation155_spill] sm:$0xff] }
 0x472   : > { %1970 = vmatpush.bf16.msrb.mxu0 %v3049_v8  ;;  %v2857_v2 = vor.u32 %v5934_v13, %v5933_v19  ;;  %v5945_v19 = vld [vmem:[#allocation101_spill] sm:$0xff] }
 0x473   : > { %1894 = vmatpush.bf16.msrb.mxu2 %v3009_v20  ;;  %v5929_v20 = vld [vmem:[#allocation162_spill] sm:$0xff] }
 0x474   : > { %1933 = vmatpush.bf16.msrb.mxu1 %v3013_v11  ;;  %1959 = vmatpush.bf16.msrb.mxu3 %v2889_v3  ;;  %v2981_v8 = vor.u32 %v5930_v22, %v5929_v20  ;;  %v5931_v11 = vld [vmem:[#allocation177_spill] sm:$0xff]  ;;  %v5935_v3 = vld [vmem:[#allocation151_spill] sm:$0xff] }
 0x475   : > { %v3017_v6 = vor.u32 %v5932_v23, %v5931_v11  ;;  %v2961_v14 = vor.u32 %v5936_v10, %v5935_v3  ;;  %v5941_v20 = vld [vmem:[#allocation169_spill] sm:$0xff]  ;;  %v5944_v11 = vld [vmem:[#allocation110_spill] sm:$0xff]  ;;  %v5948_v3 = vld [vmem:[#allocation207_spill] sm:$0xff] }
 0x476   : > { %1971 = vmatpush.bf16.msrb.mxu0 %v3033_v56  ;;  %v5940_v56 = vld [vmem:[#allocation150_spill] sm:$0xff]  ;;  %v5942_v22 = vld [vmem:[#allocation173_spill] sm:$0xff]  ;;  %v5950_v10 = vld [vmem:[#allocation95_spill] sm:$0xff] }
 0x477   : > { %1895 = vmatpush.bf16.msrb.mxu2 %v2993_v7  ;;  %v5937_v7 = vld [vmem:[#allocation99_spill] sm:$0xff]  ;;  %v3001_v15 = vor.u32 %v5942_v22, %v5941_v20  ;;  %v5954_v20 = vld [vmem:[#allocation90_spill] sm:$0xff] }
 0x478   : > { %1934 = vmatpush.bf16.msrb.mxu1 %v2997_v0  ;;  %1960 = vmatpush.bf16.msrb.mxu3 %v2873_v4  ;;  %v2825_v45 = vor.u32 %v5938_v5, %v5937_v7  ;;  %v5939_v0 = vld [vmem:[#allocation154_spill] sm:$0xff]  ;;  %v5951_v5 = vld [vmem:[#allocation161_spill] sm:$0xff] }
 0x479   : > { %v2965_v28 = vor.u32 %v5940_v56, %v5939_v0  ;;  %v5943_v4 = vld [vmem:[#allocation106_spill] sm:$0xff]  ;;  %v5952_v0 = vld [vmem:[#allocation165_spill] sm:$0xff] }
 0x47a   : > { %1972 = vmatpush.bf16.msrb.mxu0 %v3017_v6  ;;  %v2841_v23 = vor.u32 %v5944_v11, %v5943_v4  ;;  %v3085_v6 = vor.u32 %v5948_v3, %v5947_v16  ;;  %v2985_v56 = vor.u32 %v5952_v0, %v5951_v5  ;;  %v5955_v4 = vld [vmem:[#allocation204_spill] sm:$0xff]  ;;  %v5959_v11 = vld [vmem:[#allocation153_spill] sm:$0xff] }
 0x47b   : > { %1896 = vmatpush.bf16.msrb.mxu2 %v2977_v9  ;;  %v5946_v9 = vld [vmem:[#allocation98_spill] sm:$0xff]  ;;  %v5956_v16 = vld [vmem:[#allocation200_spill] sm:$0xff]  ;;  %v5965_v5 = vld [vmem:[#allocation73_spill] sm:$0xff] }
 0x47c   : > { %1935 = vmatpush.bf16.msrb.mxu1 %v2981_v8  ;;  %1961 = vmatpush.bf16.msrb.mxu3 %v2857_v2  ;;  %v2829_v13 = vor.u32 %v5946_v9, %v5945_v19  ;;  %v5949_v8 = vld [vmem:[#allocation91_spill] sm:$0xff]  ;;  %v5953_v2 = vld [vmem:[#allocation94_spill] sm:$0xff] }
 0x47d   : > { %v2809_v7 = vor.u32 %v5950_v10, %v5949_v8  ;;  %v2813_v22 = vor.u32 %v5954_v20, %v5953_v2  ;;  %v5961_v9 = vld [vmem:[#allocation86_spill] sm:$0xff]  ;;  %v5964_v8 = vld [vmem:[#allocation192_spill] sm:$0xff] }
 0x47e   : > { %1973 = vmatpush.bf16.msrb.mxu0 %v3001_v15  ;;  %v5957_v15 = vld [vmem:[#allocation85_spill] sm:$0xff]  ;;  %v5968_v2 = vld [vmem:[#allocation74_spill] sm:$0xff]  ;;  %v5969_v20 = vld [vmem:[#allocation72_spill] sm:$0xff] }
 0x47f   : > { %1897 = vmatpush.bf16.msrb.mxu2 %v2961_v14  ;;  %v3069_v14 = vor.u32 %v5956_v16, %v5955_v4  ;;  %v2781_v4 = vor.u32 %v5969_v20, %v5968_v2  ;;  %v5971_v16 = vld [vmem:[#allocation184_spill] sm:$0xff] }
 0x480   : > { %1936 = vmatpush.bf16.msrb.mxu1 %v2965_v28  ;;  %1962 = vmatpush.bf16.msrb.mxu3 %v2841_v23  ;;  %v5960_v23 = vld [vmem:[#allocation157_spill] sm:$0xff]  ;;  %v5983_v20 = vld [vmem:[#allocation172_spill] sm:$0xff] }
 0x481   : > { %v2969_v19 = vor.u32 %v5960_v23, %v5959_v11  ;;  %v5975_v23 = vld [vmem:[#allocation66_spill] sm:$0xff] }
 0x482   : > { %1898 = vmatmul.bf16.vlgmr.msrb.gmra.mxu2 %v5311_v12  ;;  %1974 = vmatpush.bf16.msrb.mxu0 %v2985_v56  ;;  %v5967_v56 = vld [vmem:[#allocation48_spill] sm:$0xff] }
 0x483   : > { %1942 = vmatpush.bf16.msra.mxu2 %v2825_v45  ;;  %1937 = vmatmul.bf16.vlgmr.msrb.gmra.mxu1 %v5311_v12  ;;  %v5958_v45 = vld [vmem:[#allocation87_spill] sm:$0xff] }
 0x484   : > { %1981 = vmatpush.bf16.msra.mxu1 %v2829_v13  ;;  %2007 = vmatpush.bf16.msra.mxu3 %v3085_v6  ;;  %v2793_v28 = vor.u32 %v5958_v45, %v5957_v15  ;;  %v5962_v13 = vld [vmem:[#allocation76_spill] sm:$0xff]  ;;  %v5973_v45 = vld [vmem:[#allocation70_spill] sm:$0xff] }
 0x485   : > { %1963 = vmatmul.bf16.vlgmr.msrb.gmra.mxu3 %v5317_v1  ;;  %v2797_v3 = vor.u32 %v5962_v13, %v5961_v9  ;;  %v5963_v6 = vld [vmem:[#allocation196_spill] sm:$0xff] }
 0x486   : > { %v3053_v10 = vor.u32 %v5964_v8, %v5963_v6  ;;  %1975 = vmatpush.bf16.msrb.mxu0 %v2969_v19  ;;  %v5976_v9 = vld [vmem:[#allocation180_spill] sm:$0xff]  ;;  %v5978_v6 = vld [vmem:[#allocation63_spill] sm:$0xff]  ;;  %v5979_v8 = vld [vmem:[#allocation65_spill] sm:$0xff] }
 0x487   : > { %1943 = vmatpush.bf16.msra.mxu2 %v2809_v7  ;;  %v5966_v7 = vld [vmem:[#allocation75_spill] sm:$0xff]  ;;  %v5977_v13 = vld [vmem:[#allocation176_spill] sm:$0xff] }
 0x488   : > { %1982 = vmatpush.bf16.msra.mxu1 %v2813_v22  ;;  %2008 = vmatpush.bf16.msra.mxu3 %v3069_v14  ;;  %v2777_v0 = vor.u32 %v5966_v7, %v5965_v5  ;;  %v5970_v22 = vld [vmem:[#allocation188_spill] sm:$0xff]  ;;  %v5972_v14 = vld [vmem:[#allocation67_spill] sm:$0xff] }
 0x489   : > { %v3037_v15 = vor.u32 %v5971_v16, %v5970_v22  ;;  %1976 = vmatmul.bf16.vlgmr.msrb.gmra.mxu0 %v5311_v12  ;;  %v2761_v11 = vor.u32 %v5973_v45, %v5972_v14  ;;  %v5980_v5 = vld [vmem:[#allocation47_spill] sm:$0xff]  ;;  %v5981_v7 = vld [vmem:[#allocation64_spill] sm:$0xff]  ;;  %v5985_v16 = vld [vmem:[#allocation58_spill] sm:$0xff] }
 0x48a   : > { %2084 = vmatpush.bf16.xpose.msra.mxu0 %v5967_v56  ;;  %v5987_v45 = vld [vmem:[#allocation59_spill] sm:$0xff] }
 0x48b   : > { %1944 = vmatpush.bf16.msra.mxu2 %v2793_v28  ;;  %v5974_v28 = vld [vmem:[#allocation69_spill] sm:$0xff] }
 0x48c   : > { %1983 = vmatpush.bf16.msra.mxu1 %v2797_v3  ;;  %2009 = vmatpush.bf16.msra.mxu3 %v3053_v10  ;;  %v2765_v19 = vor.u32 %v5975_v23, %v5974_v28  ;;  %v3021_v3 = vor.u32 %v5977_v13, %v5976_v9  ;;  %v2745_v10 = vor.u32 %v5979_v8, %v5978_v6  ;;  %v5989_v23 = vld [vmem:[#allocation164_spill] sm:$0xff]  ;;  %v5992_v6 = vld [vmem:[#allocation54_spill] sm:$0xff] }
 0x48d   : > { %v5990_v9 = vld [vmem:[#allocation160_spill] sm:$0xff] }
 0x48e   : > { %v2989_v13 = vor.u32 %v5990_v9, %v5989_v23  ;;  %v6003_v23 = vld [vmem:[#allocation136_spill] sm:$0xff]  ;;  %v6004_v9 = vld [vmem:[#allocation133_spill] sm:$0xff] }
 0x48f   : > { %1945 = vmatpush.bf16.msra.mxu2 %v2777_v0  ;;  %v5982_v0 = vld [vmem:[#allocation62_spill] sm:$0xff] }
 0x490   : > { %1984 = vmatpush.bf16.msra.mxu1 %v2781_v4  ;;  %2010 = vmatpush.bf16.msra.mxu3 %v3037_v15  ;;  %v2749_v2 = vor.u32 %v5982_v0, %v5981_v7  ;;  %v5984_v4 = vld [vmem:[#allocation168_spill] sm:$0xff]  ;;  %v5995_v0 = vld [vmem:[#allocation146_spill] sm:$0xff] }
 0x491   : > { %v3005_v22 = vor.u32 %v5984_v4, %v5983_v20  ;;  %v5986_v15 = vld [vmem:[#allocation60_spill] sm:$0xff]  ;;  %v5996_v20 = vld [vmem:[#allocation53_spill] sm:$0xff] }
 0x492   : > { %2085 = vmatpush.bf16.xpose.msra.mxu0 %v5980_v5  ;;  %v2729_v14 = vor.u32 %v5986_v15, %v5985_v16  ;;  %v5994_v7 = vld [vmem:[#allocation148_spill] sm:$0xff]  ;;  %v5997_v4 = vld [vmem:[#allocation49_spill] sm:$0xff] }
 0x493   : > { %1946 = vmatpush.bf16.msra.mxu2 %v2761_v11  ;;  %v5988_v11 = vld [vmem:[#allocation56_spill] sm:$0xff] }
 0x494   : > { %1985 = vmatpush.bf16.msra.mxu1 %v2765_v19  ;;  %2011 = vmatpush.bf16.msra.mxu3 %v3021_v3  ;;  %v2733_v28 = vor.u32 %v5988_v11, %v5987_v45  ;;  %v5991_v19 = vld [vmem:[#allocation50_spill] sm:$0xff]  ;;  %v5998_v16 = vld [vmem:[#allocation156_spill] sm:$0xff] }
 0x495   : > { %v2713_v8 = vor.u32 %v5992_v6, %v5991_v19  ;;  %v5993_v3 = vld [vmem:[#allocation46_spill] sm:$0xff]  ;;  %v5999_v15 = vld [vmem:[#allocation152_spill] sm:$0xff] }
 0x496   : > { %v6000_v45 = vld [vmem:[#allocation142_spill] sm:$0xff]  ;;  %v6006_v6 = vld [vmem:[#allocation128_spill] sm:$0xff] }
 0x497   : > { %1947 = vmatpush.bf16.msra.mxu2 %v2745_v10  ;;  %v2957_v10 = vor.u32 %v5995_v0, %v5994_v7  ;;  %v6005_v19 = vld [vmem:[#allocation130_spill] sm:$0xff] }
 0x498   : > { %1986 = vmatpush.bf16.msra.mxu1 %v2749_v2  ;;  %2012 = vmatpush.bf16.msra.mxu3 %v3005_v22  ;;  %v2717_v2 = vor.u32 %v5997_v4, %v5996_v20  ;;  %v2973_v22 = vor.u32 %v5999_v15, %v5998_v16  ;;  %v6007_v7 = vld [vmem:[#allocation42_spill] sm:$0xff]  ;;  %v6012_v16 = vld [vmem:[#allocation41_spill] sm:$0xff]  ;;  %v6013_v15 = vld [vmem:[#allocation115_spill] sm:$0xff] }
 0x499   : > { %v6008_v0 = vld [vmem:[#allocation126_spill] sm:$0xff] }
 0x49a   : > { %2086 = vmatpush.bf16.xpose.msra.mxu0 %v5993_v3  ;;  %v6010_v4 = vld [vmem:[#allocation122_spill] sm:$0xff] }
 0x49b   : > { %1948 = vmatpush.bf16.msra.mxu2 %v2729_v14  ;;  %v6001_v14 = vld [vmem:[#allocation139_spill] sm:$0xff] }
 0x49c   : > { %1987 = vmatpush.bf16.msra.mxu1 %v2733_v28  ;;  %2013 = vmatpush.bf16.msra.mxu3 %v2989_v13  ;;  %v2941_v11 = vor.u32 %v6001_v14, %v6000_v45  ;;  %v6002_v28 = vld [vmem:[#allocation45_spill] sm:$0xff]  ;;  %v2925_v13 = vor.u32 %v6004_v9, %v6003_v23  ;;  %v6017_v9 = vld [vmem:[#allocation40_spill] sm:$0xff] }
 0x49d   : > { %v6015_v14 = vld [vmem:[#allocation109_spill] sm:$0xff] }
 0x49f   : > { %1949 = vmatpush.bf16.msra.mxu2 %v2713_v8  ;;  %v2909_v8 = vor.u32 %v6006_v6, %v6005_v19  ;;  %v6019_v6 = vld [vmem:[#allocation213_spill] sm:$0xff] }
 0x4a0   : > { %1988 = vmatpush.bf16.msra.mxu1 %v2717_v2  ;;  %2014 = vmatpush.bf16.msra.mxu3 %v2973_v22  ;;  %v6011_v2 = vld [vmem:[#allocation119_spill] sm:$0xff]  ;;  %v6014_v22 = vld [vmem:[#allocation112_spill] sm:$0xff] }
 0x4a1   : > { %v2861_v45 = vor.u32 %v6014_v22, %v6013_v15 }
 0x4a2   : > { %1950 = vmatmul.bf16.vlgmr.msra.gmra.mxu2 %v5311_v12  ;;  %2087 = vmatpush.bf16.xpose.msra.mxu0 %v6002_v28 }
 0x4a3   : > { %1994 = vmatpush.bf16.msrb.mxu2 %v2957_v10  ;;  %1989 = vmatmul.bf16.vlgmr.msra.gmra.mxu1 %v5311_v12  ;;  %v6009_v10 = vld [vmem:[#allocation124_spill] sm:$0xff] }
 0x4a4   : > { %2112 = vmatpush.bf16.msrb.mxu1 %v5967_v56  ;;  %2015 = vmatmul.bf16.vlgmr.msra.gmra.mxu3 %v5311_v12  ;;  %v2893_v20 = vor.u32 %v6009_v10, %v6008_v0  ;;  %v2877_v12 = vor.u32 %v6011_v2, %v6010_v4  ;;  %v1377_v2 = vperm.slane %v6019_v6, 1 }
 0x4a7   : > { %1995 = vmatpush.bf16.msrb.mxu2 %v2941_v11  ;;  %v6016_v11 = vld [vmem:[#allocation105_spill] sm:$0xff] }
 0x4a8   : > { %2113 = vmatpush.bf16.msrb.mxu1 %v5980_v5  ;;  %v2845_v23 = vor.u32 %v6016_v11, %v6015_v14 }
 0x4aa   : > { %2088 = vmatpush.bf16.xpose.msra.mxu0 %v6007_v7 }
 0x4ab   : > { %1996 = vmatpush.bf16.msrb.mxu2 %v2925_v13  ;;  %v6018_v13 = vld [vmem:[#allocation39_spill] sm:$0xff] }
 0x4ac   : > { %2114 = vmatpush.bf16.msrb.mxu1 %v5993_v3 }
 0x4af   : > { %1997 = vmatpush.bf16.msrb.mxu2 %v2909_v8  ;;  %v1376_v8 = vperm.slane %v6019_v6, 0 }
 0x4b0   : > { %2115 = vmatpush.bf16.msrb.mxu1 %v6002_v28 }
 0x4b2   : > { %2089 = vmatpush.bf16.xpose.msra.mxu0 %v6012_v16 }
 0x4b3   : > { %1998 = vmatpush.bf16.msrb.mxu2 %v2893_v20 }
 0x4b4   : > { %2116 = vmatpush.bf16.msrb.mxu1 %v6007_v7 }
 0x4b7   : > { %1999 = vmatpush.bf16.msrb.mxu2 %v2877_v12 }
 0x4b8   : > { %2117 = vmatpush.bf16.msrb.mxu1 %v6012_v16 }
 0x4ba   : > { %2090 = vmatpush.bf16.xpose.msra.mxu0 %v6017_v9 }
 0x4bb   : > { %2000 = vmatpush.bf16.msrb.mxu2 %v2861_v45 }
 0x4bc   : > { %2118 = vmatpush.bf16.msrb.mxu1 %v6017_v9 }
 0x4bf   : > { %2001 = vmatpush.bf16.msrb.mxu2 %v2845_v23 }
 0x4c0   : > { %2119 = vmatpush.bf16.msrb.mxu1 %v6018_v13 }
 0x4c2   : > { %2002 = vmatmul.bf16.vlgmr.msrb.gmra.mxu2 %v5317_v1  ;;  %2091 = vmatpush.bf16.xpose.msra.mxu0 %v6018_v13 }
 0x4e0   : > { %v1886_v19 = vpop.f32.mrf.mxu1 }
 0x4e5   : > { %v1873_v0 = vpop.f32.mrf.mxu2 }
 0x4e6   : > { %v1874_v10 = vadd.f32 %v1873_v0, %v1376_v8  ;;  %v1925_v22 = vpop.f32.mrf.mxu0 }
 0x4e8   : > { %v1887_v20 = vadd.f32 %v1886_v19, %v1874_v10  ;;  %v1888_v4 = vpop.f32.mrf.mxu1  ;;  %v1912_v12 = vpop.f32.mrf.mxu3 }
 0x4e9   : > { %v1913_v15 = vadd.f32 %v1912_v12, %v1377_v2 }
 0x4eb   : > { %v1926_v14 = vadd.f32 %v1925_v22, %v1913_v15 }
 0x4ed   : > { %v1875_v45 = vpop.f32.mrf.mxu2 }
 0x4ee   : > { %v1927_v23 = vpop.f32.mrf.mxu0 }
 0x4f0   : > { %v1914_v11 = vpop.f32.mrf.mxu3 }
 0x500   : > { %v1938_v3 = vpop.f32.mrf.mxu1 }
 0x501   : > { %v1939_v1 = vadd.f32 %v1938_v3, %v1926_v14 }
 0x503   : > { %v3087_v5 = vmul.f32 -1.442695, %v1939_v1 }
 0x505   : > { %v1899_v7 = vpop.f32.mrf.mxu2  ;;  %3577 = vpow2.f32 %v3087_v5 }
 0x506   : > { %v1900_v9 = vadd.f32 %v1899_v7, %v1887_v20  ;;  %v1977_v16 = vpop.f32.mrf.mxu0  ;;  %v1378_v20 = vperm.slane %v6019_v6, 2 }
 0x508   : > { %v1964_v13 = vpop.f32.mrf.mxu3  ;;  %v3086_v8 = vmul.f32 -1.442695, %v1900_v9  ;;  %v1940_v19 = vpop.f32.mrf.mxu1 }
 0x50a   : > { %3579 = vpow2.f32 %v3086_v8 }
 0x50b   : > { %v3578_v0 = vpop.eup %3577 }
 0x50c   : > { %v2042_v10 = vadd.f32 1.0, %v3578_v0 }
 0x50d   : > { %v1901_v4 = vpop.f32.mrf.mxu2 }
 0x50e   : > { %3581 = vrcp.f32 %v2042_v10  ;;  %v1979_v12 = vpop.f32.mrf.mxu0  ;;  %vm2048_vm1 = vweird.f32 %v2042_v10  ;;  %v2054_v8 = vand.u32 2147483648, %v2042_v10 }
 0x510   : > { %v1966_v2 = vpop.f32.mrf.mxu3  ;;  %v3580_v15 = vpop.eup %3579  ;;  %v2055_v18 = vor.u32 1.1754944e-38, %v2054_v8 }
 0x511   : > { %v2023_v22 = vadd.f32 1.0, %v3580_v15  ;;  %v2052_v2 = vand.u32 2147483647, %v2042_v10 }
 0x513   : > { %3583 = vrcp.f32 %v2023_v22  ;;  %vm2053_vm5 = vcmp.eq.f32.partialorder %v2052_v2, 8.507059e+37  ;;  %vm2029_vm6 = vweird.f32 %v2023_v22 }
 0x514   : > { %v3582_v45 = vpop.eup %3581 }
 0x515   : > { %v2044_v3 = vmul.f32 %v3582_v45, %v2042_v10  ;;  %vm2049_vm2 = vweird.f32 %v3582_v45 }
 0x516   : > { %vm5476_vm3 = vmor %vm2048_vm1, %vm2049_vm2 }
 0x517   : > { %v2045_v5 = vsub.f32 1.0, %v2044_v3 }
 0x519   : > { %v3584_v14 = vpop.eup %3583  ;;  %v2046_v23 = vmul.f32 %v3582_v45, %v2045_v5  ;;  %v2035_v5 = vand.u32 2147483648, %v2023_v22 }
 0x51a   : > { %v2025_v11 = vmul.f32 %v3584_v14, %v2023_v22  ;;  %vm2030_vm4 = vweird.f32 %v3584_v14 }
 0x51b   : > { %v2047_v4 = vadd.f32 %v3582_v45, %v2046_v23  ;;  %vm2031_vm7 = vmor %vm2029_vm6, %vm2030_vm4  ;;  %v2036_v25 = vor.u32 1.1754944e-38, %v2035_v5 }
 0x51c   : > { %v2026_v9 = vsub.f32 1.0, %v2025_v11 }
 0x51d   : > { %v2051_v11 = vsel %vm5476_vm3, %v3582_v45, %v2047_v4  ;;  %v1379_v45 = vperm.slane %v6019_v6, 3 }
 0x51e   : > { %v2027_v0 = vmul.f32 %v3584_v14, %v2026_v9  ;;  %v2056_v9 = vsel %vm2053_vm5, %v2055_v18, %v2051_v11 }
 0x520   : > { %v1990_v7 = vpop.f32.mrf.mxu1  ;;  %v2028_v24 = vadd.f32 %v3584_v14, %v2027_v0 }
 0x521   : > { %v1991_v0 = vadd.f32 %v1990_v7, %v1379_v45 }
 0x522   : > { %v2032_v23 = vsel %vm2031_vm7, %v3584_v14, %v2028_v24 }
 0x525   : > { %v1951_v1 = vpop.f32.mrf.mxu2 }
 0x526   : > { %v1952_v19 = vadd.f32 %v1951_v1, %v1378_v20  ;;  %v2033_v20 = vand.u32 2147483647, %v2023_v22 }
 0x527   : > { %v2016_v12 = vpop.f32.mrf.mxu3 }
 0x528   : > { %v1965_v17 = vadd.f32 %v1964_v13, %v1952_v19  ;;  %v1992_v3 = vpop.f32.mrf.mxu1  ;;  %vm2034_vm8 = vcmp.eq.f32.partialorder %v2033_v20, 8.507059e+37  ;;  %v6022_v13 = vld [vmem:[#allocation214_spill] sm:$0xff] }
 0x529   : > { %v2078_v8 = vmul.f32 %v6022_v13, %v2056_v9 }
 0x52a   : > { %v1978_v21 = vadd.f32 %v1977_v16, %v1965_v17  ;;  %v2037_v16 = vsel %vm2034_vm8, %v2036_v25, %v2032_v23 }
 0x52c   : > { %3585 = vtanh.f32 %v1978_v21 }
 0x52d   : > { %v1953_v10 = vpop.f32.mrf.mxu2 }
 0x52f   : > { %v2018_v1 = vpop.f32.mrf.mxu3 }
 0x532   : > { %v3586_v17 = vpop.eup %3585 }
 0x533   : > { %v2079_v19 = vmul.f32 %v3586_v17, %v2037_v16 }
 0x535   : > { %v2080_v20 = vadd.f32 %v2079_v19, %v2078_v8  }
 0x545   : > { %v2003_v4 = vpop.f32.mrf.mxu2 }
 0x546   : > { %v2004_v21 = vadd.f32 %v2003_v4, %v1991_v0 }
 0x548   : > { %v2017_v2 = vadd.f32 %v2016_v12, %v2004_v21 }
 0x54a   : > { %v3088_v22 = vmul.f32 -1.442695, %v2017_v2 }
 0x54c   : > { %3587 = vpow2.f32 %v3088_v22 }
 0x54d   : > { %v2005_v15 = vpop.f32.mrf.mxu2 }
 0x552   : > { %v3588_v18 = vpop.eup %3587 }
 0x553   : > { %v2062_v24 = vadd.f32 1.0, %v3588_v18 }
 0x555   : > { %3589 = vrcp.f32 %v2062_v24  ;;  %v2074_v5 = vand.u32 2147483648, %v2062_v24  ;;  %v2072_v10 = vand.u32 2147483647, %v2062_v24  ;;  %vm2068_vm10 = vweird.f32 %v2062_v24 }
 0x556   : > { %3591 = vtanh.f32 %v2080_v20 }
 0x557   : > { %v2075_v7 = vor.u32 1.1754944e-38, %v2074_v5  ;;  %vm2073_vm12 = vcmp.eq.f32.partialorder %v2072_v10, 8.507059e+37  ;;  %v3348_v10 = vld [vmem:[#allocation25 + $0x38] sm:$0xff] (%p1366_p1) }
 0x55b   : > { %v3590_v14 = vpop.eup %3589 }
 0x55c   : > { %v2064_v3 = vmul.f32 %v3590_v14, %v2062_v24  ;;  %vm2069_vm9 = vweird.f32 %v3590_v14  ;;  %v3592_v12 = vpop.eup %3591 }
 0x55d   : > { %vm2070_vm11 = vmor %vm2068_vm10, %vm2069_vm9 }
 0x55e   : > { %v2065_v11 = vsub.f32 1.0, %v2064_v3 }
 0x560   : > { %v2066_v25 = vmul.f32 %v3590_v14, %v2065_v11 }
 0x562   : > { %v2067_v9 = vadd.f32 %v3590_v14, %v2066_v25 }
 0x564   : > { %v2071_v23 = vsel %vm2070_vm11, %v3590_v14, %v2067_v9  ;;  %v3356_v9 = vld [vmem:[#allocation25 + $0x78] sm:$0xff] (%p1366_p1) }
 0x565   : > { %v2076_v1 = vsel %vm2073_vm12, %v2075_v7, %v2071_v23  ;;  %2272 = vmatpush.bf16.msra.mxu1 (%p1366_p1), %v3356_v9  ;;  %v3347_v7 = vld [vmem:[#allocation25 + $0x30] sm:$0xff] (%p1366_p1) }
 0x566   : > { %v2082_v14 = vmul.f32 %v3592_v12, %v2076_v1   ;;  %v3355_v23 = vld [vmem:[#allocation25 + $0x70] sm:$0xff] (%p1366_p1)  ;;  %v3364_v12 = vld [vmem:[#allocation27 + $0x38] sm:$0xff] (%p1366_p1)  ;;  %v3346_v1 = vld [vmem:[#allocation25 + $0x28] sm:$0xff] (%p1366_p1) }
 0x567   :  { %2355 = vmatpush.bf16.msra.mxu2 (%p1366_p1), %v3364_v12 }
 0x568   : > { %v5484_v13 = vpack.c.bf16 %v2082_v14, %v2082_v14  ;;  %v3353_v14 = vld [vmem:[#allocation25 + $0x60] sm:$0xff] (%p1366_p1) }
 0x569   :  { %2273 = vmatpush.bf16.msra.mxu1 (%p1366_p1), %v3355_v23 }
 0x56a   : > { %2092 = vmatmul.bf16.vlgmr.msra.gmra.mxu0 %v5484_v13 }
 0x56b   :  { %2259 = vmatpush.bf16.msra.mxu0 (%p1366_p1), %v3348_v10 }
 0x56f   :  { %2260 = vmatpush.bf16.msra.mxu0 (%p1366_p1), %v3347_v7 }
 0x573   :  { %2261 = vmatpush.bf16.msra.mxu0 (%p1366_p1), %v3346_v1 }
 0x5e7   : > { %v2093_v8 = vpop.f32.mrf.mxu0 }
 0x5e8   : > { %v2097_v16 = vsel %vm4861_vm0, %v2093_v8, -1e+30 }
 0x5e9   : > { %2098 = vmax.xlane.f32.xlu0 %v2097_v16  ;;  %v3363_v16 = vld [vmem:[#allocation27 + $0x30] sm:$0xff] (%p1366_p1) }
 0x5ea   :  { %2356 = vmatpush.bf16.msra.mxu2 (%p1366_p1), %v3363_v16 }
 0x5ef   : > { %v2095_v19 = vpop.f32.mrf.mxu0 }
 0x5f0   :  { %v3345_v19 = vld [vmem:[#allocation25 + $0x20] sm:$0xff] (%p1366_p1) }
 0x5f1   :  { %2262 = vmatpush.bf16.msra.mxu0 (%p1366_p1), %v3345_v19 }
 0x5f5   :  { %2263 = vmatpush.bf16.msra.mxu0 (%p1366_p1), %v3344_v33 }
 0x5f9   :  { %2264 = vmatpush.bf16.msra.mxu0 (%p1366_p1), %v3343_v40 }
 0x5fd   :  { %2265 = vmatpush.bf16.msra.mxu0 (%p1366_p1), %v3342_v57 }
 0x601   :  { %2266 = vmatpush.bf16.msra.mxu0 (%p1366_p1), %v3341_v53 }
 0x604   :  { %2267 = vmatmul.bf16.vlgmr.msra.gmra.mxu0 (%p1366_p1), %v5484_v13 }
 0x65c   : > { %v2099_v45 = vpop.xlane.xlu0 %2098 }
 0x65d   : > { %v2100_v0 = vsub.f32 %v2093_v8, %v2099_v45  ;;  %v3354_v8 = vld [vmem:[#allocation25 + $0x68] sm:$0xff] (%p1366_p1) }
 0x65e   :  { %2274 = vmatpush.bf16.msra.mxu1 (%p1366_p1), %v3354_v8 }
 0x65f   : > { %v2101_v4 = vmin.f32 %v2100_v0, 0.0  ;;  %v3362_v0 = vld [vmem:[#allocation27 + $0x28] sm:$0xff] (%p1366_p1) }
 0x660   :  { %2357 = vmatpush.bf16.msra.mxu2 (%p1366_p1), %v3362_v0 }
 0x661   : > { %v2102_v21 = vmul.f32 1.442695, %v2101_v4 }
 0x662   :  { %2275 = vmatpush.bf16.msra.mxu1 (%p1366_p1), %v3353_v14 }
 0x663   : > { %3593 = vpow2.f32 %v2102_v21 }
 0x664   :  { %2358 = vmatpush.bf16.msra.mxu2 (%p1366_p1), %v3361_v29 }
 0x666   :  { %2276 = vmatpush.bf16.msra.mxu1 (%p1366_p1), %v3352_v32 }
 0x668   :  { %2359 = vmatpush.bf16.msra.mxu2 (%p1366_p1), %v3360_v51 }
 0x669   : > { %v3594_v2 = vpop.eup %3593 }
 0x66a   : > { %v2104_v22 = vsel %vm4861_vm0, %v3594_v2, 0.0  ;;  %2277 = vmatpush.bf16.msra.mxu1 (%p1366_p1), %v3351_v50 }
 0x66b   : > { %2105 = vadd.xlane.f32.xlu0 %v2104_v22 }
 0x66c   :  { %2360 = vmatpush.bf16.msra.mxu2 (%p1366_p1), %v3359_v52 }
 0x66e   :  { %2278 = vmatpush.bf16.msra.mxu1 (%p1366_p1), %v3350_v31 }
 0x670   :  { %2361 = vmatpush.bf16.msra.mxu2 (%p1366_p1), %v3358_v55 }
 0x672   :  { %2279 = vmatpush.bf16.msra.mxu1 (%p1366_p1), %v3349_v37 }
 0x674   :  { %2362 = vmatpush.bf16.msra.mxu2 (%p1366_p1), %v3357_v34 }
 0x681   :  { %v2268_v41 = vpop.f32.mrf.mxu0 (%p1366_p1) }
 0x682   :  { %v2269_v36 = vadd.f32 (%p1366_p1), %v3597_v39, %v2268_v41 }
 0x689   :  { %v2270_v46 = vpop.f32.mrf.mxu0 (%p1366_p1) }
 0x6de   : > { %v2106_v15 = vpop.xlane.xlu0 %2105 }
 0x6df   : > { %vm2107_vm13 = vcmp.gt.f32.partialorder %v2106_v15, 0.0 }
 0x6e0   : > { %v2108_v18 = vsel %vm2107_vm13, %v2106_v15, 1.0 }
 0x6e1   : > { %3595 = vrcp.f32 %v2108_v18 }
 0x6e7   : > { %v3596_v24 = vpop.eup %3595 }
 0x6e8   : > { %v2110_v3 = vmul.f32 %v3596_v24, %v2104_v22 }
 0x6ea   : > { %v2111_v11 = vpack.c.bf16 %v2110_v3, %v2110_v3 }
 0x6ec   : > { %2120 = vmatmul.bf16.vlgmr.msrb.gmra.mxu1 %v2111_v11 }
 0x769   : > { %v2121_v5 = vpop.f32.mrf.mxu1  }
 0x76a   : > { %v6024_v45 = vmov %v2121_v5  ;;  %v2126_v54 = vpack.c.bf16 (%p1366_p1), %v2121_v5, %v2121_v5 }
 0x76c   :  { %2280 = vmatmul.bf16.vlgmr.msra.gmra.mxu1 (%p1366_p1), %v2126_v54 }
 0x76d   :  { %1368 = sbr.rel (!%p1366_p1) target bundleno = 1088 (0x440), region = 197 }
 0x771   : > { %v2123_v25 = vpop.f32.mrf.mxu1 }
 0x7e9   :  { %v2281_v27 = vpop.f32.mrf.mxu1 }
 0x7ea   :  { %v2282_v44 = vadd.f32 %v2281_v27, %v2269_v36 }
 0x7ec   :  { %v2285_v42 = vmax.f32 %v2282_v44, 0.0 }
 0x7ee   :  { %v2286_v43 = vpack.c.bf16 %v2285_v42, %v2285_v42 }
 0x7f0   :  { %2363 = vmatmul.bf16.vlgmr.msra.gmra.mxu2 %v2286_v43 }
 0x7f1   :  { %v2283_v47 = vpop.f32.mrf.mxu1 }
 0x873   :  { %v2364_v58 = vpop.f32.mrf.mxu2 }
 0x874   :  { %v2365_v30 = vadd.f32 %v3598_v38, %v2364_v58 }
 0x876   :  { %2368 = vst [vmem:[#allocation28] sm:$0xff] %v2365_v30 }
 0x877   :  { %2379 = dma.vmem_to_hbm [thread:$0]  %s2375_s1, 128, %s2377_s14, [#allocation4]  }
 0x87b   :  { %v2366_v59 = vpop.f32.mrf.mxu2 }
 0x87c   :  { %4097 = dma.done.wait [#allocation4], 128  }
 0x87d   :  { %4098 = vsyncadd [#allocation4], 4294967168 }
 0x87e   :  { %2384 = vsyncpa [#allocation3], 1 }
 0x87f   :  { %2385 = vsyncpa [#allocation8], 1 }
 0x880   :  { %2386 = vsyncpa [#allocation11], 1 }
 0x881   :  { %2387 = vsyncpa [#allocation14], 1 }
 0x882   :  { %2388 = vsyncpa [#allocation17], 1 }
 0x883   :  { %2389 = vsyncpa [#allocation20], 1 }
 0x884   :  { %2390 = vsyncpa [#allocation23], 1 }
 0x885   :  { %2391 = vsyncpa [#allocation26], 1 }
 0x886   :  { %2392 = vsyncpa [#allocation4], 1 }
 0x887   :  { %2393 = vsyncpa [#allocation5], 1 }

</bundles_post_ra>
